<compile_context>
chip_gen: v7x
topology: tpu7x:2x2x1
jax: 0.10.0
libtpu: 0.0.40
codegen_flags: <defaults>
</compile_context>

<pallas_src>
import math

import jax
import jax.numpy as jnp
from jax.experimental import pallas as pl
from jax.experimental.pallas import tpu as pltpu


# ------------------------------ Pallas wrapper ------------------------------ #
def smultihead_attention(input_Q, input_K, input_V, params, heads):
    """Pallas implementation of SMultiHeadAttention.forward(input_Q, input_K, input_V)."""
    B, N, T, C = input_Q.shape
    H = heads
    DH = C // H
    assert DH * H == C, "embed_size must be divisible by heads"
    NT = N * T  # rows ordered (n, t): row r = n*T + t

    # ---------------- batch-invariant prep, hoisted out of the kernel --------
    scale = 1.0 / math.sqrt(DH)

    def head_major(w):  # (C, C) -> (H, C, DH), head h = output columns h*DH:(h+1)*DH
        return jnp.transpose(w.reshape(C, H, DH), (1, 0, 2))

    wqkv = jnp.stack(
        [head_major(params["wq"] * scale),   # scale folded into W_Q
         head_major(params["wk"]),
         head_major(params["wv"])], axis=0)                       # (3, H, C, DH)
    wo = params["wo"]                                             # (C, C)
    bo = params["bo"].reshape(1, C)                               # (1, C)

    # pure metadata reshape — no HBM transpose pass
    q2 = input_Q.reshape(B, NT, C)
    k2 = input_K.reshape(B, NT, C)
    v2 = input_V.reshape(B, NT, C)

    # --------------------------------- kernel --------------------------------
    def kernel(q_r, k_r, v_r, wqkv_r, wo_r, bo_r, o_r, ctx_scr):
        xq, xk, xv = q_r[0], k_r[0], v_r[0]                       # (NT, C)

        # head-major projection straight from the MXU: (NT,C) x (H,C,DH) -> (H,NT,DH)
        def project(x, w_h):
            xb = jnp.broadcast_to(x[None], (H, NT, C))
            return jnp.einsum("hnc,hcd->hnd", xb, w_h,
                              preferred_element_type=jnp.float32)

        qh = project(xq, wqkv_r[0])                               # scale already folded
        kh = project(xk, wqkv_r[1])
        vh = project(xv, wqkv_r[2])

        # scores for every (head, query-row, key-row)
        s = jnp.einsum("hqd,hkd->hqk", qh, kh,
                       preferred_element_type=jnp.float32)        # (H, NT, NT)

        # in-kernel block-diagonal time mask: rows ordered (n, t), so a query may
        # only attend keys with the same (index mod T).  Integer mod has no cheap
        # vector lowering, so compute it with exact f32 math:
        #   for 0 <= i < NT, floor((i + 0.5) / T) == i // T exactly.
        inv_t = jnp.float32(1.0 / T)
        tf = jnp.float32(T)
        r1 = jax.lax.broadcasted_iota(jnp.int32, (NT, 1), 0).astype(jnp.float32)
        c1 = jax.lax.broadcasted_iota(jnp.int32, (1, NT), 1).astype(jnp.float32)
        rt = r1 - tf * jnp.floor((r1 + 0.5) * inv_t)              # (NT, 1) time id
        ct = c1 - tf * jnp.floor((c1 + 0.5) * inv_t)              # (1, NT) time id
        same_t = rt == ct                                         # (NT, NT) bool
        s = jnp.where(same_t[None, :, :], s, jnp.float32(-1e30))

        # softmax over keys (exact reciprocal for tight parity with reference)
        s_max = jnp.max(s, axis=-1, keepdims=True)
        e = jnp.exp(s - s_max)
        denom = jnp.sum(e, axis=-1, keepdims=True)
        attn = e / denom                                          # (H, NT, NT)

        ctx = jnp.einsum("hqk,hkd->hqd", attn, vh,
                         preferred_element_type=jnp.float32)      # (H, NT, DH)

        # pack heads back along lanes -> (NT, C), then ONE fused depth-C fc_out
        for h in range(H):
            ctx_scr[:, h * DH:(h + 1) * DH] = ctx[h]
        out = jnp.dot(ctx_scr[...], wo_r[...],
                      preferred_element_type=jnp.float32) + bo_r[...]
        o_r[0] = out.astype(o_r.dtype)                            # (NT, C)

    # advisory cost hint for the XLA scheduler
    flops_per_b = (2 * NT * C * C * 3            # head-major QKV projections
                   + 2 * H * NT * NT * DH        # scores
                   + 2 * H * NT * NT * DH        # context
                   + 2 * NT * C * C)             # fused fc_out
    bytes_per_b = 4 * (3 * NT * C + NT * C)
    bytes_const = 4 * (3 * H * C * DH + C * C + C)
    cost = pl.CostEstimate(flops=B * flops_per_b,
                           transcendentals=B * H * NT * NT,
                           bytes_accessed=B * bytes_per_b + bytes_const)

    out = pl.pallas_call(
        kernel,
        out_shape=jax.ShapeDtypeStruct((B, NT, C), input_Q.dtype),
        grid=(B,),
        in_specs=[
            pl.BlockSpec((1, NT, C), lambda b: (b, 0, 0)),        # input_Q rows
            pl.BlockSpec((1, NT, C), lambda b: (b, 0, 0)),        # input_K rows
            pl.BlockSpec((1, NT, C), lambda b: (b, 0, 0)),        # input_V rows
            pl.BlockSpec((3, H, C, DH), lambda b: (0, 0, 0, 0)),  # Wq*scale, Wk, Wv (head-major)
            pl.BlockSpec((C, C), lambda b: (0, 0)),               # fc_out weight
            pl.BlockSpec((1, C), lambda b: (0, 0)),               # fc_out bias
        ],
        out_specs=pl.BlockSpec((1, NT, C), lambda b: (b, 0, 0)),
        scratch_shapes=[pltpu.VMEM((NT, C), jnp.float32)],        # lane-packed ctx
        compiler_params=pltpu.CompilerParams(dimension_semantics=("parallel",)),
        cost_estimate=cost,
    )(q2, k2, v2, wqkv, wo, bo)

    return out.reshape(B, N, T, C)                                # free metadata reshape


# ------------------------ pure-JAX reference (PyTorch semantics) ------------ #
def _reference(input_Q, input_K, input_V, params, heads):
    B, N, T, C = input_Q.shape
    H, DH = heads, C // heads

    def lin(x, w):
        return jnp.einsum("bntc,cz->bntz", x, w)

    def heads_view(x):                              # view(B,N,T,H,DH).transpose(1,3)
        return x.reshape(B, N, T, H, DH).transpose(0, 3, 2, 1, 4)   # (B,H,T,N,DH)

    Q = heads_view(lin(input_Q, params["wq"]))
    K = heads_view(lin(input_K, params["wk"]))
    V = heads_view(lin(input_V, params["wv"]))
    scores = jnp.einsum("bhtnd,bhtmd->bhtnm", Q, K) / math.sqrt(DH)
    attn = jax.nn.softmax(scores, axis=-1)
    ctx = jnp.einsum("bhtnm,bhtmd->bhtnd", attn, V)
    ctx = ctx.transpose(0, 3, 2, 1, 4).reshape(B, N, T, C)          # permute(0,3,2,1,4)
    return lin(ctx, params["wo"]) + params["bo"]


# ------------------------------ parameter init ------------------------------ #
def init_params(key, C):
    """Weights stored in (in, out) math convention: y = x @ W (+ b)."""
    k1, k2, k3, k4, k5 = jax.random.split(key, 5)
    s = 1.0 / math.sqrt(C)
    return dict(
        wq=jax.random.normal(k1, (C, C), jnp.float32) * s,   # W_Q (bias=False)
        wk=jax.random.normal(k2, (C, C), jnp.float32) * s,   # W_K (bias=False)
        wv=jax.random.normal(k3, (C, C), jnp.float32) * s,   # W_V (bias=False)
        wo=jax.random.normal(k4, (C, C), jnp.float32) * s,   # fc_out weight
        bo=jax.random.normal(k5, (C,), jnp.float32) * s,     # fc_out bias
    )


# ----------------------------------- main ----------------------------------- #
if __name__ == "__main__":
    B, N, T, C = 2, 16, 8, 32        # batch, nodes (spatial), time steps, embed
    HEADS = 4

    root = jax.random.PRNGKey(0)
    kq, kk, kv, kp = jax.random.split(root, 4)
    input_Q = jax.random.normal(kq, (B, N, T, C), jnp.float32)
    input_K = jax.random.normal(kk, (B, N, T, C), jnp.float32)
    input_V = jax.random.normal(kv, (B, N, T, C), jnp.float32)
    params = init_params(kp, C)

    out = smultihead_attention(input_Q, input_K, input_V, params, HEADS)
    out = jax.block_until_ready(out)

    assert out.shape == (B, N, T, C)
    assert bool(jnp.all(jnp.isfinite(out)))

    ref = jax.block_until_ready(_reference(input_Q, input_K, input_V, params, HEADS))
    max_err = float(jnp.max(jnp.abs(out - ref)))
    assert max_err < 1e-3, f"mismatch vs reference: {max_err}"

    print("KERNEL_OK")
</pallas_src>

<mosaic_0001>
module attributes {stable_mosaic.version = 11 : i64} {
  func.func @kernel(%arg0: i32, %arg1: memref<1x128x32xf32, #tpu.memory_space<vmem>>, %arg2: memref<1x128x32xf32, #tpu.memory_space<vmem>>, %arg3: memref<1x128x32xf32, #tpu.memory_space<vmem>>, %arg4: memref<3x4x32x8xf32, #tpu.memory_space<vmem>>, %arg5: memref<32x32xf32, #tpu.memory_space<vmem>>, %arg6: memref<1x32xf32, #tpu.memory_space<vmem>>, %arg7: memref<1x128x32xf32, #tpu.memory_space<vmem>>, %arg8: memref<128x32xf32, #tpu.memory_space<vmem>>) attributes {dimension_semantics = [#tpu.dimension_semantics<parallel>], iteration_bounds = array<i64: 2>, scalar_prefetch = 0 : i64, scratch_operands = 1 : i64, tpu.core_type = #tpu.core_type<tc>, window_params = [{transform_indices = @transform_0, window_bounds = array<i64: 1, 128, 32>}, {transform_indices = @transform_1, window_bounds = array<i64: 1, 128, 32>}, {transform_indices = @transform_2, window_bounds = array<i64: 1, 128, 32>}, {pipeline_mode = #tpu.pipeline_mode<synchronous>, transform_indices = @transform_3, window_bounds = array<i64: 3, 4, 32, 8>}, {pipeline_mode = #tpu.pipeline_mode<synchronous>, transform_indices = @transform_4, window_bounds = array<i64: 32, 32>}, {pipeline_mode = #tpu.pipeline_mode<synchronous>, transform_indices = @transform_5, window_bounds = array<i64: 1, 32>}, {transform_indices = @transform_6, window_bounds = array<i64: 1, 128, 32>}]} {
    %c0 = arith.constant 0 : index
    %c0_0 = arith.constant 0 : index
    %c0_1 = arith.constant 0 : index
    %0 = vector.load %arg1[%c0, %c0_0, %c0_1] : memref<1x128x32xf32, #tpu.memory_space<vmem>>, vector<1x128x32xf32>
    %1 = vector.shape_cast %0 : vector<1x128x32xf32> to vector<128x32xf32>
    %c0_2 = arith.constant 0 : index
    %c0_3 = arith.constant 0 : index
    %c0_4 = arith.constant 0 : index
    %2 = vector.load %arg2[%c0_2, %c0_3, %c0_4] : memref<1x128x32xf32, #tpu.memory_space<vmem>>, vector<1x128x32xf32>
    %3 = vector.shape_cast %2 : vector<1x128x32xf32> to vector<128x32xf32>
    %c0_5 = arith.constant 0 : index
    %c0_6 = arith.constant 0 : index
    %c0_7 = arith.constant 0 : index
    %4 = vector.load %arg3[%c0_5, %c0_6, %c0_7] : memref<1x128x32xf32, #tpu.memory_space<vmem>>, vector<1x128x32xf32>
    %5 = vector.shape_cast %4 : vector<1x128x32xf32> to vector<128x32xf32>
    %c0_8 = arith.constant 0 : index
    %c0_9 = arith.constant 0 : index
    %c0_10 = arith.constant 0 : index
    %c0_11 = arith.constant 0 : index
    %6 = vector.load %arg4[%c0_8, %c0_9, %c0_10, %c0_11] : memref<3x4x32x8xf32, #tpu.memory_space<vmem>>, vector<1x4x32x8xf32>
    %7 = vector.shape_cast %6 : vector<1x4x32x8xf32> to vector<4x32x8xf32>
    %8 = vector.shape_cast %1 : vector<128x32xf32> to vector<1x128x32xf32>
    %9 = vector.shape_cast %8 : vector<1x128x32xf32> to vector<1x128x32xf32>
    %10 = vector.broadcast %9 : vector<1x128x32xf32> to vector<4x128x32xf32>
    "tpu.trace_start"() <{level = 10 : i32, message = "hnc,hcd->hnd"}> : () -> ()
    %cst = arith.constant dense<0.000000e+00> : vector<4x128x8xf32>
    %11 = tpu.matmul %10, %7, %cst {dimension_numbers = #tpu.dot_dimension_numbers<[2], [1], [1], [2], [0, 0, 0, 1, 1, 2], [0], [0]>} : vector<4x128x32xf32>, vector<4x32x8xf32>, vector<4x128x8xf32> -> vector<4x128x8xf32>
    "tpu.trace_stop"() : () -> ()
    %c1 = arith.constant 1 : index
    %c0_12 = arith.constant 0 : index
    %c0_13 = arith.constant 0 : index
    %c0_14 = arith.constant 0 : index
    %12 = vector.load %arg4[%c1, %c0_12, %c0_13, %c0_14] : memref<3x4x32x8xf32, #tpu.memory_space<vmem>>, vector<1x4x32x8xf32>
    %13 = vector.shape_cast %12 : vector<1x4x32x8xf32> to vector<4x32x8xf32>
    %14 = vector.shape_cast %3 : vector<128x32xf32> to vector<1x128x32xf32>
    %15 = vector.shape_cast %14 : vector<1x128x32xf32> to vector<1x128x32xf32>
    %16 = vector.broadcast %15 : vector<1x128x32xf32> to vector<4x128x32xf32>
    "tpu.trace_start"() <{level = 10 : i32, message = "hnc,hcd->hnd"}> : () -> ()
    %cst_15 = arith.constant dense<0.000000e+00> : vector<4x128x8xf32>
    %17 = tpu.matmul %16, %13, %cst_15 {dimension_numbers = #tpu.dot_dimension_numbers<[2], [1], [1], [2], [0, 0, 0, 1, 1, 2], [0], [0]>} : vector<4x128x32xf32>, vector<4x32x8xf32>, vector<4x128x8xf32> -> vector<4x128x8xf32>
    "tpu.trace_stop"() : () -> ()
    %c2 = arith.constant 2 : index
    %c0_16 = arith.constant 0 : index
    %c0_17 = arith.constant 0 : index
    %c0_18 = arith.constant 0 : index
    %18 = vector.load %arg4[%c2, %c0_16, %c0_17, %c0_18] : memref<3x4x32x8xf32, #tpu.memory_space<vmem>>, vector<1x4x32x8xf32>
    %19 = vector.shape_cast %18 : vector<1x4x32x8xf32> to vector<4x32x8xf32>
    %20 = vector.shape_cast %5 : vector<128x32xf32> to vector<1x128x32xf32>
    %21 = vector.shape_cast %20 : vector<1x128x32xf32> to vector<1x128x32xf32>
    %22 = vector.broadcast %21 : vector<1x128x32xf32> to vector<4x128x32xf32>
    "tpu.trace_start"() <{level = 10 : i32, message = "hnc,hcd->hnd"}> : () -> ()
    %cst_19 = arith.constant dense<0.000000e+00> : vector<4x128x8xf32>
    %23 = tpu.matmul %22, %19, %cst_19 {dimension_numbers = #tpu.dot_dimension_numbers<[2], [1], [1], [2], [0, 0, 0, 1, 1, 2], [0], [0]>} : vector<4x128x32xf32>, vector<4x32x8xf32>, vector<4x128x8xf32> -> vector<4x128x8xf32>
    "tpu.trace_stop"() : () -> ()
    "tpu.trace_start"() <{level = 10 : i32, message = "hqd,hkd->hqk"}> : () -> ()
    %cst_20 = arith.constant dense<0.000000e+00> : vector<4x128x128xf32>
    %24 = tpu.matmul %11, %17, %cst_20 {dimension_numbers = #tpu.dot_dimension_numbers<[2], [2], [1], [1], [0, 0, 0, 1, 1, 1], [0], [0]>} : vector<4x128x8xf32>, vector<4x128x8xf32>, vector<4x128x128xf32> -> vector<4x128x128xf32>
    "tpu.trace_stop"() : () -> ()
    %25 = tpu.iota {dimensions = array<i32: 0>} : vector<128x1xi32>
    %26 = arith.sitofp %25 : vector<128x1xi32> to vector<128x1xf32>
    %27 = tpu.iota {dimensions = array<i32: 1>} : vector<1x128xi32>
    %28 = arith.sitofp %27 : vector<1x128xi32> to vector<1x128xf32>
    %cst_21 = arith.constant 5.000000e-01 : f32
    %29 = vector.broadcast %cst_21 : f32 to vector<128x1xf32>
    %30 = arith.addf %26, %29 : vector<128x1xf32>
    %cst_22 = arith.constant 1.250000e-01 : f32
    %31 = vector.broadcast %cst_22 : f32 to vector<128x1xf32>
    %32 = arith.mulf %30, %31 : vector<128x1xf32>
    %33 = math.floor %32 : vector<128x1xf32>
    %cst_23 = arith.constant 8.000000e+00 : f32
    %34 = vector.broadcast %cst_23 : f32 to vector<128x1xf32>
    %35 = arith.mulf %34, %33 : vector<128x1xf32>
    %36 = arith.subf %26, %35 : vector<128x1xf32>
    %cst_24 = arith.constant 5.000000e-01 : f32
    %37 = vector.broadcast %cst_24 : f32 to vector<1x128xf32>
    %38 = arith.addf %28, %37 : vector<1x128xf32>
    %cst_25 = arith.constant 1.250000e-01 : f32
    %39 = vector.broadcast %cst_25 : f32 to vector<1x128xf32>
    %40 = arith.mulf %38, %39 : vector<1x128xf32>
    %41 = math.floor %40 : vector<1x128xf32>
    %cst_26 = arith.constant 8.000000e+00 : f32
    %42 = vector.broadcast %cst_26 : f32 to vector<1x128xf32>
    %43 = arith.mulf %42, %41 : vector<1x128xf32>
    %44 = arith.subf %28, %43 : vector<1x128xf32>
    %45 = vector.broadcast %36 : vector<128x1xf32> to vector<128x128xf32>
    %46 = vector.broadcast %44 : vector<1x128xf32> to vector<128x128xf32>
    %47 = arith.cmpf oeq, %45, %46 : vector<128x128xf32>
    %48 = vector.shape_cast %47 : vector<128x128xi1> to vector<1x128x128xi1>
    %cst_27 = arith.constant -1.000000e+30 : f32
    %49 = vector.shape_cast %48 : vector<1x128x128xi1> to vector<1x128x128xi1>
    %50 = vector.broadcast %49 : vector<1x128x128xi1> to vector<4x128x128xi1>
    %51 = vector.broadcast %cst_27 : f32 to vector<4x128x128xf32>
    %52 = arith.select %50, %24, %51 : vector<4x128x128xi1>, vector<4x128x128xf32>
    %cst_28 = arith.constant dense<0xFF800000> : vector<4x128xf32>
    %53 = vector.multi_reduction <maximumf>, %52, %cst_28 [2] : vector<4x128x128xf32> to vector<4x128xf32>
    %54 = vector.shape_cast %53 : vector<4x128xf32> to vector<4x128x1xf32>
    %55 = vector.broadcast %54 : vector<4x128x1xf32> to vector<4x128x128xf32>
    %56 = arith.subf %52, %55 : vector<4x128x128xf32>
    %57 = math.exp %56 : vector<4x128x128xf32>
    %cst_29 = arith.constant dense<0.000000e+00> : vector<4x128xf32>
    %58 = vector.multi_reduction <add>, %57, %cst_29 [2] : vector<4x128x128xf32> to vector<4x128xf32>
    %59 = vector.shape_cast %58 : vector<4x128xf32> to vector<4x128x1xf32>
    %60 = vector.broadcast %59 : vector<4x128x1xf32> to vector<4x128x128xf32>
    %61 = arith.divf %57, %60 : vector<4x128x128xf32>
    "tpu.trace_start"() <{level = 10 : i32, message = "hqk,hkd->hqd"}> : () -> ()
    %cst_30 = arith.constant dense<0.000000e+00> : vector<4x128x8xf32>
    %62 = tpu.matmul %61, %23, %cst_30 {dimension_numbers = #tpu.dot_dimension_numbers<[2], [1], [1], [2], [0, 0, 0, 1, 1, 2], [0], [0]>} : vector<4x128x128xf32>, vector<4x128x8xf32>, vector<4x128x8xf32> -> vector<4x128x8xf32>
    "tpu.trace_stop"() : () -> ()
    %63 = vector.extract_strided_slice %62 {offsets = [0, 0, 0], sizes = [1, 128, 8], strides = [1, 1, 1]} : vector<4x128x8xf32> to vector<1x128x8xf32>
    %64 = vector.shape_cast %63 : vector<1x128x8xf32> to vector<128x8xf32>
    %c0_31 = arith.constant 0 : index
    %c0_32 = arith.constant 0 : index
    %65 = vector.load %arg8[%c0_31, %c0_32] : memref<128x32xf32, #tpu.memory_space<vmem>>, vector<128x8xf32>
    tpu.vector_store %arg8[%c0_31, %c0_32], %64 {strides = array<i32>} : memref<128x32xf32, #tpu.memory_space<vmem>>, vector<128x8xf32>,
    %66 = vector.extract_strided_slice %62 {offsets = [1, 0, 0], sizes = [1, 128, 8], strides = [1, 1, 1]} : vector<4x128x8xf32> to vector<1x128x8xf32>
    %67 = vector.shape_cast %66 : vector<1x128x8xf32> to vector<128x8xf32>
    %c0_33 = arith.constant 0 : index
    %c8 = arith.constant 8 : index
    %68 = vector.load %arg8[%c0_33, %c8] : memref<128x32xf32, #tpu.memory_space<vmem>>, vector<128x8xf32>
    tpu.vector_store %arg8[%c0_33, %c8], %67 {strides = array<i32>} : memref<128x32xf32, #tpu.memory_space<vmem>>, vector<128x8xf32>,
    %69 = vector.extract_strided_slice %62 {offsets = [2, 0, 0], sizes = [1, 128, 8], strides = [1, 1, 1]} : vector<4x128x8xf32> to vector<1x128x8xf32>
    %70 = vector.shape_cast %69 : vector<1x128x8xf32> to vector<128x8xf32>
    %c0_34 = arith.constant 0 : index
    %c16 = arith.constant 16 : index
    %71 = vector.load %arg8[%c0_34, %c16] : memref<128x32xf32, #tpu.memory_space<vmem>>, vector<128x8xf32>
    tpu.vector_store %arg8[%c0_34, %c16], %70 {strides = array<i32>} : memref<128x32xf32, #tpu.memory_space<vmem>>, vector<128x8xf32>,
    %72 = vector.extract_strided_slice %62 {offsets = [3, 0, 0], sizes = [1, 128, 8], strides = [1, 1, 1]} : vector<4x128x8xf32> to vector<1x128x8xf32>
    %73 = vector.shape_cast %72 : vector<1x128x8xf32> to vector<128x8xf32>
    %c0_35 = arith.constant 0 : index
    %c24 = arith.constant 24 : index
    %74 = vector.load %arg8[%c0_35, %c24] : memref<128x32xf32, #tpu.memory_space<vmem>>, vector<128x8xf32>
    tpu.vector_store %arg8[%c0_35, %c24], %73 {strides = array<i32>} : memref<128x32xf32, #tpu.memory_space<vmem>>, vector<128x8xf32>,
    %c0_36 = arith.constant 0 : index
    %c0_37 = arith.constant 0 : index
    %75 = vector.load %arg8[%c0_36, %c0_37] : memref<128x32xf32, #tpu.memory_space<vmem>>, vector<128x32xf32>
    %c0_38 = arith.constant 0 : index
    %c0_39 = arith.constant 0 : index
    %76 = vector.load %arg5[%c0_38, %c0_39] : memref<32x32xf32, #tpu.memory_space<vmem>>, vector<32x32xf32>
    %cst_40 = arith.constant dense<0.000000e+00> : vector<128x32xf32>
    %77 = tpu.matmul %75, %76, %cst_40 {dimension_numbers = #tpu.dot_dimension_numbers<[1], [0], [0], [1], [0, 0, 1, 1], [], []>} : vector<128x32xf32>, vector<32x32xf32>, vector<128x32xf32> -> vector<128x32xf32>
    %c0_41 = arith.constant 0 : index
    %c0_42 = arith.constant 0 : index
    %78 = vector.load %arg6[%c0_41, %c0_42] : memref<1x32xf32, #tpu.memory_space<vmem>>, vector<1x32xf32>
    %79 = vector.broadcast %78 : vector<1x32xf32> to vector<128x32xf32>
    %80 = arith.addf %77, %79 : vector<128x32xf32>
    %c0_43 = arith.constant 0 : index
    %c0_44 = arith.constant 0 : index
    %c0_45 = arith.constant 0 : index
    %81 = vector.load %arg7[%c0_43, %c0_44, %c0_45] : memref<1x128x32xf32, #tpu.memory_space<vmem>>, vector<1x128x32xf32>
    %82 = vector.shape_cast %81 : vector<1x128x32xf32> to vector<128x32xf32>
    %83 = vector.shape_cast %80 : vector<128x32xf32> to vector<1x128x32xf32>
    tpu.vector_store %arg7[%c0_43, %c0_44, %c0_45], %83 {strides = array<i32>} : memref<1x128x32xf32, #tpu.memory_space<vmem>>, vector<1x128x32xf32>,
    return
  }
  func.func @transform_0(%arg0: i32) -> (i32, i32, i32) {
    %c0_i32 = arith.constant 0 : i32
    %c0_i32_0 = arith.constant 0 : i32
    %c0_i32_1 = arith.constant 0 : i32
    return %arg0, %c0_i32, %c0_i32_0 : i32, i32, i32
  }
  func.func @transform_1(%arg0: i32) -> (i32, i32, i32) {
    %c0_i32 = arith.constant 0 : i32
    %c0_i32_0 = arith.constant 0 : i32
    %c0_i32_1 = arith.constant 0 : i32
    return %arg0, %c0_i32, %c0_i32_0 : i32, i32, i32
  }
  func.func @transform_2(%arg0: i32) -> (i32, i32, i32) {
    %c0_i32 = arith.constant 0 : i32
    %c0_i32_0 = arith.constant 0 : i32
    %c0_i32_1 = arith.constant 0 : i32
    return %arg0, %c0_i32, %c0_i32_0 : i32, i32, i32
  }
  func.func @transform_3(%arg0: i32) -> (i32, i32, i32, i32) {
    %c0_i32 = arith.constant 0 : i32
    %c0_i32_0 = arith.constant 0 : i32
    %c0_i32_1 = arith.constant 0 : i32
    %c0_i32_2 = arith.constant 0 : i32
    %c0_i32_3 = arith.constant 0 : i32
    return %c0_i32, %c0_i32_0, %c0_i32_1, %c0_i32_2 : i32, i32, i32, i32
  }
  func.func @transform_4(%arg0: i32) -> (i32, i32) {
    %c0_i32 = arith.constant 0 : i32
    %c0_i32_0 = arith.constant 0 : i32
    %c0_i32_1 = arith.constant 0 : i32
    return %c0_i32, %c0_i32_0 : i32, i32
  }
  func.func @transform_5(%arg0: i32) -> (i32, i32) {
    %c0_i32 = arith.constant 0 : i32
    %c0_i32_0 = arith.constant 0 : i32
    %c0_i32_1 = arith.constant 0 : i32
    return %c0_i32, %c0_i32_0 : i32, i32
  }
  func.func @transform_6(%arg0: i32) -> (i32, i32, i32) {
    %c0_i32 = arith.constant 0 : i32
    %c0_i32_0 = arith.constant 0 : i32
    %c0_i32_1 = arith.constant 0 : i32
    return %arg0, %c0_i32, %c0_i32_0 : i32, i32, i32
  }
}

</mosaic_0001>

<bundles_post_ra>
// kernel: tpu_custom_call.1
= control target key start
LH: loop header
LB: loop body
LE: loop exit
PB: predicated region body
PF: predicated region fallthrough
CT: control target
= control target key end

     0   :  { %s7712_s21 = smov 0   ;;  %s10013_s0 = inlined_call_operand.vmem [shape: f32[2,128,32], index: 0, kind: input, shape index: {}]   ;;  %s10014_s1 = inlined_call_operand.vmem [shape: f32[2,128,32], index: 1, kind: input, shape index: {}]   ;;  %s10015_s2 = inlined_call_operand.vmem [shape: f32[2,128,32], index: 2, kind: input, shape index: {}]   ;;  %s10016_s3 = inlined_call_operand.vmem [shape: f32[3,4,32,8], index: 3, kind: input, shape index: {}]   ;;  %s10017_s4 = inlined_call_operand.vmem [shape: f32[32,32], index: 4, kind: input, shape index: {}]   ;;  %s10018_s5 = inlined_call_operand.vmem [shape: f32[1,32], index: 5, kind: input, shape index: {}]   ;;  %s10019_s6 = inlined_call_operand.vmem [shape: f32[2,128,32], index: 6, kind: output, shape index: {}]  }
   0x1 LB: > { %s5203_s22 = sadd.s32 4294967295, %s7672_s21   ;;  %p5207_p0 = scmp.ge.s32.totalorder %s7672_s21, 1  ;;  %s7672_s21 = sphi %s7712_s21, %s16_s21  }
   0x2   : > { %p232_p1 = scmp.lt.s32.totalorder %s7672_s21, 3 }
   0x4   : > { %p233_p2 = pnand %p5207_p0, %p232_p1 }
   0x6   : > { %236 = sbr.rel (%p233_p2) target bundleno = 1562 (0x61a), region = 44 }
   0xd   : > { %v340_v0 = vld [vmem:[%s10016_s3] sm:$0xff]  ;;  %v341_v1 = vld [vmem:[%s10016_s3 + $0x8] sm:$0xff]  ;;  %v342_v2 = vld [vmem:[%s10016_s3 + $0x10] sm:$0xff]  ;;  %p272_p3 = scmp.lt.s32.totalorder %s5203_s22, 1  ;;  %vm10020_vm0 = vcmask 261120   ;;  %vm10021_vm1 = vcmask 64512  }
   0xe   : > { %v6971_v3 = vpack.c.bf16 %v341_v1, %v340_v0  ;;  %v343_v4 = vld [vmem:[%s10016_s3 + $0x18] sm:$0xff]  ;;  %v344_v5 = vld [vmem:[%s10016_s3 + $0x20] sm:$0xff]  ;;  %v345_v7 = vld [vmem:[%s10016_s3 + $0x28] sm:$0xff]  ;;  %s7674_s17 = smov 8   ;;  %s7676_s28 = smov 24  }
   0xf   : > { %v6975_v6 = vpack.c.bf16 %v343_v4, %v342_v2  ;;  %s10250_s22 = smov (!%p272_p3, %s5203_s22), 1  ;;  %v348_v8 = vld [vmem:[%s10016_s3 + $0x40] sm:$0xff]  ;;  %v349_v9 = vld [vmem:[%s10016_s3 + $0x48] sm:$0xff]  ;;  %v6979_v10 = vpack.c.bf16 %v345_v7, %v344_v5  ;;  %v346_v14 = vld [vmem:[%s10016_s3 + $0x30] sm:$0xff] }
  0x10   : > { %6972 = vmatprep.subr.bf16.mxu0 %v6971_v3  ;;  %7395 = vmatprep.subr.bf16.mxu1 %v6971_v3  ;;  %s7744_s15 = sshll.u32 %s10250_s22, 7  ;;  %v6987_v11 = vpack.c.bf16 %v349_v9, %v348_v8  ;;  %v347_v15 = vld [vmem:[%s10016_s3 + $0x38] sm:$0xff]  ;;  %v350_v16 = vld [vmem:[%s10016_s3 + $0x50] sm:$0xff]  ;;  %v352_v24 = vld [vmem:[%s10016_s3 + $0x60] sm:$0xff] }
  0x11   : > { %6974 = vmatpush3.bf16.msra.mxu0 %v6971_v3  ;;  %7397 = vmatpush3.bf16.msra.mxu1 %v6971_v3  ;;  %s7750_s18 = scalar_lea.vmem %s10013_s0, %s7744_s15  ;;  %v351_v17 = vld [vmem:[%s10016_s3 + $0x58] sm:$0xff]  ;;  %v6983_v22 = vpack.c.bf16 %v347_v15, %v346_v14  ;;  %v353_v25 = vld [vmem:[%s10016_s3 + $0x68] sm:$0xff]  ;;  %v5280_v26 = vld [vmem:[%s10016_s3 + $0x80] sm:$0xff]  ;;  %s7936_s8 = scalar_lea.vmem %s10014_s1, %s7744_s15 }
  0x12   : > { %6976 = vmatprep.subr.bf16.mxu0 %v6975_v6  ;;  %7396 = vmatprep.subr.bf16.mxu1 %v6975_v6  ;;  %v7753_v12 = vld [vmem:[%s7750_s18] sm:$0xff]  ;;  %v7775_v18 = vld [vmem:[%s7750_s18 + $0x8] sm:$0xff]  ;;  %v7781_v20 = vld [vmem:[%s7750_s18 + $0x10] sm:$0xff]  ;;  %v6991_v23 = vpack.c.bf16 %v351_v17, %v350_v16  ;;  %v6995_v32 = vpack.c.bf16 %v353_v25, %v352_v24  ;;  %s8166_s23 = scalar_lea.vmem %s10015_s2, %s7744_s15  ;;  %s9976_s9 = scalar_lea.vmem %s10019_s6, %s7744_s15 }
  0x13   : > { %v7756_v13 = vld [vmem:[%s7750_s18 + $0x40] sm:$0xff]  ;;  %6115 = vmatprep.mubr.msk.f32.mxu0 %vm10020_vm0, %v7753_v12  ;;  %v7778_v19 = vld [vmem:[%s7750_s18 + $0x48] sm:$0xff]  ;;  %v7784_v21 = vld [vmem:[%s7750_s18 + $0x50] sm:$0xff] }
  0x14   : > { %6127 = vmatprep.mubr.msk.f32.mxu1 %vm10020_vm0, %v7756_v13  ;;  %v5281_v27 = vld [vmem:[%s10016_s3 + $0x88] sm:$0xff]  ;;  %v7803_v28 = vld [vmem:[%s7750_s18 + $0x18] sm:$0xff]  ;;  %v7813_v30 = vld [vmem:[%s7750_s18 + $0x20] sm:$0xff] }
  0x15   : > { %6978 = vmatpush3.bf16.msra.mxu0 %v6975_v6  ;;  %7398 = vmatpush3.bf16.msra.mxu1 %v6975_v6  ;;  %v7806_v29 = vld [vmem:[%s7750_s18 + $0x58] sm:$0xff]  ;;  %v7816_v31 = vld [vmem:[%s7750_s18 + $0x60] sm:$0xff]  ;;  %v7003_v33 = vpack.c.bf16 %v5281_v27, %v5280_v26  ;;  %v7827_v34 = vld [vmem:[%s7750_s18 + $0x28] sm:$0xff] }
  0x16   : > { %6980 = vmatprep.subr.bf16.mxu1 %v6979_v10  ;;  %6988 = vmatprep.subr.bf16.mxu0 %v6987_v11  ;;  %v7830_v35 = vld [vmem:[%s7750_s18 + $0x68] sm:$0xff]  ;;  %v7833_v36 = vld [vmem:[%s7750_s18 + $0x30] sm:$0xff]  ;;  %v7847_v38 = vld [vmem:[%s7750_s18 + $0x38] sm:$0xff] }
  0x17   : > { %v7836_v37 = vld [vmem:[%s7750_s18 + $0x70] sm:$0xff]  ;;  %v7850_v39 = vld [vmem:[%s7750_s18 + $0x78] sm:$0xff]  ;;  %v5284_v46 = vld [vmem:[%s10016_s3 + $0xa0] sm:$0xff] }
  0x18   : > { %6116 = vmatmul.mubr.msk.f32.vlgmr.msra.gmra.mrb[0].mxu0 %vm10020_vm0, %v7775_v18  ;;  %6128 = vmatmul.mubr.msk.f32.vlgmr.msra.gmra.mrb[0].mxu1 %vm10020_vm0, %v7778_v19  ;;  %v354_v40 = vld [vmem:[%s10016_s3 + $0x70] sm:$0xff]  ;;  %v355_v41 = vld [vmem:[%s10016_s3 + $0x78] sm:$0xff]  ;;  %v5285_v47 = vld [vmem:[%s10016_s3 + $0xa8] sm:$0xff] }
  0x19   : > { %6982 = vmatpush3.bf16.msra.mxu1 %v6979_v10  ;;  %6990 = vmatpush3.bf16.msra.mxu0 %v6987_v11  ;;  %v5282_v42 = vld [vmem:[%s10016_s3 + $0x90] sm:$0xff]  ;;  %v5283_v43 = vld [vmem:[%s10016_s3 + $0x98] sm:$0xff]  ;;  %v6999_v44 = vpack.c.bf16 %v355_v41, %v354_v40  ;;  %v5288_v48 = vld [vmem:[%s10016_s3 + $0xc0] sm:$0xff]  ;;  %v7011_v50 = vpack.c.bf16 %v5285_v47, %v5284_v46 }
  0x1a   : > { %6118 = vmatprep.mubr.msk.f32.mxu0 %vm10020_vm0, %v7781_v20  ;;  %6130 = vmatprep.mubr.msk.f32.mxu1 %vm10020_vm0, %v7784_v21  ;;  %v7007_v45 = vpack.c.bf16 %v5283_v43, %v5282_v42  ;;  %v5289_v49 = vld [vmem:[%s10016_s3 + $0xc8] sm:$0xff]  ;;  %v7947_v52 = vld [vmem:[%s7936_s8] sm:$0xff]  ;;  %v5286_v53 = vld [vmem:[%s10016_s3 + $0xb0] sm:$0xff] }
  0x1b   : > { %6984 = vmatprep.subr.bf16.mxu1 %v6983_v22  ;;  %6992 = vmatprep.subr.bf16.mxu0 %v6991_v23  ;;  %v7019_v51 = vpack.c.bf16 %v5289_v49, %v5288_v48  ;;  %v5287_v54 = vld [vmem:[%s10016_s3 + $0xb8] sm:$0xff]  ;;  %v7964_v55 = vld [vmem:[%s7936_s8 + $0x8] sm:$0xff]  ;;  %v7967_v57 = vld [vmem:[%s7936_s8 + $0x10] sm:$0xff] }
  0x1c   : > { %6119 = vmatmul.mubr.msk.f32.gmra.mrb[2].mxu0 %vm10020_vm0, %v7803_v28  ;;  %6131 = vmatmul.mubr.msk.f32.gmra.mrb[2].mxu1 %vm10020_vm0, %v7806_v29  ;;  %v7015_v56 = vpack.c.bf16 %v5287_v54, %v5286_v53  ;;  %v5290_v58 = vld [vmem:[%s10016_s3 + $0xd0] sm:$0xff]  ;;  %v5291_v59 = vld [vmem:[%s10016_s3 + $0xd8] sm:$0xff]  ;;  %v5292_v60 = vld [vmem:[%s10016_s3 + $0xe0] sm:$0xff] }
  0x1d   : > { %6121 = vmatprep.mubr.msk.f32.mxu0 %vm10020_vm0, %v7813_v30  ;;  %6133 = vmatprep.mubr.msk.f32.mxu1 %vm10020_vm0, %v7816_v31  ;;  %v5293_v61 = vld [vmem:[%s10016_s3 + $0xe8] sm:$0xff]  ;;  %v7988_v62 = vld [vmem:[%s7936_s8 + $0x18] sm:$0xff]  ;;  %v7993_v63 = vld [vmem:[%s7936_s8 + $0x20] sm:$0xff]  ;;  %v7023_v0 = vpack.c.bf16 %v5291_v59, %v5290_v58 }
  0x1e   : > { %6986 = vmatpush3.bf16.msra.mxu1 %v6983_v22  ;;  %6994 = vmatpush3.bf16.msra.mxu0 %v6991_v23  ;;  %v7027_v1 = vpack.c.bf16 %v5293_v61, %v5292_v60  ;;  %v5360_v2 = vld [vmem:[%s10016_s3 + $0x100] sm:$0xff]  ;;  %v5361_v3 = vld [vmem:[%s10016_s3 + $0x108] sm:$0xff]  ;;  %v8013_v5 = vld [vmem:[%s7936_s8 + $0x30] sm:$0xff] }
  0x1f   : > { %6996 = vmatprep.subr.bf16.mxu1 %v6995_v32  ;;  %7004 = vmatprep.subr.bf16.mxu0 %v7003_v33  ;;  %v8010_v4 = vld [vmem:[%s7936_s8 + $0x28] sm:$0xff]  ;;  %v7035_v6 = vpack.c.bf16 %v5361_v3, %v5360_v2  ;;  %v8024_v7 = vld [vmem:[%s7936_s8 + $0x38] sm:$0xff]  ;;  %v8027_v8 = vld [vmem:[%s7936_s8 + $0x40] sm:$0xff] }
  0x20   : > { %6122 = vmatmul.mubr.msk.f32.gmra.mrb[4].mxu0 %vm10020_vm0, %v7827_v34  ;;  %6134 = vmatmul.mubr.msk.f32.gmra.mrb[4].mxu1 %vm10020_vm0, %v7830_v35  ;;  %v8038_v9 = vld [vmem:[%s7936_s8 + $0x48] sm:$0xff]  ;;  %v8041_v10 = vld [vmem:[%s7936_s8 + $0x50] sm:$0xff]  ;;  %v8052_v11 = vld [vmem:[%s7936_s8 + $0x58] sm:$0xff] }
  0x21   : > { %6124 = vmatprep.mubr.msk.f32.mxu0 %vm10020_vm0, %v7833_v36  ;;  %6136 = vmatprep.mubr.msk.f32.mxu1 %vm10020_vm0, %v7836_v37  ;;  %v8069_v14 = vld [vmem:[%s7936_s8 + $0x70] sm:$0xff]  ;;  %v8080_v15 = vld [vmem:[%s7936_s8 + $0x78] sm:$0xff]  ;;  %v5365_v22 = vld [vmem:[%s10016_s3 + $0x128] sm:$0xff] }
  0x22   : > { %v5294_v16 = vld [vmem:[%s10016_s3 + $0xf0] sm:$0xff]  ;;  %v5295_v17 = vld [vmem:[%s10016_s3 + $0xf8] sm:$0xff]  ;;  %v5368_v25 = vld [vmem:[%s10016_s3 + $0x140] sm:$0xff] }
  0x23   : > { %v5369_v26 = vld [vmem:[%s10016_s3 + $0x148] sm:$0xff]  ;;  %v8223_v40 = vld [vmem:[%s8166_s23 + $0x20] sm:$0xff]  ;;  %v8237_v43 = vld [vmem:[%s8166_s23 + $0x30] sm:$0xff] }
  0x24   : > { %6125 = vmatmul.mubr.msk.f32.gmra.mrb[6].mxu0 %vm10020_vm0, %v7847_v38  ;;  %6137 = vmatmul.mubr.msk.f32.gmra.mrb[6].mxu1 %vm10020_vm0, %v7850_v39  ;;  %v7051_v27 = vpack.c.bf16 %v5369_v26, %v5368_v25  ;;  %v8234_v42 = vld [vmem:[%s8166_s23 + $0x28] sm:$0xff]  ;;  %v8265_v47 = vld [vmem:[%s8166_s23 + $0x50] sm:$0xff]  ;;  %v8276_v48 = vld [vmem:[%s8166_s23 + $0x58] sm:$0xff] }
  0x25   : > { %6147 = vmatprep.mubr.msk.f32.mxu1 %vm10020_vm0, %v7753_v12  ;;  %6179 = vmatprep.mubr.msk.f32.mxu0 %vm10020_vm0, %v7753_v12  ;;  %v8262_v46 = vld [vmem:[%s8166_s23 + $0x48] sm:$0xff]  ;;  %v8279_v49 = vld [vmem:[%s8166_s23 + $0x60] sm:$0xff]  ;;  %v5374_v53 = vld [vmem:[%s10016_s3 + $0x170] sm:$0xff] }
  0x26   : > { %v5375_v54 = vld [vmem:[%s10016_s3 + $0x178] sm:$0xff]  ;;  %vm8494_vm2 = vmpackc.low %vm10021_vm1, %vm10021_vm1 }
  0x28   : > { %6148 = vmatmul.mubr.msk.f32.vlgmr.msra.gmra.mrb[8].mxu1 %vm10020_vm0, %v7775_v18  ;;  %6180 = vmatmul.mubr.msk.f32.vlgmr.msra.gmra.mrb[8].mxu0 %vm10020_vm0, %v7775_v18 }
  0x29   : > { %6998 = vmatpush3.bf16.msra.mxu1 %v6995_v32  ;;  %7006 = vmatpush3.bf16.msra.mxu0 %v7003_v33  ;;  %v5371_v32 = vld [vmem:[%s10016_s3 + $0x158] sm:$0xff]  ;;  %v8200_v33 = vld [vmem:[%s8166_s23 + $0x8] sm:$0xff] }
  0x2a   : > { %6150 = vmatprep.mubr.msk.f32.mxu1 %vm10020_vm0, %v7781_v20  ;;  %6182 = vmatprep.mubr.msk.f32.mxu0 %vm10020_vm0, %v7781_v20 }
  0x2b   : > { %7000 = vmatprep.subr.bf16.mxu1 %v6999_v44  ;;  %7008 = vmatprep.subr.bf16.mxu0 %v7007_v45 }
  0x2c   : > { %6151 = vmatmul.mubr.msk.f32.gmra.mrb[10].mxu1 %vm10020_vm0, %v7803_v28  ;;  %6183 = vmatmul.mubr.msk.f32.gmra.mrb[10].mxu0 %vm10020_vm0, %v7803_v28 }
  0x2d   : > { %6153 = vmatprep.mubr.msk.f32.mxu1 %vm10020_vm0, %v7813_v30  ;;  %6185 = vmatprep.mubr.msk.f32.mxu0 %vm10020_vm0, %v7813_v30 }
  0x2e   : > { %7002 = vmatpush3.bf16.msra.mxu1 %v6999_v44  ;;  %7010 = vmatpush3.bf16.msra.mxu0 %v7007_v45  ;;  %v8248_v44 = vld [vmem:[%s8166_s23 + $0x38] sm:$0xff]  ;;  %v8251_v45 = vld [vmem:[%s8166_s23 + $0x40] sm:$0xff] }
  0x2f   : > { %7012 = vmatprep.subr.bf16.mxu1 %v7011_v50  ;;  %7020 = vmatprep.subr.bf16.mxu0 %v7019_v51 }
  0x30   : > { %6154 = vmatmul.mubr.msk.f32.gmra.mrb[12].mxu1 %vm10020_vm0, %v7827_v34  ;;  %6186 = vmatmul.mubr.msk.f32.gmra.mrb[12].mxu0 %vm10020_vm0, %v7827_v34 }
  0x31   : > { %6156 = vmatprep.mubr.msk.f32.mxu1 %vm10020_vm0, %v7833_v36  ;;  %6188 = vmatprep.mubr.msk.f32.mxu0 %vm10020_vm0, %v7833_v36 }
  0x34   : > { %6157 = vmatmul.mubr.msk.f32.gmra.mrb[14].mxu1 %vm10020_vm0, %v7847_v38  ;;  %6189 = vmatmul.mubr.msk.f32.gmra.mrb[14].mxu0 %vm10020_vm0, %v7847_v38 }
  0x35   : > { %6159 = vmatprep.mubr.msk.f32.mxu1 %vm10020_vm0, %v7756_v13  ;;  %6191 = vmatprep.mubr.msk.f32.mxu0 %vm10020_vm0, %v7756_v13 }
  0x38   : > { %6160 = vmatmul.mubr.msk.f32.gmra.mrb[16].mxu1 %vm10020_vm0, %v7778_v19  ;;  %6192 = vmatmul.mubr.msk.f32.gmra.mrb[16].mxu0 %vm10020_vm0, %v7778_v19 }
  0x39   : > { %6162 = vmatprep.mubr.msk.f32.mxu1 %vm10020_vm0, %v7784_v21  ;;  %6194 = vmatprep.mubr.msk.f32.mxu0 %vm10020_vm0, %v7784_v21 }
  0x3c   : > { %6163 = vmatmul.mubr.msk.f32.gmra.mrb[18].mxu1 %vm10020_vm0, %v7806_v29  ;;  %6195 = vmatmul.mubr.msk.f32.gmra.mrb[18].mxu0 %vm10020_vm0, %v7806_v29 }
  0x3d   : > { %6165 = vmatprep.mubr.msk.f32.mxu1 %vm10020_vm0, %v7816_v31  ;;  %6197 = vmatprep.mubr.msk.f32.mxu0 %vm10020_vm0, %v7816_v31 }
  0x40   : > { %6166 = vmatmul.mubr.msk.f32.gmra.mrb[20].mxu1 %vm10020_vm0, %v7830_v35  ;;  %6198 = vmatmul.mubr.msk.f32.gmra.mrb[20].mxu0 %vm10020_vm0, %v7830_v35 }
  0x41   : > { %6168 = vmatprep.mubr.msk.f32.mxu1 %vm10020_vm0, %v7836_v37  ;;  %6200 = vmatprep.mubr.msk.f32.mxu0 %vm10020_vm0, %v7836_v37 }
  0x44   : > { %6169 = vmatmul.mubr.msk.f32.gmra.mrb[22].mxu1 %vm10020_vm0, %v7850_v39  ;;  %6201 = vmatmul.mubr.msk.f32.gmra.mrb[22].mxu0 %vm10020_vm0, %v7850_v39 }
  0x45   : > { %6211 = vmatprep.mubr.msk.f32.mxu1 %vm10020_vm0, %v7753_v12  ;;  %6243 = vmatprep.mubr.msk.f32.mxu0 %vm10020_vm0, %v7947_v52  ;;  %v8055_v12 = vld [vmem:[%s7936_s8 + $0x60] sm:$0xff] }
  0x48   : > { %6212 = vmatmul.mubr.msk.f32.vlgmr.msra.gmra.mrb[24].mxu1 %vm10020_vm0, %v7775_v18  ;;  %6244 = vmatmul.mubr.msk.f32.vlgmr.msra.gmra.mrb[24].mxu0 %vm10020_vm0, %v7964_v55  ;;  %v7031_v18 = vpack.c.bf16 %v5295_v17, %v5294_v16 }
  0x49   : > { %7014 = vmatpush3.bf16.msra.mxu1 %v7011_v50  ;;  %6214 = vmatprep.mubr.msk.f32.mxu1 %vm10020_vm0, %v7781_v20  ;;  %v5363_v20 = vld [vmem:[%s10016_s3 + $0x118] sm:$0xff]  ;;  %v337_v50 = vld [vmem:[%s8166_s23 + $0x68] sm:$0xff] }
  0x4a   : > { %6246 = vmatprep.mubr.msk.f32.mxu0 %vm10020_vm0, %v7967_v57  ;;  %7016 = vmatprep.subr.bf16.mxu1 %v7015_v56 }
  0x4b   : > { %7022 = vmatpush3.bf16.msra.mxu0 %v7019_v51  ;;  %v338_v51 = vld [vmem:[%s8166_s23 + $0x70] sm:$0xff] }
  0x4c   : > { %6215 = vmatmul.mubr.msk.f32.gmra.mrb[26].mxu1 %vm10020_vm0, %v7803_v28  ;;  %6247 = vmatmul.mubr.msk.f32.gmra.mrb[26].mxu0 %vm10020_vm0, %v7988_v62  ;;  %v8177_v28 = vld [vmem:[%s8166_s23] sm:$0xff] }
  0x4d   : > { %6217 = vmatprep.mubr.msk.f32.mxu1 %vm10020_vm0, %v7813_v30  ;;  %6249 = vmatprep.mubr.msk.f32.mxu0 %vm10020_vm0, %v7993_v63  ;;  %v5367_v30 = vld [vmem:[%s10016_s3 + $0x138] sm:$0xff] }
  0x4e   : > { %7018 = vmatpush3.bf16.msra.mxu1 %v7015_v56  ;;  %7024 = vmatprep.subr.bf16.mxu0 %v7023_v0 }
  0x4f   : > { %7026 = vmatpush3.bf16.msra.mxu0 %v7023_v0  ;;  %7028 = vmatprep.subr.bf16.mxu1 %v7027_v1 }
  0x50   : > { %6218 = vmatmul.mubr.msk.f32.gmra.mrb[28].mxu1 %vm10020_vm0, %v7827_v34  ;;  %6250 = vmatmul.mubr.msk.f32.gmra.mrb[28].mxu0 %vm10020_vm0, %v8010_v4  ;;  %v8203_v34 = vld [vmem:[%s8166_s23 + $0x10] sm:$0xff] }
  0x51   : > { %6220 = vmatprep.mubr.msk.f32.mxu1 %vm10020_vm0, %v7833_v36  ;;  %6252 = vmatprep.mubr.msk.f32.mxu0 %vm10020_vm0, %v8013_v5 }
  0x52   : > { %7036 = vmatprep.subr.bf16.mxu0 %v7035_v6 }
  0x54   : > { %6221 = vmatmul.mubr.msk.f32.gmra.mrb[30].mxu1 %vm10020_vm0, %v7847_v38  ;;  %6253 = vmatmul.mubr.msk.f32.gmra.mrb[30].mxu0 %vm10020_vm0, %v8024_v7  ;;  %v5373_v38 = vld [vmem:[%s10016_s3 + $0x168] sm:$0xff] }
  0x55   : > { %6223 = vmatprep.mubr.msk.f32.mxu1 %vm10020_vm0, %v7756_v13  ;;  %6255 = vmatprep.mubr.msk.f32.mxu0 %vm10020_vm0, %v8027_v8  ;;  %v8066_v13 = vld [vmem:[%s7936_s8 + $0x68] sm:$0xff] }
  0x58   : > { %6224 = vmatmul.mubr.msk.f32.gmra.mrb[32].mxu1 %vm10020_vm0, %v7778_v19  ;;  %6256 = vmatmul.mubr.msk.f32.gmra.mrb[32].mxu0 %vm10020_vm0, %v8038_v9  ;;  %v5362_v19 = vld [vmem:[%s10016_s3 + $0x110] sm:$0xff] }
  0x59   : > { %6226 = vmatprep.mubr.msk.f32.mxu1 %vm10020_vm0, %v7784_v21  ;;  %6258 = vmatprep.mubr.msk.f32.mxu0 %vm10020_vm0, %v8041_v10  ;;  %v5364_v21 = vld [vmem:[%s10016_s3 + $0x120] sm:$0xff]  ;;  %v7039_v23 = vpack.c.bf16 %v5363_v20, %v5362_v19 }
  0x5a   : > { %v7043_v24 = vpack.c.bf16 %v5365_v22, %v5364_v21 }
  0x5c   : > { %6227 = vmatmul.mubr.msk.f32.gmra.mrb[34].mxu1 %vm10020_vm0, %v7806_v29  ;;  %6259 = vmatmul.mubr.msk.f32.gmra.mrb[34].mxu0 %vm10020_vm0, %v8052_v11  ;;  %v5366_v29 = vld [vmem:[%s10016_s3 + $0x130] sm:$0xff] }
  0x5d   : > { %6229 = vmatprep.mubr.msk.f32.mxu1 %vm10020_vm0, %v7816_v31  ;;  %6261 = vmatprep.mubr.msk.f32.mxu0 %vm10020_vm0, %v8055_v12  ;;  %v5370_v31 = vld [vmem:[%s10016_s3 + $0x150] sm:$0xff] }
  0x5e   : > { %v7055_v36 = vpack.c.bf16 %v5371_v32, %v5370_v31 }
  0x60   : > { %6230 = vmatmul.mubr.msk.f32.gmra.mrb[36].mxu1 %vm10020_vm0, %v7830_v35  ;;  %6262 = vmatmul.mubr.msk.f32.gmra.mrb[36].mxu0 %vm10020_vm0, %v8066_v13  ;;  %v7047_v35 = vpack.c.bf16 %v5367_v30, %v5366_v29 }
  0x61   : > { %6232 = vmatprep.mubr.msk.f32.mxu1 %vm10020_vm0, %v7836_v37  ;;  %6264 = vmatprep.mubr.msk.f32.mxu0 %vm10020_vm0, %v8069_v14  ;;  %v5372_v37 = vld [vmem:[%s10016_s3 + $0x160] sm:$0xff] }
  0x62   : > { %v7059_v41 = vpack.c.bf16 %v5373_v38, %v5372_v37 }
  0x64   : > { %6233 = vmatmul.mubr.msk.f32.gmra.mrb[38].mxu1 %vm10020_vm0, %v7850_v39  ;;  %6265 = vmatmul.mubr.msk.f32.gmra.mrb[38].mxu0 %vm10020_vm0, %v8080_v15  ;;  %v8220_v39 = vld [vmem:[%s8166_s23 + $0x18] sm:$0xff] }
  0x65   : > { %6275 = vmatprep.mubr.msk.f32.mxu1 %vm10020_vm0, %v7947_v52  ;;  %6307 = vmatprep.mubr.msk.f32.mxu0 %vm10020_vm0, %v7947_v52 }
  0x68   : > { %6276 = vmatmul.mubr.msk.f32.vlgmr.msra.gmra.mrb[40].mxu1 %vm10020_vm0, %v7964_v55  ;;  %6308 = vmatmul.mubr.msk.f32.vlgmr.msra.gmra.mrb[40].mxu0 %vm10020_vm0, %v7964_v55 }
  0x69   : > { %6278 = vmatprep.mubr.msk.f32.mxu1 %vm10020_vm0, %v7967_v57  ;;  %7030 = vmatpush3.bf16.msra.mxu1 %v7027_v1 }
  0x6a   : > { %6310 = vmatprep.mubr.msk.f32.mxu0 %vm10020_vm0, %v7967_v57  ;;  %7032 = vmatprep.subr.bf16.mxu1 %v7031_v18 }
  0x6b   : > { %7038 = vmatpush3.bf16.msra.mxu0 %v7035_v6 }
  0x6c   : > { %6279 = vmatmul.mubr.msk.f32.gmra.mrb[42].mxu1 %vm10020_vm0, %v7988_v62  ;;  %6311 = vmatmul.mubr.msk.f32.gmra.mrb[42].mxu0 %vm10020_vm0, %v7988_v62 }
  0x6d   : > { %6281 = vmatprep.mubr.msk.f32.mxu1 %vm10020_vm0, %v7993_v63  ;;  %6313 = vmatprep.mubr.msk.f32.mxu0 %vm10020_vm0, %v7993_v63 }
  0x6e   : > { %7034 = vmatpush3.bf16.msra.mxu1 %v7031_v18  ;;  %7040 = vmatprep.subr.bf16.mxu0 %v7039_v23 }
  0x6f   : > { %7042 = vmatpush3.bf16.msra.mxu0 %v7039_v23  ;;  %7044 = vmatprep.subr.bf16.mxu1 %v7043_v24 }
  0x70   : > { %6282 = vmatmul.mubr.msk.f32.gmra.mrb[44].mxu1 %vm10020_vm0, %v8010_v4  ;;  %6314 = vmatmul.mubr.msk.f32.gmra.mrb[44].mxu0 %vm10020_vm0, %v8010_v4 }
  0x71   : > { %6284 = vmatprep.mubr.msk.f32.mxu1 %vm10020_vm0, %v8013_v5  ;;  %6316 = vmatprep.mubr.msk.f32.mxu0 %vm10020_vm0, %v8013_v5 }
  0x72   : > { %7052 = vmatprep.subr.bf16.mxu0 %v7051_v27 }
  0x74   : > { %6285 = vmatmul.mubr.msk.f32.gmra.mrb[46].mxu1 %vm10020_vm0, %v8024_v7  ;;  %6317 = vmatmul.mubr.msk.f32.gmra.mrb[46].mxu0 %vm10020_vm0, %v8024_v7 }
  0x75   : > { %6287 = vmatprep.mubr.msk.f32.mxu1 %vm10020_vm0, %v8027_v8  ;;  %6319 = vmatprep.mubr.msk.f32.mxu0 %vm10020_vm0, %v8027_v8 }
  0x78   : > { %6288 = vmatmul.mubr.msk.f32.gmra.mrb[48].mxu1 %vm10020_vm0, %v8038_v9  ;;  %6320 = vmatmul.mubr.msk.f32.gmra.mrb[48].mxu0 %vm10020_vm0, %v8038_v9 }
  0x79   : > { %6290 = vmatprep.mubr.msk.f32.mxu1 %vm10020_vm0, %v8041_v10  ;;  %6322 = vmatprep.mubr.msk.f32.mxu0 %vm10020_vm0, %v8041_v10 }
  0x7c   : > { %6291 = vmatmul.mubr.msk.f32.gmra.mrb[50].mxu1 %vm10020_vm0, %v8052_v11  ;;  %6323 = vmatmul.mubr.msk.f32.gmra.mrb[50].mxu0 %vm10020_vm0, %v8052_v11 }
  0x7d   : > { %6293 = vmatprep.mubr.msk.f32.mxu1 %vm10020_vm0, %v8055_v12  ;;  %6325 = vmatprep.mubr.msk.f32.mxu0 %vm10020_vm0, %v8055_v12 }
  0x80   : > { %6294 = vmatmul.mubr.msk.f32.gmra.mrb[52].mxu1 %vm10020_vm0, %v8066_v13  ;;  %6326 = vmatmul.mubr.msk.f32.gmra.mrb[52].mxu0 %vm10020_vm0, %v8066_v13 }
  0x81   : > { %6296 = vmatprep.mubr.msk.f32.mxu1 %vm10020_vm0, %v8069_v14  ;;  %6328 = vmatprep.mubr.msk.f32.mxu0 %vm10020_vm0, %v8069_v14 }
  0x84   : > { %6297 = vmatmul.mubr.msk.f32.gmra.mrb[54].mxu1 %vm10020_vm0, %v8080_v15  ;;  %6329 = vmatmul.mubr.msk.f32.gmra.mrb[54].mxu0 %vm10020_vm0, %v8080_v15 }
  0x85   : > { %6339 = vmatprep.mubr.msk.f32.mxu1 %vm10020_vm0, %v7947_v52  ;;  %6371 = vmatprep.mubr.msk.f32.mxu0 %vm10020_vm0, %v8177_v28  ;;  %v339_v52 = vld [vmem:[%s8166_s23 + $0x78] sm:$0xff]  ;;  %s7675_s23 = smov 16  }
  0x88   : > { %6340 = vmatmul.mubr.msk.f32.vlgmr.msra.gmra.mrb[56].mxu1 %vm10020_vm0, %v7964_v55  ;;  %6372 = vmatmul.mubr.msk.f32.vlgmr.msra.gmra.mrb[56].mxu0 %vm10020_vm0, %v8200_v33  ;;  %v7063_v55 = vpack.c.bf16 %v5375_v54, %v5374_v53 }
  0x89   : > { %6342 = vmatprep.mubr.msk.f32.mxu1 %vm10020_vm0, %v7967_v57  ;;  %6374 = vmatprep.mubr.msk.f32.mxu0 %vm10020_vm0, %v8203_v34 }
  0x8a   : > { %7046 = vmatpush3.bf16.msra.mxu1 %v7043_v24  ;;  %7054 = vmatpush3.bf16.msra.mxu0 %v7051_v27 }
  0x8b   : > { %7048 = vmatprep.subr.bf16.mxu1 %v7047_v35  ;;  %7056 = vmatprep.subr.bf16.mxu0 %v7055_v36 }
  0x8c   : > { %6343 = vmatmul.mubr.msk.f32.gmra.mrb[58].mxu1 %vm10020_vm0, %v7988_v62  ;;  %6375 = vmatmul.mubr.msk.f32.gmra.mrb[58].mxu0 %vm10020_vm0, %v8220_v39 }
  0x8d   : > { %6345 = vmatprep.mubr.msk.f32.mxu1 %vm10020_vm0, %v7993_v63  ;;  %6377 = vmatprep.mubr.msk.f32.mxu0 %vm10020_vm0, %v8223_v40 }
  0x8e   : > { %7050 = vmatpush3.bf16.msra.mxu1 %v7047_v35  ;;  %7058 = vmatpush3.bf16.msra.mxu0 %v7055_v36 }
  0x8f   : > { %7060 = vmatprep.subr.bf16.mxu1 %v7059_v41 }
  0x90   : > { %6346 = vmatmul.mubr.msk.f32.gmra.mrb[60].mxu1 %vm10020_vm0, %v8010_v4  ;;  %6378 = vmatmul.mubr.msk.f32.gmra.mrb[60].mxu0 %vm10020_vm0, %v8234_v42 }
  0x91   : > { %6348 = vmatprep.mubr.msk.f32.mxu1 %vm10020_vm0, %v8013_v5  ;;  %6380 = vmatprep.mubr.msk.f32.mxu0 %vm10020_vm0, %v8237_v43 }
  0x94   : > { %6349 = vmatmul.mubr.msk.f32.gmra.mrb[62].mxu1 %vm10020_vm0, %v8024_v7  ;;  %6381 = vmatmul.mubr.msk.f32.gmra.mrb[62].mxu0 %vm10020_vm0, %v8248_v44 }
  0x95   : > { %6351 = vmatprep.mubr.msk.f32.mxu1 %vm10020_vm0, %v8027_v8  ;;  %6383 = vmatprep.mubr.msk.f32.mxu0 %vm10020_vm0, %v8251_v45 }
  0x98   : > { %6352 = vmatmul.mubr.msk.f32.gmra.mrb[64].mxu1 %vm10020_vm0, %v8038_v9  ;;  %6384 = vmatmul.mubr.msk.f32.gmra.mrb[64].mxu0 %vm10020_vm0, %v8262_v46 }
  0x99   : > { %6354 = vmatprep.mubr.msk.f32.mxu1 %vm10020_vm0, %v8041_v10  ;;  %6386 = vmatprep.mubr.msk.f32.mxu0 %vm10020_vm0, %v8265_v47 }
  0x9c   : > { %6355 = vmatmul.mubr.msk.f32.gmra.mrb[66].mxu1 %vm10020_vm0, %v8052_v11  ;;  %6387 = vmatmul.mubr.msk.f32.gmra.mrb[66].mxu0 %vm10020_vm0, %v8276_v48 }
  0x9d   : > { %6357 = vmatprep.mubr.msk.f32.mxu1 %vm10020_vm0, %v8055_v12  ;;  %6389 = vmatprep.mubr.msk.f32.mxu0 %vm10020_vm0, %v8279_v49 }
  0xa0   : > { %6358 = vmatmul.mubr.msk.f32.gmra.mrb[68].mxu1 %vm10020_vm0, %v8066_v13  ;;  %6390 = vmatmul.mubr.msk.f32.gmra.mrb[68].mxu0 %vm10020_vm0, %v337_v50 }
  0xa1   : > { %6360 = vmatprep.mubr.msk.f32.mxu1 %vm10020_vm0, %v8069_v14  ;;  %6392 = vmatprep.mubr.msk.f32.mxu0 %vm10020_vm0, %v338_v51 }
  0xa4   : > { %6361 = vmatmul.mubr.msk.f32.gmra.mrb[70].mxu1 %vm10020_vm0, %v8080_v15  ;;  %6393 = vmatmul.mubr.msk.f32.gmra.mrb[70].mxu0 %vm10020_vm0, %v339_v52 }
  0xa5   : > { %6403 = vmatprep.mubr.msk.f32.mxu1 %vm10020_vm0, %v8177_v28  ;;  %6435 = vmatprep.mubr.msk.f32.mxu0 %vm10020_vm0, %v8177_v28 }
  0xa8   : > { %6404 = vmatmul.mubr.msk.f32.vlgmr.msra.gmra.mrb[72].mxu1 %vm10020_vm0, %v8200_v33  ;;  %6436 = vmatmul.mubr.msk.f32.vlgmr.msra.gmra.mrb[72].mxu0 %vm10020_vm0, %v8200_v33 }
  0xa9   : > { %6406 = vmatprep.mubr.msk.f32.mxu1 %vm10020_vm0, %v8203_v34  ;;  %6438 = vmatprep.mubr.msk.f32.mxu0 %vm10020_vm0, %v8203_v34 }
  0xaa   : > { %7062 = vmatpush3.bf16.msra.mxu1 %v7059_v41 }
  0xab   : > { %7064 = vmatprep.subr.bf16.mxu1 %v7063_v55 }
  0xac   : > { %6407 = vmatmul.mubr.msk.f32.gmra.mrb[74].mxu1 %vm10020_vm0, %v8220_v39  ;;  %6439 = vmatmul.mubr.msk.f32.gmra.mrb[74].mxu0 %vm10020_vm0, %v8220_v39 }
  0xad   : > { %6409 = vmatprep.mubr.msk.f32.mxu1 %vm10020_vm0, %v8223_v40  ;;  %6441 = vmatprep.mubr.msk.f32.mxu0 %vm10020_vm0, %v8223_v40 }
  0xae   : > { %7066 = vmatpush3.bf16.msra.mxu1 %v7063_v55 }
  0xb0   : > { %6410 = vmatmul.mubr.msk.f32.gmra.mrb[76].mxu1 %vm10020_vm0, %v8234_v42  ;;  %6442 = vmatmul.mubr.msk.f32.gmra.mrb[76].mxu0 %vm10020_vm0, %v8234_v42 }
  0xb1   : > { %6412 = vmatprep.mubr.msk.f32.mxu1 %vm10020_vm0, %v8237_v43  ;;  %6444 = vmatprep.mubr.msk.f32.mxu0 %vm10020_vm0, %v8237_v43 }
  0xb4   : > { %6413 = vmatmul.mubr.msk.f32.gmra.mrb[78].mxu1 %vm10020_vm0, %v8248_v44  ;;  %6445 = vmatmul.mubr.msk.f32.gmra.mrb[78].mxu0 %vm10020_vm0, %v8248_v44 }
  0xb5   : > { %6415 = vmatprep.mubr.msk.f32.mxu1 %vm10020_vm0, %v8251_v45  ;;  %6447 = vmatprep.mubr.msk.f32.mxu0 %vm10020_vm0, %v8251_v45 }
  0xb8   : > { %6416 = vmatmul.mubr.msk.f32.gmra.mrb[80].mxu1 %vm10020_vm0, %v8262_v46  ;;  %6448 = vmatmul.mubr.msk.f32.gmra.mrb[80].mxu0 %vm10020_vm0, %v8262_v46 }
  0xb9   : > { %6418 = vmatprep.mubr.msk.f32.mxu1 %vm10020_vm0, %v8265_v47  ;;  %6450 = vmatprep.mubr.msk.f32.mxu0 %vm10020_vm0, %v8265_v47 }
  0xbc   : > { %6419 = vmatmul.mubr.msk.f32.gmra.mrb[82].mxu1 %vm10020_vm0, %v8276_v48  ;;  %6451 = vmatmul.mubr.msk.f32.gmra.mrb[82].mxu0 %vm10020_vm0, %v8276_v48 }
  0xbd   : > { %6421 = vmatprep.mubr.msk.f32.mxu1 %vm10020_vm0, %v8279_v49  ;;  %6453 = vmatprep.mubr.msk.f32.mxu0 %vm10020_vm0, %v8279_v49 }
  0xc0   : > { %6422 = vmatmul.mubr.msk.f32.gmra.mrb[84].mxu1 %vm10020_vm0, %v337_v50  ;;  %6454 = vmatmul.mubr.msk.f32.gmra.mrb[84].mxu0 %vm10020_vm0, %v337_v50 }
  0xc1   : > { %6424 = vmatprep.mubr.msk.f32.mxu1 %vm10020_vm0, %v338_v51  ;;  %6456 = vmatprep.mubr.msk.f32.mxu0 %vm10020_vm0, %v338_v51 }
  0xc4   : > { %6425 = vmatmul.mubr.msk.f32.gmra.mrb[86].mxu1 %vm10020_vm0, %v339_v52  ;;  %6457 = vmatmul.mubr.msk.f32.gmra.mrb[86].mxu0 %vm10020_vm0, %v339_v52 }
  0xc5   : > { %6467 = vmatprep.mubr.msk.f32.mxu1 %vm10020_vm0, %v8177_v28 }
  0xc8   : > { %6468 = vmatmul.mubr.msk.f32.vlgmr.msra.gmra.mrb[88].mxu1 %vm10020_vm0, %v8200_v33 }
  0xc9   : > { %6470 = vmatprep.mubr.msk.f32.mxu1 %vm10020_vm0, %v8203_v34 }
  0xcc   : > { %6471 = vmatmul.mubr.msk.f32.gmra.mrb[90].mxu1 %vm10020_vm0, %v8220_v39 }
  0xcd   : > { %6473 = vmatprep.mubr.msk.f32.mxu1 %vm10020_vm0, %v8223_v40 }
  0xd0   : > { %6474 = vmatmul.mubr.msk.f32.gmra.mrb[92].mxu1 %vm10020_vm0, %v8234_v42 }
  0xd1   : > { %6476 = vmatprep.mubr.msk.f32.mxu1 %vm10020_vm0, %v8237_v43 }
  0xd4   : > { %6477 = vmatmul.mubr.msk.f32.gmra.mrb[94].mxu1 %vm10020_vm0, %v8248_v44 }
  0xd5   : > { %6479 = vmatprep.mubr.msk.f32.mxu1 %vm10020_vm0, %v8251_v45 }
  0xd8   : > { %6480 = vmatmul.mubr.msk.f32.gmra.mrb[96].mxu1 %vm10020_vm0, %v8262_v46 }
  0xd9   : > { %6482 = vmatprep.mubr.msk.f32.mxu1 %vm10020_vm0, %v8265_v47 }
  0xdc   : > { %6483 = vmatmul.mubr.msk.f32.gmra.mrb[98].mxu1 %vm10020_vm0, %v8276_v48 }
  0xdd   : > { %6485 = vmatprep.mubr.msk.f32.mxu1 %vm10020_vm0, %v8279_v49 }
  0xe0   : > { %6486 = vmatmul.mubr.msk.f32.gmra.mrb[100].mxu1 %vm10020_vm0, %v337_v50 }
  0xe1   : > { %6488 = vmatprep.mubr.msk.f32.mxu1 %vm10020_vm0, %v338_v51 }
  0xe4   : > { %6489 = vmatmul.mubr.msk.f32.gmra.mrb[102].mxu1 %vm10020_vm0, %v339_v52 }
  0xeb   : > { %v8394_v56 = vpop.f32.mrb[0].mxu0  ;;  %v8396_v57 = vpop.f32.mrb[0].mxu1 }
  0xec   : > { %v471_v58 = vpop.f32.mrb[1].mxu0  ;;  %v8398_v59 = vpop.f32.mrb[1].mxu1 }
  0xed   : > { %6523 = vmatprep.mubr.msk.f32.mxu0 %vm10021_vm1, %v471_v58 }
  0xef   : > { %v8401_v60 = vpop.f32.mrb[2].mxu0  ;;  %v8403_v61 = vpop.f32.mrb[2].mxu1 }
  0xf0   : > { %v8405_v62 = vpop.f32.mrb[3].mxu0  ;;  %v8407_v63 = vpop.f32.mrb[3].mxu1 }
  0xf3   : > { %v8409_v0 = vpop.f32.mrb[4].mxu0  ;;  %v8411_v1 = vpop.f32.mrb[4].mxu1 }
  0xf4   : > { %v8413_v2 = vpop.f32.mrb[5].mxu0  ;;  %v8415_v3 = vpop.f32.mrb[5].mxu1 }
  0xf7   : > { %v8417_v4 = vpop.f32.mrb[6].mxu0  ;;  %v8419_v5 = vpop.f32.mrb[6].mxu1 }
  0xf8   : > { %v8421_v6 = vpop.f32.mrb[7].mxu0  ;;  %v8423_v7 = vpop.f32.mrb[7].mxu1 }
  0xfb   : > { %v8425_v8 = vpop.f32.mrb[8].mxu1  ;;  %v8427_v9 = vpop.f32.mrb[8].mxu0 }
  0xfc   : > { %v616_v10 = vpop.f32.mrb[9].mxu1  ;;  %v8429_v11 = vpop.f32.mrb[9].mxu0 }
  0xfd   : > { %6579 = vmatprep.mubr.msk.f32.mxu1 %vm10021_vm1, %v616_v10 }
  0xff   : > { %v8432_v12 = vpop.f32.mrb[10].mxu1  ;;  %v8434_v13 = vpop.f32.mrb[10].mxu0 }
 0x100   : > { %v8436_v14 = vpop.f32.mrb[11].mxu1  ;;  %v8438_v15 = vpop.f32.mrb[11].mxu0 }
 0x103   : > { %v8440_v16 = vpop.f32.mrb[12].mxu1  ;;  %v8442_v17 = vpop.f32.mrb[12].mxu0 }
 0x104   : > { %v8444_v18 = vpop.f32.mrb[13].mxu1  ;;  %v8446_v19 = vpop.f32.mrb[13].mxu0 }
 0x107   : > { %v8448_v20 = vpop.f32.mrb[14].mxu1  ;;  %v8450_v21 = vpop.f32.mrb[14].mxu0 }
 0x108   : > { %v8452_v22 = vpop.f32.mrb[15].mxu1  ;;  %v8454_v23 = vpop.f32.mrb[15].mxu0 }
 0x10b   : > { %v8456_v24 = vpop.f32.mrb[16].mxu1  ;;  %v8458_v25 = vpop.f32.mrb[16].mxu0 }
 0x10c   : > { %10066 = vst [vmem:[#allocation3_spill] sm:$0xff] %v8458_v25  ;;  %v8460_v26 = vpop.f32.mrb[17].mxu1  ;;  %v8462_v27 = vpop.f32.mrb[17].mxu0 }
 0x10d   : > { %10067 = vst [vmem:[#allocation4_spill] sm:$0xff] %v8462_v27 }
 0x10f   : > { %v8464_v28 = vpop.f32.mrb[18].mxu1  ;;  %v8466_v29 = vpop.f32.mrb[18].mxu0 }
 0x110   : > { %10068 = vst [vmem:[#allocation5_spill] sm:$0xff] %v8466_v29  ;;  %v8468_v30 = vpop.f32.mrb[19].mxu1  ;;  %v8470_v31 = vpop.f32.mrb[19].mxu0 }
 0x111   : > { %10069 = vst [vmem:[#allocation6_spill] sm:$0xff] %v8470_v31 }
 0x113   : > { %v8472_v32 = vpop.f32.mrb[20].mxu1  ;;  %v8474_v33 = vpop.f32.mrb[20].mxu0 }
 0x114   : > { %10070 = vst [vmem:[#allocation7_spill] sm:$0xff] %v8474_v33  ;;  %v8476_v34 = vpop.f32.mrb[21].mxu1  ;;  %v8478_v35 = vpop.f32.mrb[21].mxu0 }
 0x115   : > { %10071 = vst [vmem:[#allocation8_spill] sm:$0xff] %v8478_v35 }
 0x117   : > { %v8480_v36 = vpop.f32.mrb[22].mxu1  ;;  %v8482_v37 = vpop.f32.mrb[22].mxu0 }
 0x118   : > { %10072 = vst [vmem:[#allocation9_spill] sm:$0xff] %v8482_v37  ;;  %v8484_v38 = vpop.f32.mrb[23].mxu1  ;;  %v8486_v39 = vpop.f32.mrb[23].mxu0 }
 0x119   : > { %10073 = vst [vmem:[#allocation10_spill] sm:$0xff] %v8486_v39 }
 0x11b   : > { %v8488_v40 = vpop.f32.mrb[24].mxu1  ;;  %v6245_v41 = vpop.f32.mrb[24].mxu0 }
 0x11c   : > { %10074 = vst [vmem:[#allocation11_spill] sm:$0xff] %v8488_v40  ;;  %v8490_v42 = vpop.f32.mrb[25].mxu1  ;;  %v1116_v43 = vpop.f32.mrb[25].mxu0 }
 0x11d   : > { %v7067_v45 = vpack.c.bf16 %v6245_v41, %v1116_v43 }
 0x11f   : > { %v8498_v46 = vpop.f32.mrb[26].mxu1  ;;  %7069 = vmatprep.subr.msk.bf16.mxu0 %vm8494_vm2, %v7067_v45  ;;  %v6248_v47 = vpop.f32.mrb[26].mxu0 }
 0x120   : > { %10077 = vst [vmem:[#allocation12_spill] sm:$0xff] %v8498_v46  ;;  %v8502_v48 = vpop.f32.mrb[27].mxu1  ;;  %7072 = vmatpush3.bf16.xpose.msk.msra.mxu0 %vm8494_vm2, %v7067_v45  ;;  %v1126_v49 = vpop.f32.mrb[27].mxu0 }
 0x121   : > { %10078 = vst [vmem:[#allocation13_spill] sm:$0xff] %v8502_v48  ;;  %v7073_v50 = vpack.c.bf16 %v6248_v47, %v1126_v49 }
 0x123   : > { %v8506_v51 = vpop.f32.mrb[28].mxu1  ;;  %7075 = vmatprep.subr.msk.bf16.mxu0 %vm8494_vm2, %v7073_v50  ;;  %v6251_v52 = vpop.f32.mrb[28].mxu0 }
 0x124   : > { %10079 = vst [vmem:[#allocation14_spill] sm:$0xff] %v8506_v51  ;;  %v8510_v53 = vpop.f32.mrb[29].mxu1  ;;  %v1136_v54 = vpop.f32.mrb[29].mxu0 }
 0x125   : > { %10080 = vst [vmem:[#allocation15_spill] sm:$0xff] %v8510_v53  ;;  %v7079_v55 = vpack.c.bf16 %v6251_v52, %v1136_v54 }
 0x127   : > { %v8512_v58 = vpop.f32.mrb[30].mxu1  ;;  %v6254_v10 = vpop.f32.mrb[30].mxu0 }
 0x128   : > { %10081 = vst [vmem:[#allocation16_spill] sm:$0xff] %v8512_v58  ;;  %v8514_v41 = vpop.f32.mrb[31].mxu1  ;;  %7078 = vmatpush3.bf16.xpose.msk.msra.mxu0 %vm8494_vm2, %v7073_v50  ;;  %v1146_v43 = vpop.f32.mrb[31].mxu0 }
 0x129   : > { %10082 = vst [vmem:[#allocation17_spill] sm:$0xff] %v8514_v41  ;;  %7081 = vmatprep.subr.msk.bf16.mxu0 %vm8494_vm2, %v7079_v55  ;;  %v7085_v45 = vpack.c.bf16 %v6254_v10, %v1146_v43 }
 0x12b   : > { %v8520_v47 = vpop.f32.mrb[32].mxu1  ;;  %v6257_v49 = vpop.f32.mrb[32].mxu0 }
 0x12c   : > { %10083 = vst [vmem:[#allocation18_spill] sm:$0xff] %v8520_v47  ;;  %v8522_v51 = vpop.f32.mrb[33].mxu1  ;;  %v1156_v53 = vpop.f32.mrb[33].mxu0 }
 0x12d   : > { %10084 = vst [vmem:[#allocation19_spill] sm:$0xff] %v8522_v51  ;;  %v7091_v52 = vpack.c.bf16 %v6257_v49, %v1156_v53 }
 0x12f   : > { %v8524_v54 = vpop.f32.mrb[34].mxu1  ;;  %v6260_v58 = vpop.f32.mrb[34].mxu0 }
 0x130   : > { %10085 = vst [vmem:[#allocation20_spill] sm:$0xff] %v8524_v54  ;;  %v8526_v46 = vpop.f32.mrb[35].mxu1  ;;  %7084 = vmatpush3.bf16.xpose.msk.msra.mxu0 %vm8494_vm2, %v7079_v55  ;;  %v1166_v50 = vpop.f32.mrb[35].mxu0 }
 0x131   : > { %10086 = vst [vmem:[#allocation21_spill] sm:$0xff] %v8526_v46  ;;  %7087 = vmatprep.subr.msk.bf16.mxu0 %vm8494_vm2, %v7085_v45  ;;  %v7097_v10 = vpack.c.bf16 %v6260_v58, %v1166_v50 }
 0x133   : > { %v8532_v43 = vpop.f32.mrb[36].mxu1  ;;  %v6263_v47 = vpop.f32.mrb[36].mxu0 }
 0x134   : > { %10087 = vst [vmem:[#allocation22_spill] sm:$0xff] %v8532_v43  ;;  %v8534_v41 = vpop.f32.mrb[37].mxu1  ;;  %v1176_v51 = vpop.f32.mrb[37].mxu0 }
 0x135   : > { %10088 = vst [vmem:[#allocation23_spill] sm:$0xff] %v8534_v41  ;;  %v7103_v53 = vpack.c.bf16 %v6263_v47, %v1176_v51 }
 0x137   : > { %v8536_v49 = vpop.f32.mrb[38].mxu1  ;;  %v6266_v54 = vpop.f32.mrb[38].mxu0 }
 0x138   : > { %10089 = vst [vmem:[#allocation24_spill] sm:$0xff] %v8536_v49  ;;  %v8538_v48 = vpop.f32.mrb[39].mxu1  ;;  %7090 = vmatpush3.bf16.xpose.msk.msra.mxu0 %vm8494_vm2, %v7085_v45  ;;  %v1186_v55 = vpop.f32.mrb[39].mxu0 }
 0x139   : > { %10090 = vst [vmem:[#allocation25_spill] sm:$0xff] %v8538_v48  ;;  %7093 = vmatprep.subr.msk.bf16.mxu0 %vm8494_vm2, %v7091_v52  ;;  %v7109_v58 = vpack.c.bf16 %v6266_v54, %v1186_v55 }
 0x13b   : > { %v6277_v50 = vpop.f32.mrb[40].mxu1  ;;  %v6309_v43 = vpop.f32.mrb[40].mxu0 }
 0x13c   : > { %v1261_v46 = vpop.f32.mrb[41].mxu1  ;;  %v1406_v40 = vpop.f32.mrb[41].mxu0 }
 0x13d   : > { %v7115_v41 = vpack.c.bf16 %v6277_v50, %v1261_v46  ;;  %v8544_v37 = vpack.c.bf16 %v6309_v43, %v1406_v40 }
 0x13f   : > { %7117 = vmatprep.subr.msk.bf16.mxu1 %vm8494_vm2, %v7115_v41  ;;  %v6280_v51 = vpop.f32.mrb[42].mxu1  ;;  %v6312_v47 = vpop.f32.mrb[42].mxu0 }
 0x140   : > { %7096 = vmatpush3.bf16.xpose.msk.msra.mxu0 %vm8494_vm2, %v7091_v52  ;;  %7120 = vmatpush3.bf16.xpose.msk.msra.mxu1 %vm8494_vm2, %v7115_v41  ;;  %v1271_v45 = vpop.f32.mrb[43].mxu1  ;;  %v1416_v54 = vpop.f32.mrb[43].mxu0 }
 0x141   : > { %v7121_v55 = vpack.c.bf16 %v6280_v51, %v1271_v45  ;;  %7099 = vmatprep.subr.msk.bf16.mxu0 %vm8494_vm2, %v7097_v10  ;;  %v8554_v46 = vpack.c.bf16 %v6312_v47, %v1416_v54 }
 0x143   : > { %7123 = vmatprep.subr.msk.bf16.mxu1 %vm8494_vm2, %v7121_v55  ;;  %v6283_v40 = vpop.f32.mrb[44].mxu1  ;;  %v6315_v43 = vpop.f32.mrb[44].mxu0 }
 0x144   : > { %v1281_v50 = vpop.f32.mrb[45].mxu1  ;;  %v1426_v49 = vpop.f32.mrb[45].mxu0 }
 0x145   : > { %v7127_v48 = vpack.c.bf16 %v6283_v40, %v1281_v50  ;;  %v8558_v52 = vpack.c.bf16 %v6315_v43, %v1426_v49 }
 0x147   : > { %v6286_v39 = vpop.f32.mrb[46].mxu1  ;;  %v6318_v41 = vpop.f32.mrb[46].mxu0 }
 0x148   : > { %7102 = vmatpush3.bf16.xpose.msk.msra.mxu0 %vm8494_vm2, %v7097_v10  ;;  %7126 = vmatpush3.bf16.xpose.msk.msra.mxu1 %vm8494_vm2, %v7121_v55  ;;  %v1291_v51 = vpop.f32.mrb[47].mxu1  ;;  %v1436_v47 = vpop.f32.mrb[47].mxu0 }
 0x149   : > { %7105 = vmatprep.subr.msk.bf16.mxu0 %vm8494_vm2, %v7103_v53  ;;  %7129 = vmatprep.subr.msk.bf16.mxu1 %vm8494_vm2, %v7127_v48  ;;  %v7133_v45 = vpack.c.bf16 %v6286_v39, %v1291_v51  ;;  %v8568_v54 = vpack.c.bf16 %v6318_v41, %v1436_v47 }
 0x14b   : > { %v6289_v49 = vpop.f32.mrb[48].mxu1  ;;  %v6321_v40 = vpop.f32.mrb[48].mxu0 }
 0x14c   : > { %v1301_v43 = vpop.f32.mrb[49].mxu1  ;;  %v1446_v50 = vpop.f32.mrb[49].mxu0 }
 0x14d   : > { %v7139_v33 = vpack.c.bf16 %v6289_v49, %v1301_v43  ;;  %v8570_v10 = vpack.c.bf16 %v6321_v40, %v1446_v50 }
 0x14f   : > { %v6292_v35 = vpop.f32.mrb[50].mxu1  ;;  %v6324_v55 = vpop.f32.mrb[50].mxu0 }
 0x150   : > { %7108 = vmatpush3.bf16.xpose.msk.msra.mxu0 %vm8494_vm2, %v7103_v53  ;;  %7132 = vmatpush3.bf16.xpose.msk.msra.mxu1 %vm8494_vm2, %v7127_v48  ;;  %v1311_v29 = vpop.f32.mrb[51].mxu1  ;;  %v1456_v31 = vpop.f32.mrb[51].mxu0 }
 0x151   : > { %7111 = vmatprep.subr.msk.bf16.mxu0 %vm8494_vm2, %v7109_v58  ;;  %7135 = vmatprep.subr.msk.bf16.mxu1 %vm8494_vm2, %v7133_v45  ;;  %v7145_v39 = vpack.c.bf16 %v6292_v35, %v1311_v29  ;;  %v8580_v41 = vpack.c.bf16 %v6324_v55, %v1456_v31 }
 0x153   : > { %v6295_v51 = vpop.f32.mrb[52].mxu1  ;;  %v6327_v47 = vpop.f32.mrb[52].mxu0 }
 0x154   : > { %v1321_v49 = vpop.f32.mrb[53].mxu1  ;;  %v1466_v40 = vpop.f32.mrb[53].mxu0 }
 0x155   : > { %v7151_v43 = vpack.c.bf16 %v6295_v51, %v1321_v49  ;;  %v8582_v53 = vpack.c.bf16 %v6327_v47, %v1466_v40 }
 0x157   : > { %v6298_v50 = vpop.f32.mrb[54].mxu1  ;;  %v6330_v48 = vpop.f32.mrb[54].mxu0 }
 0x158   : > { %7114 = vmatpush3.bf16.xpose.msk.msra.mxu0 %vm8494_vm2, %v7109_v58  ;;  %7138 = vmatpush3.bf16.xpose.msk.msra.mxu1 %vm8494_vm2, %v7133_v45  ;;  %v1331_v25 = vpop.f32.mrb[55].mxu1  ;;  %v1476_v27 = vpop.f32.mrb[55].mxu0 }
 0x159   : > { %7141 = vmatprep.subr.msk.bf16.mxu1 %vm8494_vm2, %v7139_v33  ;;  %7165 = vmatprep.subr.msk.bf16.mxu0 %vm8494_vm2, %v8544_v37  ;;  %v8593_v29 = vpack.c.bf16 %v6298_v50, %v1331_v25  ;;  %v8595_v31 = vpack.c.bf16 %v6330_v48, %v1476_v27 }
 0x15b   : > { %v6341_v35 = vpop.f32.mrb[56].mxu1  ;;  %v6373_v55 = vpop.f32.mrb[56].mxu0 }
 0x15c   : > { %v1551_v51 = vpop.f32.mrb[57].mxu1  ;;  %v1761_v58 = vpop.f32.mrb[57].mxu0 }
 0x15d   : > { %v8597_v47 = vpack.c.bf16 %v6341_v35, %v1551_v51  ;;  %v8599_v45 = vpack.c.bf16 %v6373_v55, %v1761_v58 }
 0x15f   : > { %6524 = vmatmul.mubr.msk.f32.vlgmr.msra.gmra.mrb[88].mxu0 %vm10021_vm1, %v8394_v56  ;;  %v6344_v49 = vpop.f32.mrb[58].mxu1  ;;  %v6376_v40 = vpop.f32.mrb[58].mxu0 }
 0x160   : > { %6526 = vmatprep.mubr.msk.f32.mxu0 %vm10021_vm1, %v8405_v62  ;;  %7144 = vmatpush3.bf16.xpose.msk.msra.mxu1 %vm8494_vm2, %v7139_v33  ;;  %v1561_v25 = vpop.f32.mrb[59].mxu1  ;;  %v1771_v27 = vpop.f32.mrb[59].mxu0 }
 0x161   : > { %7168 = vmatpush3.bf16.xpose.msk.msra.mxu0 %vm8494_vm2, %v8544_v37  ;;  %7147 = vmatprep.subr.msk.bf16.mxu1 %vm8494_vm2, %v7145_v39  ;;  %v8612_v50 = vpack.c.bf16 %v6344_v49, %v1561_v25  ;;  %v8614_v56 = vpack.c.bf16 %v6376_v40, %v1771_v27 }
 0x162   : > { %7171 = vmatprep.subr.msk.bf16.mxu0 %vm8494_vm2, %v8554_v46 }
 0x163   : > { %6527 = vmatmul.mubr.msk.f32.gmra.mrb[90].mxu0 %vm10021_vm1, %v8401_v60  ;;  %v6347_v62 = vpop.f32.mrb[60].mxu1  ;;  %v6379_v33 = vpop.f32.mrb[60].mxu0 }
 0x164   : > { %6529 = vmatprep.mubr.msk.f32.mxu0 %vm10021_vm1, %v8413_v2  ;;  %v1571_v37 = vpop.f32.mrb[61].mxu1  ;;  %v1781_v48 = vpop.f32.mrb[61].mxu0 }
 0x165   : > { %v8623_v35 = vpack.c.bf16 %v6347_v62, %v1571_v37  ;;  %v8625_v55 = vpack.c.bf16 %v6379_v33, %v1781_v48 }
 0x167   : > { %6530 = vmatmul.mubr.msk.f32.gmra.mrb[92].mxu0 %vm10021_vm1, %v8409_v0  ;;  %v6350_v51 = vpop.f32.mrb[62].mxu1  ;;  %v6382_v58 = vpop.f32.mrb[62].mxu0 }
 0x168   : > { %6532 = vmatprep.mubr.msk.f32.mxu0 %vm10021_vm1, %v8421_v6  ;;  %7150 = vmatpush3.bf16.xpose.msk.msra.mxu1 %vm8494_vm2, %v7145_v39  ;;  %v1581_v60 = vpop.f32.mrb[63].mxu1  ;;  %v1791_v49 = vpop.f32.mrb[63].mxu0 }
 0x169   : > { %7174 = vmatpush3.bf16.xpose.msk.msra.mxu0 %vm8494_vm2, %v8554_v46  ;;  %7153 = vmatprep.subr.msk.bf16.mxu1 %vm8494_vm2, %v7151_v43  ;;  %v8638_v2 = vpack.c.bf16 %v6350_v51, %v1581_v60  ;;  %v8640_v0 = vpack.c.bf16 %v6382_v58, %v1791_v49 }
 0x16a   : > { %7177 = vmatprep.subr.msk.bf16.mxu0 %vm8494_vm2, %v8558_v52 }
 0x16b   : > { %6533 = vmatmul.mubr.msk.f32.gmra.mrb[94].mxu0 %vm10021_vm1, %v8417_v4  ;;  %v6353_v6 = vpop.f32.mrb[64].mxu1  ;;  %v6385_v39 = vpop.f32.mrb[64].mxu0 }
 0x16c   : > { %6535 = vmatprep.mubr.msk.f32.mxu0 %vm10021_vm1, %v8398_v59  ;;  %v1591_v46 = vpop.f32.mrb[65].mxu1  ;;  %v1801_v40 = vpop.f32.mrb[65].mxu0 }
 0x16d   : > { %v8649_v25 = vpack.c.bf16 %v6353_v6, %v1591_v46  ;;  %v8651_v27 = vpack.c.bf16 %v6385_v39, %v1801_v40 }
 0x16f   : > { %6536 = vmatmul.mubr.msk.f32.gmra.mrb[96].mxu0 %vm10021_vm1, %v8396_v57  ;;  %v6356_v62 = vpop.f32.mrb[66].mxu1  ;;  %v6388_v33 = vpop.f32.mrb[66].mxu0 }
 0x170   : > { %6538 = vmatprep.mubr.msk.f32.mxu0 %vm10021_vm1, %v8407_v63  ;;  %7156 = vmatpush3.bf16.xpose.msk.msra.mxu1 %vm8494_vm2, %v7151_v43  ;;  %v1601_v4 = vpop.f32.mrb[67].mxu1  ;;  %v1811_v37 = vpop.f32.mrb[67].mxu0 }
 0x171   : > { %7180 = vmatpush3.bf16.xpose.msk.msra.mxu0 %vm8494_vm2, %v8558_v52  ;;  %7159 = vmatprep.subr.msk.bf16.mxu1 %vm8494_vm2, %v8593_v29  ;;  %v8665_v59 = vpack.c.bf16 %v6356_v62, %v1601_v4  ;;  %v8667_v57 = vpack.c.bf16 %v6388_v33, %v1811_v37 }
 0x172   : > { %7183 = vmatprep.subr.msk.bf16.mxu0 %vm8494_vm2, %v8568_v54 }
 0x173   : > { %6539 = vmatmul.mubr.msk.f32.gmra.mrb[98].mxu0 %vm10021_vm1, %v8403_v61  ;;  %v6359_v63 = vpop.f32.mrb[68].mxu1  ;;  %v6391_v43 = vpop.f32.mrb[68].mxu0 }
 0x174   : > { %6541 = vmatprep.mubr.msk.f32.mxu0 %vm10021_vm1, %v8415_v3  ;;  %v1611_v52 = vpop.f32.mrb[69].mxu1  ;;  %v1821_v48 = vpop.f32.mrb[69].mxu0 }
 0x175   : > { %v8676_v51 = vpack.c.bf16 %v6359_v63, %v1611_v52  ;;  %v8678_v58 = vpack.c.bf16 %v6391_v43, %v1821_v48 }
 0x177   : > { %6542 = vmatmul.mubr.msk.f32.gmra.mrb[100].mxu0 %vm10021_vm1, %v8411_v1  ;;  %v6362_v60 = vpop.f32.mrb[70].mxu1  ;;  %v6394_v49 = vpop.f32.mrb[70].mxu0 }
 0x178   : > { %6544 = vmatprep.mubr.msk.f32.mxu0 %vm10021_vm1, %v8423_v7  ;;  %7162 = vmatpush3.bf16.xpose.msk.msra.mxu1 %vm8494_vm2, %v8593_v29  ;;  %v1621_v61 = vpop.f32.mrb[71].mxu1  ;;  %v1831_v3 = vpop.f32.mrb[71].mxu0 }
 0x179   : > { %7186 = vmatpush3.bf16.xpose.msk.msra.mxu0 %vm8494_vm2, %v8568_v54  ;;  %7213 = vmatprep.subr.msk.bf16.mxu1 %vm8494_vm2, %v8597_v47  ;;  %v8693_v1 = vpack.c.bf16 %v6362_v60, %v1621_v61  ;;  %v8695_v6 = vpack.c.bf16 %v6394_v49, %v1831_v3 }
 0x17a   : > { %7189 = vmatprep.subr.msk.bf16.mxu0 %vm8494_vm2, %v8570_v10 }
 0x17b   : > { %6545 = vmatmul.mubr.msk.f32.gmra.mrb[102].mxu0 %vm10021_vm1, %v8419_v5  ;;  %v6405_v7 = vpop.f32.mrb[72].mxu1  ;;  %v6437_v29 = vpop.f32.mrb[72].mxu0 }
 0x17c   : > { %6635 = vmatprep.mubr.msk.f32.mxu0 %vm10021_vm1, %v8429_v11  ;;  %v1906_v54 = vpop.f32.mrb[73].mxu1  ;;  %v2051_v39 = vpop.f32.mrb[73].mxu0 }
 0x17d   : > { %v8704_v46 = vpack.c.bf16 %v6405_v7, %v1906_v54  ;;  %v8706_v40 = vpack.c.bf16 %v6437_v29, %v2051_v39 }
 0x17f   : > { %10091 = vst [vmem:[#allocation26_spill] sm:$0xff] %v8706_v40  ;;  %6580 = vmatmul.mubr.msk.f32.vlgmr.msra.gmra.mrb[104].mxu1 %vm10021_vm1, %v8425_v8  ;;  %v6408_v62 = vpop.f32.mrb[74].mxu1  ;;  %v6440_v33 = vpop.f32.mrb[74].mxu0 }
 0x180   : > { %6582 = vmatprep.mubr.msk.f32.mxu1 %vm10021_vm1, %v8436_v14  ;;  %7216 = vmatpush3.bf16.xpose.msk.msra.mxu1 %vm8494_vm2, %v8597_v47  ;;  %v1916_v5 = vpop.f32.mrb[75].mxu1  ;;  %v2061_v11 = vpop.f32.mrb[75].mxu0 }
 0x181   : > { %7192 = vmatpush3.bf16.xpose.msk.msra.mxu0 %vm8494_vm2, %v8570_v10  ;;  %7219 = vmatprep.subr.msk.bf16.mxu1 %vm8494_vm2, %v8612_v50  ;;  %v8721_v8 = vpack.c.bf16 %v6408_v62, %v1916_v5  ;;  %v8723_v4 = vpack.c.bf16 %v6440_v33, %v2061_v11 }
 0x182   : > { %7195 = vmatprep.subr.msk.bf16.mxu0 %vm8494_vm2, %v8580_v41 }
 0x183   : > { %10092 = vst [vmem:[#allocation27_spill] sm:$0xff] %v8723_v4  ;;  %6583 = vmatmul.mubr.msk.f32.gmra.mrb[106].mxu1 %vm10021_vm1, %v8432_v12  ;;  %v6411_v14 = vpop.f32.mrb[76].mxu1  ;;  %v6443_v47 = vpop.f32.mrb[76].mxu0 }
 0x184   : > { %6585 = vmatprep.mubr.msk.f32.mxu1 %vm10021_vm1, %v8444_v18  ;;  %v1926_v10 = vpop.f32.mrb[77].mxu1  ;;  %v2071_v37 = vpop.f32.mrb[77].mxu0 }
 0x185   : > { %v8732_v63 = vpack.c.bf16 %v6411_v14, %v1926_v10  ;;  %v8734_v43 = vpack.c.bf16 %v6443_v47, %v2071_v37  ;;  %v10115_v10 = vld [vmem:[#allocation15_spill] sm:$0xff] }
 0x187   : > { %10093 = vst [vmem:[#allocation28_spill] sm:$0xff] %v8734_v43  ;;  %6586 = vmatmul.mubr.msk.f32.gmra.mrb[108].mxu1 %vm10021_vm1, %v8440_v16  ;;  %v6414_v52 = vpop.f32.mrb[78].mxu1  ;;  %v6446_v48 = vpop.f32.mrb[78].mxu0 }
 0x188   : > { %6588 = vmatprep.mubr.msk.f32.mxu1 %vm10021_vm1, %v8452_v22  ;;  %7222 = vmatpush3.bf16.xpose.msk.msra.mxu1 %vm8494_vm2, %v8612_v50  ;;  %v1936_v12 = vpop.f32.mrb[79].mxu1  ;;  %v2081_v18 = vpop.f32.mrb[79].mxu0 }
 0x189   : > { %7198 = vmatpush3.bf16.xpose.msk.msra.mxu0 %vm8494_vm2, %v8580_v41  ;;  %7225 = vmatprep.subr.msk.bf16.mxu1 %vm8494_vm2, %v8623_v35  ;;  %v8749_v16 = vpack.c.bf16 %v6414_v52, %v1936_v12  ;;  %v8751_v60 = vpack.c.bf16 %v6446_v48, %v2081_v18  ;;  %v10116_v48 = vld [vmem:[#allocation14_spill] sm:$0xff]  ;;  %v10118_v12 = vld [vmem:[#allocation17_spill] sm:$0xff] }
 0x18a   : > { %7201 = vmatprep.subr.msk.bf16.mxu0 %vm8494_vm2, %v8582_v53 }
 0x18b   : > { %10094 = vst [vmem:[#allocation29_spill] sm:$0xff] %v8751_v60  ;;  %6589 = vmatmul.mubr.msk.f32.gmra.mrb[110].mxu1 %vm10021_vm1, %v8448_v20  ;;  %v6417_v22 = vpop.f32.mrb[80].mxu1  ;;  %v6449_v50 = vpop.f32.mrb[80].mxu0 }
 0x18c   : > { %6591 = vmatprep.mubr.msk.f32.mxu1 %vm10021_vm1, %v8460_v26  ;;  %v1946_v41 = vpop.f32.mrb[81].mxu1  ;;  %v2091_v49 = vpop.f32.mrb[81].mxu0 }
 0x18d   : > { %v8760_v61 = vpack.c.bf16 %v6417_v22, %v1946_v41  ;;  %v8762_v3 = vpack.c.bf16 %v6449_v50, %v2091_v49  ;;  %v10119_v50 = vld [vmem:[#allocation16_spill] sm:$0xff]  ;;  %v10121_v41 = vld [vmem:[#allocation19_spill] sm:$0xff] }
 0x18f   : > { %10095 = vst [vmem:[#allocation30_spill] sm:$0xff] %v8762_v3  ;;  %6592 = vmatmul.mubr.msk.f32.gmra.mrb[112].mxu1 %vm10021_vm1, %v8456_v24  ;;  %v6420_v7 = vpop.f32.mrb[82].mxu1  ;;  %v6452_v29 = vpop.f32.mrb[82].mxu0 }
 0x190   : > { %6594 = vmatprep.mubr.msk.f32.mxu1 %vm10021_vm1, %v8468_v30  ;;  %7228 = vmatpush3.bf16.xpose.msk.msra.mxu1 %vm8494_vm2, %v8623_v35  ;;  %v1956_v20 = vpop.f32.mrb[83].mxu1  ;;  %v2101_v26 = vpop.f32.mrb[83].mxu0 }
 0x191   : > { %7204 = vmatpush3.bf16.xpose.msk.msra.mxu0 %vm8494_vm2, %v8582_v53  ;;  %7231 = vmatprep.subr.msk.bf16.mxu1 %vm8494_vm2, %v8638_v2  ;;  %v8777_v24 = vpack.c.bf16 %v6420_v7, %v1956_v20  ;;  %v8779_v54 = vpack.c.bf16 %v6452_v29, %v2101_v26  ;;  %v10122_v29 = vld [vmem:[#allocation18_spill] sm:$0xff]  ;;  %v10124_v20 = vld [vmem:[#allocation21_spill] sm:$0xff]  ;;  %v10125_v26 = vld [vmem:[#allocation20_spill] sm:$0xff] }
 0x192   : > { %7207 = vmatprep.subr.msk.bf16.mxu0 %vm8494_vm2, %v8595_v31 }
 0x193   : > { %10096 = vst [vmem:[#allocation31_spill] sm:$0xff] %v8779_v54  ;;  %6595 = vmatmul.mubr.msk.f32.gmra.mrb[114].mxu1 %vm10021_vm1, %v8464_v28  ;;  %v6423_v30 = vpop.f32.mrb[84].mxu1  ;;  %v6455_v35 = vpop.f32.mrb[84].mxu0 }
 0x194   : > { %6597 = vmatprep.mubr.msk.f32.mxu1 %vm10021_vm1, %v8476_v34  ;;  %v1966_v53 = vpop.f32.mrb[85].mxu1  ;;  %v2111_v39 = vpop.f32.mrb[85].mxu0 }
 0x195   : > { %v8788_v62 = vpack.c.bf16 %v6423_v30, %v1966_v53  ;;  %v8790_v33 = vpack.c.bf16 %v6455_v35, %v2111_v39  ;;  %v10127_v30 = vld [vmem:[#allocation22_spill] sm:$0xff]  ;;  %v10128_v35 = vld [vmem:[#allocation25_spill] sm:$0xff] }
 0x197   : > { %10097 = vst [vmem:[#allocation32_spill] sm:$0xff] %v8790_v33  ;;  %6598 = vmatmul.mubr.msk.f32.gmra.mrb[116].mxu1 %vm10021_vm1, %v8472_v32  ;;  %v6426_v5 = vpop.f32.mrb[86].mxu1  ;;  %v6458_v11 = vpop.f32.mrb[86].mxu0 }
 0x198   : > { %6600 = vmatprep.mubr.msk.f32.mxu1 %vm10021_vm1, %v8484_v38  ;;  %7234 = vmatpush3.bf16.xpose.msk.msra.mxu1 %vm8494_vm2, %v8638_v2  ;;  %v1976_v28 = vpop.f32.mrb[87].mxu1  ;;  %v2121_v34 = vpop.f32.mrb[87].mxu0 }
 0x199   : > { %7210 = vmatpush3.bf16.xpose.msk.msra.mxu0 %vm8494_vm2, %v8595_v31  ;;  %7237 = vmatprep.subr.msk.bf16.mxu1 %vm8494_vm2, %v8649_v25  ;;  %v8805_v32 = vpack.c.bf16 %v6426_v5, %v1976_v28  ;;  %v8807_v14 = vpack.c.bf16 %v6458_v11, %v2121_v34 }
 0x19a   : > { %7260 = vmatprep.subr.bf16.mxu0 %v8599_v45 }
 0x19b   : > { %10098 = vst [vmem:[#allocation33_spill] sm:$0xff] %v8807_v14  ;;  %6601 = vmatmul.mubr.msk.f32.gmra.mrb[118].mxu1 %vm10021_vm1, %v8480_v36  ;;  %v6469_v38 = vpop.f32.mrb[88].mxu1 }
 0x19c   : > { %6691 = vmatprep.mubr.msk.f32.mxu1 %vm10021_vm1, %v8490_v42  ;;  %v2196_v2 = vpop.f32.mrb[89].mxu1  ;;  %v10106_v42 = vld [vmem:[#allocation7_spill] sm:$0xff] }
 0x19d   : > { %v8814_v47 = vpack.c.bf16 %v6469_v38, %v2196_v2 }
 0x19f   : > { %10099 = vst [vmem:[#allocation34_spill] sm:$0xff] %v8814_v47 }
 0x1a0   : > { %6636 = vmatmul.mubr.msk.f32.vlgmr.msra.gmra.mrb[104].mxu0 %vm10021_vm1, %v8427_v9  ;;  %7240 = vmatpush3.bf16.xpose.msk.msra.mxu1 %vm8494_vm2, %v8649_v25  ;;  %v10100_v9 = vld [vmem:[#allocation4_spill] sm:$0xff] }
 0x1a1   : > { %6638 = vmatprep.mubr.msk.f32.mxu0 %vm10021_vm1, %v8438_v15  ;;  %7243 = vmatprep.subr.msk.bf16.mxu1 %vm8494_vm2, %v8665_v59  ;;  %v10102_v15 = vld [vmem:[#allocation6_spill] sm:$0xff] }
 0x1a2   : > { %7262 = vmatpush3.bf16.msra.mxu0 %v8599_v45  ;;  %v10107_v45 = vld [vmem:[#allocation10_spill] sm:$0xff] }
 0x1a3   : > { %7264 = vmatprep.subr.bf16.mxu0 %v8614_v56 }
 0x1a4   : > { %6639 = vmatmul.mubr.msk.f32.gmra.mrb[106].mxu0 %vm10021_vm1, %v8434_v13  ;;  %v10101_v13 = vld [vmem:[#allocation3_spill] sm:$0xff] }
 0x1a5   : > { %6641 = vmatprep.mubr.msk.f32.mxu0 %vm10021_vm1, %v8446_v19  ;;  %v6472_v19 = vpop.f32.mrb[90].mxu1 }
 0x1a6   : > { %7266 = vmatpush3.bf16.msra.mxu0 %v8614_v56 }
 0x1a7   : > { %7268 = vmatprep.subr.bf16.mxu0 %v8625_v55 }
 0x1a8   : > { %6642 = vmatmul.mubr.msk.f32.gmra.mrb[108].mxu0 %vm10021_vm1, %v8442_v17  ;;  %7246 = vmatpush3.bf16.xpose.msk.msra.mxu1 %vm8494_vm2, %v8665_v59  ;;  %v10103_v17 = vld [vmem:[#allocation5_spill] sm:$0xff] }
 0x1a9   : > { %6644 = vmatprep.mubr.msk.f32.mxu0 %vm10021_vm1, %v8454_v23  ;;  %7249 = vmatprep.subr.msk.bf16.mxu1 %vm8494_vm2, %v8676_v51  ;;  %v2206_v23 = vpop.f32.mrb[91].mxu1 }
 0x1aa   : > { %7270 = vmatpush3.bf16.msra.mxu0 %v8625_v55  ;;  %v8870_v36 = vpack.c.bf16 %v6472_v19, %v2206_v23  ;;  %v6475_v31 = vpop.f32.mrb[92].mxu1 }
 0x1ab   : > { %7272 = vmatprep.subr.bf16.mxu0 %v8640_v0  ;;  %v2216_v56 = vpop.f32.mrb[93].mxu1 }
 0x1ac   : > { %6645 = vmatmul.mubr.msk.f32.gmra.mrb[110].mxu0 %vm10021_vm1, %v8450_v21  ;;  %v10104_v21 = vld [vmem:[#allocation8_spill] sm:$0xff]  ;;  %10105 = vst [vmem:[#allocation4_spill] sm:$0xff] %v8870_v36  ;;  %v8882_v55 = vpack.c.bf16 %v6475_v31, %v2216_v56  ;;  %v6478_v25 = vpop.f32.mrb[94].mxu1 }
 0x1ad   : > { %6647 = vmatprep.mubr.msk.f32.mxu0 %vm10021_vm1, %v10100_v9  ;;  %v2226_v44 = vpop.f32.mrb[95].mxu1 }
 0x1ae   : > { %7274 = vmatpush3.bf16.msra.mxu0 %v8640_v0  ;;  %10108 = vst [vmem:[#allocation3_spill] sm:$0xff] %v8882_v55  ;;  %v10109_v0 = vld [vmem:[#allocation9_spill] sm:$0xff]  ;;  %v8890_v59 = vpack.c.bf16 %v6478_v25, %v2226_v44 }
 0x1af   : > { %7276 = vmatprep.subr.bf16.mxu0 %v8651_v27 }
 0x1b0   : > { %6648 = vmatmul.mubr.msk.f32.gmra.mrb[112].mxu0 %vm10021_vm1, %v10101_v13  ;;  %7252 = vmatpush3.bf16.xpose.msk.msra.mxu1 %vm8494_vm2, %v8676_v51  ;;  %10111 = vst [vmem:[#allocation6_spill] sm:$0xff] %v8890_v59  ;;  %v6481_v51 = vpop.f32.mrb[96].mxu1 }
 0x1b1   : > { %6650 = vmatprep.mubr.msk.f32.mxu0 %vm10021_vm1, %v10102_v15  ;;  %7255 = vmatprep.subr.msk.bf16.mxu1 %vm8494_vm2, %v8693_v1 }
 0x1b2   : > { %7278 = vmatpush3.bf16.msra.mxu0 %v8651_v27  ;;  %v10110_v27 = vld [vmem:[#allocation11_spill] sm:$0xff] }
 0x1b3   : > { %7280 = vmatprep.subr.bf16.mxu0 %v8667_v57 }
 0x1b4   : > { %6651 = vmatmul.mubr.msk.f32.gmra.mrb[114].mxu0 %vm10021_vm1, %v10103_v17 }
 0x1b5   : > { %6653 = vmatprep.mubr.msk.f32.mxu0 %vm10021_vm1, %v10104_v21 }
 0x1b6   : > { %7282 = vmatpush3.bf16.msra.mxu0 %v8667_v57  ;;  %v10112_v57 = vld [vmem:[#allocation13_spill] sm:$0xff] }
 0x1b7   : > { %7284 = vmatprep.subr.bf16.mxu0 %v8678_v58 }
 0x1b8   : > { %6654 = vmatmul.mubr.msk.f32.gmra.mrb[116].mxu0 %vm10021_vm1, %v10106_v42  ;;  %7258 = vmatpush3.bf16.xpose.msk.msra.mxu1 %vm8494_vm2, %v8693_v1  ;;  %v10113_v1 = vld [vmem:[#allocation12_spill] sm:$0xff] }
 0x1b9   : > { %6656 = vmatprep.mubr.msk.f32.mxu0 %vm10021_vm1, %v10107_v45  ;;  %7292 = vmatprep.subr.bf16.mxu1 %v8704_v46 }
 0x1ba   : > { %7286 = vmatpush3.bf16.msra.mxu0 %v8678_v58  ;;  %v2236_v58 = vpop.f32.mrb[97].mxu1 }
 0x1bb   : > { %7288 = vmatprep.subr.bf16.mxu0 %v8695_v6  ;;  %v6484_v37 = vpop.f32.mrb[98].mxu1 }
 0x1bc   : > { %6657 = vmatmul.mubr.msk.f32.gmra.mrb[118].mxu0 %vm10021_vm1, %v10109_v0  ;;  %v2246_v52 = vpop.f32.mrb[99].mxu1 }
 0x1bd   : > { %v6487_v18 = vpop.f32.mrb[100].mxu1 }
 0x1be   : > { %7290 = vmatpush3.bf16.msra.mxu0 %v8695_v6  ;;  %v8898_v6 = vpack.c.bf16 %v6481_v51, %v2236_v58  ;;  %v2256_v22 = vpop.f32.mrb[101].mxu1 }
 0x1bf   : > { %6692 = vmatmul.mubr.msk.f32.vlgmr.msra.gmra.mrb[120].mxu1 %vm10021_vm1, %v10110_v27  ;;  %7324 = vmatprep.subr.bf16.mxu0 %v8706_v40  ;;  %v6490_v49 = vpop.f32.mrb[102].mxu1 }
 0x1c0   : > { %6694 = vmatprep.mubr.msk.f32.mxu1 %vm10021_vm1, %v10112_v57  ;;  %7294 = vmatpush3.bf16.msra.mxu1 %v8704_v46  ;;  %10114 = vst [vmem:[#allocation5_spill] sm:$0xff] %v8898_v6  ;;  %v8906_v46 = vpack.c.bf16 %v6484_v37, %v2246_v52  ;;  %v2266_v7 = vpop.f32.mrb[103].mxu1 }
 0x1c1   : > { %7296 = vmatprep.subr.bf16.mxu1 %v8721_v8 }
 0x1c2   : > { %10117 = vst [vmem:[#allocation8_spill] sm:$0xff] %v8906_v46 }
 0x1c3   : > { %6695 = vmatmul.mubr.msk.f32.gmra.mrb[122].mxu1 %vm10021_vm1, %v10113_v1 }
 0x1c4   : > { %6697 = vmatprep.mubr.msk.f32.mxu1 %vm10021_vm1, %v10115_v10  ;;  %7298 = vmatpush3.bf16.msra.mxu1 %v8721_v8  ;;  %v8914_v8 = vpack.c.bf16 %v6487_v18, %v2256_v22 }
 0x1c5   : > { %7300 = vmatprep.subr.bf16.mxu1 %v8732_v63 }
 0x1c6   : > { %10120 = vst [vmem:[#allocation7_spill] sm:$0xff] %v8914_v8 }
 0x1c7   : > { %6698 = vmatmul.mubr.msk.f32.gmra.mrb[124].mxu1 %vm10021_vm1, %v10116_v48 }
 0x1c8   : > { %6700 = vmatprep.mubr.msk.f32.mxu1 %vm10021_vm1, %v10118_v12  ;;  %7302 = vmatpush3.bf16.msra.mxu1 %v8732_v63  ;;  %v8922_v63 = vpack.c.bf16 %v6490_v49, %v2266_v7 }
 0x1c9   : > { %7304 = vmatprep.subr.bf16.mxu1 %v8749_v16 }
 0x1ca   : > { %10123 = vst [vmem:[#allocation10_spill] sm:$0xff] %v8922_v63 }
 0x1cb   : > { %6701 = vmatmul.mubr.msk.f32.gmra.mrb[126].mxu1 %vm10021_vm1, %v10119_v50 }
 0x1cc   : > { %6703 = vmatprep.mubr.msk.f32.mxu1 %vm10021_vm1, %v10121_v41  ;;  %7306 = vmatpush3.bf16.msra.mxu1 %v8749_v16  ;;  %v10126_v16 = vld [vmem:[#allocation23_spill] sm:$0xff] }
 0x1cd   : > { %7308 = vmatprep.subr.bf16.mxu1 %v8760_v61 }
 0x1cf   : > { %6704 = vmatmul.mubr.msk.f32.gmra.mrb[128].mxu1 %vm10021_vm1, %v10122_v29 }
 0x1d0   : > { %6706 = vmatprep.mubr.msk.f32.mxu1 %vm10021_vm1, %v10124_v20  ;;  %7310 = vmatpush3.bf16.msra.mxu1 %v8760_v61  ;;  %v10129_v61 = vld [vmem:[#allocation24_spill] sm:$0xff] }
 0x1d1   : > { %7312 = vmatprep.subr.bf16.mxu1 %v8777_v24 }
 0x1d3   : > { %6707 = vmatmul.mubr.msk.f32.gmra.mrb[130].mxu1 %vm10021_vm1, %v10125_v26 }
 0x1d4   : > { %6709 = vmatprep.mubr.msk.f32.mxu1 %vm10021_vm1, %v10126_v16  ;;  %7314 = vmatpush3.bf16.msra.mxu1 %v8777_v24  ;;  %v3240_v24 = vlaneseq }
 0x1d5   : > { %7316 = vmatprep.subr.bf16.mxu1 %v8788_v62 }
 0x1d6   : > { %v8944_v53 = vshrl.u32 %v3240_v24, 7  ;;  %v3274_v5 = vand.u32 127, %v3240_v24 }
 0x1d7   : > { %6710 = vmatmul.mubr.msk.f32.gmra.mrb[132].mxu1 %vm10021_vm1, %v10127_v30 }
 0x1d8   : > { %6712 = vmatprep.mubr.msk.f32.mxu1 %vm10021_vm1, %v10128_v35  ;;  %7318 = vmatpush3.bf16.msra.mxu1 %v8788_v62  ;;  %v3242_v39 = vadd.s32 8, %v8944_v53  ;;  %v3244_v11 = vadd.s32 24, %v8944_v53  ;;  %v3275_v34 = vcvt.s32.f32 %v3274_v5  ;;  %v3257_v62 = vcvt.s32.f32 %v8944_v53 }
 0x1d9   : > { %7320 = vmatprep.subr.bf16.mxu1 %v8805_v32  ;;  %v8950_v38 = vadd.s32 16, %v8944_v53  ;;  %v8953_v2 = vadd.s32 40, %v8944_v53  ;;  %v8958_v21 = vadd.s32 32, %v8944_v53  ;;  %v8961_v23 = vadd.s32 56, %v8944_v53 }
 0x1da   : > { %v3258_v28 = vcvt.s32.f32 %v3242_v39  ;;  %v3356_v13 = vadd.f32 0.5, %v3275_v34  ;;  %v3276_v15 = vadd.f32 0.5, %v3257_v62  ;;  %v8966_v57 = vadd.s32 48, %v8944_v53 }
 0x1db   : > { %6713 = vmatmul.mubr.msk.f32.gmra.mrb[134].mxu1 %vm10021_vm1, %v10129_v61  ;;  %v3259_v17 = vcvt.s32.f32 %v8950_v38  ;;  %v3262_v19 = vcvt.s32.f32 %v8953_v2  ;;  %v3261_v44 = vcvt.s32.f32 %v8958_v21  ;;  %v3264_v27 = vcvt.s32.f32 %v8961_v23 }
 0x1dc   : > { %7322 = vmatpush3.bf16.msra.mxu1 %v8805_v32  ;;  %v3260_v32 = vcvt.s32.f32 %v3244_v11  ;;  %v3277_v9 = vadd.f32 0.5, %v3258_v28  ;;  %v3357_v45 = vmul.f32 0.125, %v3356_v13  ;;  %v3292_v56 = vmul.f32 0.125, %v3276_v15 }
 0x1dd   : > { %7356 = vmatprep.subr.bf16.mxu1 %v8814_v47  ;;  %v3278_v0 = vadd.f32 0.5, %v3259_v17  ;;  %v3281_v25 = vadd.f32 0.5, %v3262_v19  ;;  %v8969_v51 = vadd.s32 72, %v8944_v53  ;;  %v3280_v12 = vadd.f32 0.5, %v3261_v44 }
 0x1de   : > { %v3279_v42 = vadd.f32 0.5, %v3260_v32  ;;  %v3293_v31 = vmul.f32 0.125, %v3277_v9  ;;  %v3358_v10 = vfloor.f32 %v3357_v45  ;;  %v3308_v37 = vfloor.f32 %v3292_v56 }
 0x1df   : > { %v3294_v52 = vmul.f32 0.125, %v3278_v0  ;;  %v3297_v48 = vmul.f32 0.125, %v3281_v25  ;;  %v3283_v18 = vadd.f32 0.5, %v3264_v27  ;;  %v3263_v22 = vcvt.s32.f32 %v8966_v57 }
 0x1e0   : > { %v3295_v58 = vmul.f32 0.125, %v3279_v42  ;;  %v3309_v1 = vfloor.f32 %v3293_v31  ;;  %v3266_v50 = vcvt.s32.f32 %v8969_v51  ;;  %v8978_v41 = vadd.s32 64, %v8944_v53 }
 0x1e1   : > { %v8981_v7 = vadd.s32 88, %v8944_v53  ;;  %v3359_v20 = vmul.f32 8.0, %v3358_v10  ;;  %v3324_v26 = vmul.f32 8.0, %v3308_v37  ;;  %v3310_v16 = vfloor.f32 %v3294_v52 }
 0x1e2   : > { %v3311_v49 = vfloor.f32 %v3295_v58  ;;  %v3325_v29 = vmul.f32 8.0, %v3309_v1  ;;  %v3313_v30 = vfloor.f32 %v3297_v48  ;;  %v3296_v35 = vmul.f32 0.125, %v3280_v12 }
 0x1e3   : > { %v3299_v61 = vmul.f32 0.125, %v3283_v18  ;;  %v3282_v24 = vadd.f32 0.5, %v3263_v22  ;;  %v3285_v39 = vadd.f32 0.5, %v3266_v50  ;;  %v3265_v5 = vcvt.s32.f32 %v8978_v41 }
 0x1e4   : > { %v3327_v11 = vmul.f32 8.0, %v3311_v49  ;;  %v3268_v38 = vcvt.s32.f32 %v8981_v7  ;;  %v8990_v2 = vadd.s32 80, %v8944_v53  ;;  %v8992_v9 = vsub.f32 %v3258_v28, %v3325_v29 }
 0x1e5   : > { %v8994_v13 = vsub.f32 %v3275_v34, %v3359_v20  ;;  %v8997_v15 = vadd.s32 104, %v8944_v53  ;;  %v8999_v42 = vsub.f32 %v3257_v62, %v3324_v26  ;;  %v3326_v31 = vmul.f32 8.0, %v3310_v16 }
 0x1e6   : > { %v3329_v45 = vmul.f32 8.0, %v3313_v30  ;;  %v3312_v56 = vfloor.f32 %v3296_v35  ;;  %v3315_v0 = vfloor.f32 %v3299_v61  ;;  %v3298_v25 = vmul.f32 0.125, %v3282_v24 }
 0x1e7   : > { %v3301_v58 = vmul.f32 0.125, %v3285_v39  ;;  %v3284_v1 = vadd.f32 0.5, %v3265_v5  ;;  %v9003_v10 = vsub.f32 %v3260_v32, %v3327_v11  ;;  %v3287_v28 = vadd.f32 0.5, %v3268_v38 }
 0x1e8   : > { %v3267_v34 = vcvt.s32.f32 %v8990_v2  ;;  %vm3362_vm3 = vcmp.eq.f32.partialorder %v8992_v9, %v8994_v13  ;;  %v3270_v62 = vcvt.s32.f32 %v8997_v15  ;;  %v9012_v37 = vadd.s32 96, %v8944_v53 }
 0x1e9   : > { %v9015_v52 = vadd.s32 120, %v8944_v53  ;;  %vm3361_vm4 = vcmp.eq.f32.partialorder %v8999_v42, %v8994_v13  ;;  %v9019_v32 = vsub.f32 %v3259_v17, %v3326_v31  ;;  %v9021_v48 = vsub.f32 %v3262_v19, %v3329_v45 }
 0x1ea   : > { %v3328_v12 = vmul.f32 8.0, %v3312_v56  ;;  %v3331_v49 = vmul.f32 8.0, %v3315_v0  ;;  %v3314_v29 = vfloor.f32 %v3298_v25  ;;  %v3317_v20 = vfloor.f32 %v3301_v58 }
 0x1eb   : > { %v3300_v26 = vmul.f32 0.125, %v3284_v1  ;;  %vm3364_vm5 = vcmp.eq.f32.partialorder %v9003_v10, %v8994_v13  ;;  %v3303_v35 = vmul.f32 0.125, %v3287_v28  ;;  %v3286_v17 = vadd.f32 0.5, %v3267_v34 }
 0x1ec   : > { %v3289_v19 = vadd.f32 0.5, %v3270_v62  ;;  %v3269_v61 = vcvt.s32.f32 %v9012_v37  ;;  %v3272_v24 = vcvt.s32.f32 %v9015_v52  ;;  %v9038_v39 = vadd.s32 112, %v8944_v53 }
 0x1ed   : > { %vm3363_vm6 = vcmp.eq.f32.partialorder %v9019_v32, %v8994_v13  ;;  %vm3366_vm7 = vcmp.eq.f32.partialorder %v9021_v48, %v8994_v13  ;;  %v9046_v11 = vsub.f32 %v3261_v44, %v3328_v12  ;;  %v9050_v45 = vsub.f32 %v3264_v27, %v3331_v49 }
 0x1ee   : > { %v3330_v56 = vmul.f32 8.0, %v3314_v29  ;;  %v3333_v0 = vmul.f32 8.0, %v3317_v20  ;;  %v3316_v25 = vfloor.f32 %v3300_v26  ;;  %v3319_v44 = vfloor.f32 %v3303_v35 }
 0x1ef   : > { %v3302_v1 = vmul.f32 0.125, %v3286_v17  ;;  %v3305_v23 = vmul.f32 0.125, %v3289_v19  ;;  %v3288_v27 = vadd.f32 0.5, %v3269_v61  ;;  %v3291_v28 = vadd.f32 0.5, %v3272_v24 }
 0x1f0   : > { %v3271_v12 = vcvt.s32.f32 %v9038_v39  ;;  %vm3365_vm8 = vcmp.eq.f32.partialorder %v9046_v11, %v8994_v13  ;;  %vm3368_vm9 = vcmp.eq.f32.partialorder %v9050_v45, %v8994_v13  ;;  %v9075_v49 = vsub.f32 %v3263_v22, %v3330_v56 }
 0x1f1   : > { %v9079_v29 = vsub.f32 %v3266_v50, %v3333_v0  ;;  %v3332_v20 = vmul.f32 8.0, %v3316_v25  ;;  %v3335_v17 = vmul.f32 8.0, %v3319_v44  ;;  %v3318_v57 = vfloor.f32 %v3302_v1 }
 0x1f2   : > { %v3321_v51 = vfloor.f32 %v3305_v23  ;;  %v3304_v22 = vmul.f32 0.125, %v3288_v27  ;;  %v3307_v50 = vmul.f32 0.125, %v3291_v28  ;;  %v3290_v19 = vadd.f32 0.5, %v3271_v12 }
 0x1f3   : > { %vm3367_vm10 = vcmp.eq.f32.partialorder %v9075_v49, %v8994_v13  ;;  %vm3370_vm11 = vcmp.eq.f32.partialorder %v9079_v29, %v8994_v13  ;;  %v9101_v56 = vsub.f32 %v3265_v5, %v3332_v20  ;;  %v9115_v44 = vsub.f32 %v3268_v38, %v3335_v17 }
 0x1f4   : > { %v3334_v1 = vmul.f32 8.0, %v3318_v57  ;;  %v3337_v41 = vmul.f32 8.0, %v3321_v51  ;;  %v3320_v5 = vfloor.f32 %v3304_v22  ;;  %v3323_v23 = vfloor.f32 %v3307_v50 }
 0x1f5   : > { %v3306_v27 = vmul.f32 0.125, %v3290_v19  ;;  %vm3369_vm12 = vcmp.eq.f32.partialorder %v9101_v56, %v8994_v13  ;;  %vm3372_vm13 = vcmp.eq.f32.partialorder %v9115_v44, %v8994_v13 }
 0x1f6   : > { %v9135_v20 = vsub.f32 %v3267_v34, %v3334_v1  ;;  %v3336_v17 = vmul.f32 8.0, %v3320_v5  ;;  %v3339_v57 = vmul.f32 8.0, %v3323_v23 }
 0x1f7   : > { %v3322_v51 = vfloor.f32 %v3306_v27 }
 0x1f8   : > { %vm3371_vm14 = vcmp.eq.f32.partialorder %v9135_v20, %v8994_v13  ;;  %v9161_v15 = vsub.f32 %v3269_v61, %v3336_v17  ;;  %v9165_v34 = vsub.f32 %v3272_v24, %v3339_v57 }
 0x1fa   : > { %vm3373_vm2 = vcmp.eq.f32.partialorder %v9161_v15, %v8994_v13  ;;  %vm3376_vm0 = vcmp.eq.f32.partialorder %v9165_v34, %v8994_v13 }
 0x232   : > { %v6525_v18 = vpop.f32.mrb[88].mxu0 }
 0x233   : > { %v2438_v16 = vpop.f32.mrb[89].mxu0  ;;  %v9026_v30 = vsel %vm3362_vm3, %v6525_v18, -1e+30 }
 0x234   : > { %3475 = vmax.xlane.f32.xlu0 %v9026_v30  ;;  %v9055_v58 = vsel %vm3361_vm4, %v2438_v16, -1e+30 }
 0x236   : > { %v6528_v31 = vpop.f32.mrb[90].mxu0 }
 0x237   : > { %v2448_v53 = vpop.f32.mrb[91].mxu0  ;;  %v9060_v21 = vsel %vm3364_vm5, %v6528_v31, -1e+30 }
 0x238   : > { %3473 = vmax.xlane.f32.xlu0 %v9055_v58  ;;  %3479 = vmax.xlane.f32.xlu1 %v9060_v21  ;;  %v9084_v16 = vsel %vm3363_vm6, %v2448_v53, -1e+30 }
 0x23a   : > { %v6531_v18 = vpop.f32.mrb[92].mxu0 }
 0x23b   : > { %v2458_v26 = vpop.f32.mrb[93].mxu0  ;;  %v9089_v35 = vsel %vm3366_vm7, %v6531_v18, -1e+30 }
 0x23c   : > { %3477 = vmax.xlane.f32.xlu0 %v9084_v16  ;;  %3483 = vmax.xlane.f32.xlu1 %v9089_v35  ;;  %v9106_v25 = vsel %vm3365_vm8, %v2458_v26, -1e+30  ;;  %v9141_v26 = vsub.f32 %v3270_v62, %v3337_v41  ;;  %v3338_v62 = vmul.f32 8.0, %v3322_v51 }
 0x23e   : > { %v6534_v31 = vpop.f32.mrb[94].mxu0  ;;  %vm3374_vm15 = vcmp.eq.f32.partialorder %v9141_v26, %v8994_v13  ;;  %v9185_v37 = vsub.f32 %v3271_v12, %v3338_v62 }
 0x23f   : > { %v2468_v0 = vpop.f32.mrb[95].mxu0  ;;  %v9111_v53 = vsel %vm3368_vm9, %v6534_v31, -1e+30 }
 0x240   : > { %3481 = vmax.xlane.f32.xlu0 %v9106_v25  ;;  %3487 = vmax.xlane.f32.xlu1 %v9111_v53  ;;  %v9124_v7 = vsel %vm3367_vm10, %v2468_v0, -1e+30  ;;  %vm3375_vm1 = vcmp.eq.f32.partialorder %v9185_v37, %v8994_v13 }
 0x242   : > { %v6537_v28 = vpop.f32.mrb[96].mxu0 }
 0x243   : > { %v2478_v18 = vpop.f32.mrb[97].mxu0  ;;  %v9129_v38 = vsel %vm3370_vm11, %v6537_v28, -1e+30 }
 0x244   : > { %3485 = vmax.xlane.f32.xlu0 %v9124_v7  ;;  %3491 = vmax.xlane.f32.xlu1 %v9129_v38  ;;  %v9146_v19 = vsel %vm3369_vm12, %v2478_v18, -1e+30 }
 0x246   : > { %v6540_v22 = vpop.f32.mrb[98].mxu0 }
 0x247   : > { %v2488_v50 = vpop.f32.mrb[99].mxu0  ;;  %v9151_v2 = vsel %vm3372_vm13, %v6540_v22, -1e+30 }
 0x248   : > { %3489 = vmax.xlane.f32.xlu0 %v9146_v19  ;;  %3495 = vmax.xlane.f32.xlu1 %v9151_v2  ;;  %v9170_v1 = vsel %vm3371_vm14, %v2488_v50, -1e+30 }
 0x24a   : > { %v6543_v31 = vpop.f32.mrb[100].mxu0 }
 0x24b   : > { %v2498_v0 = vpop.f32.mrb[101].mxu0  ;;  %v9175_v41 = vsel %vm3374_vm15, %v6543_v31, -1e+30 }
 0x24c   : > { %3493 = vmax.xlane.f32.xlu0 %v9170_v1  ;;  %3499 = vmax.xlane.f32.xlu1 %v9175_v41  ;;  %v9190_v24 = vsel %vm3373_vm2, %v2498_v0, -1e+30 }
 0x24e   : > { %v6546_v52 = vpop.f32.mrb[102].mxu0 }
 0x24f   : > { %v2508_v61 = vpop.f32.mrb[103].mxu0  ;;  %v9195_v5 = vsel %vm3376_vm0, %v6546_v52, -1e+30 }
 0x250   : > { %3497 = vmax.xlane.f32.xlu0 %v9190_v24  ;;  %3503 = vmax.xlane.f32.xlu1 %v9195_v5  ;;  %v9209_v27 = vsel %vm3375_vm1, %v2508_v61, -1e+30 }
 0x252   : > { %v6581_v39 = vpop.f32.mrb[104].mxu1 }
 0x253   : > { %v2679_v12 = vpop.f32.mrb[105].mxu1  ;;  %v9204_v23 = vsel %vm3362_vm3, %v6581_v39, -1e+30 }
 0x254   : > { %3507 = vmax.xlane.f32.xlu1 %v9204_v23  ;;  %3501 = vmax.xlane.f32.xlu0 %v9209_v27  ;;  %v9216_v17 = vsel %vm3361_vm4, %v2679_v12, -1e+30 }
 0x256   : > { %v6584_v28 = vpop.f32.mrb[106].mxu1 }
 0x257   : > { %v2689_v18 = vpop.f32.mrb[107].mxu1  ;;  %v9228_v50 = vsel %vm3364_vm5, %v6584_v28, -1e+30 }
 0x258   : > { %3505 = vmax.xlane.f32.xlu1 %v9216_v17  ;;  %v9222_v57 = vsel %vm3363_vm6, %v2689_v18, -1e+30 }
 0x259   : > { %3509 = vmax.xlane.f32.xlu0 %v9222_v57 }
 0x25a   : > { %v6587_v51 = vpop.f32.mrb[108].mxu1 }
 0x25b   : > { %v2699_v22 = vpop.f32.mrb[109].mxu1  ;;  %v9240_v52 = vsel %vm3366_vm7, %v6587_v51, -1e+30 }
 0x25c   : > { %3511 = vmax.xlane.f32.xlu1 %v9228_v50  ;;  %v9234_v62 = vsel %vm3365_vm8, %v2699_v22, -1e+30 }
 0x25d   : > { %3513 = vmax.xlane.f32.xlu0 %v9234_v62 }
 0x25e   : > { %v6590_v31 = vpop.f32.mrb[110].mxu1 }
 0x25f   : > { %v2709_v0 = vpop.f32.mrb[111].mxu1  ;;  %v9252_v28 = vsel %vm3368_vm9, %v6590_v31, -1e+30 }
 0x260   : > { %3515 = vmax.xlane.f32.xlu1 %v9240_v52  ;;  %v9246_v61 = vsel %vm3367_vm10, %v2709_v0, -1e+30 }
 0x261   : > { %3517 = vmax.xlane.f32.xlu0 %v9246_v61 }
 0x262   : > { %v6593_v39 = vpop.f32.mrb[112].mxu1 }
 0x263   : > { %v2719_v12 = vpop.f32.mrb[113].mxu1  ;;  %v9264_v0 = vsel %vm3370_vm11, %v6593_v39, -1e+30 }
 0x264   : > { %3519 = vmax.xlane.f32.xlu1 %v9252_v28  ;;  %v9258_v18 = vsel %vm3369_vm12, %v2719_v12, -1e+30 }
 0x265   : > { %3521 = vmax.xlane.f32.xlu0 %v9258_v18 }
 0x266   : > { %v6596_v51 = vpop.f32.mrb[114].mxu1 }
 0x267   : > { %v2729_v22 = vpop.f32.mrb[115].mxu1  ;;  %v9276_v8 = vsel %vm3372_vm13, %v6596_v51, -1e+30 }
 0x268   : > { %3523 = vmax.xlane.f32.xlu1 %v9264_v0  ;;  %v9270_v31 = vsel %vm3371_vm14, %v2729_v22, -1e+30 }
 0x269   : > { %3525 = vmax.xlane.f32.xlu0 %v9270_v31 }
 0x26a   : > { %v6599_v12 = vpop.f32.mrb[116].mxu1 }
 0x26b   : > { %v2739_v63 = vpop.f32.mrb[117].mxu1  ;;  %v9288_v6 = vsel %vm3374_vm15, %v6599_v12, -1e+30 }
 0x26c   : > { %3527 = vmax.xlane.f32.xlu1 %v9276_v8  ;;  %v9282_v39 = vsel %vm3373_vm2, %v2739_v63, -1e+30 }
 0x26d   : > { %3529 = vmax.xlane.f32.xlu0 %v9282_v39 }
 0x26e   : > { %v6602_v22 = vpop.f32.mrb[118].mxu1 }
 0x26f   : > { %v2749_v46 = vpop.f32.mrb[119].mxu1  ;;  %v9300_v59 = vsel %vm3376_vm0, %v6602_v22, -1e+30 }
 0x270   : > { %3531 = vmax.xlane.f32.xlu1 %v9288_v6  ;;  %v9294_v51 = vsel %vm3375_vm1, %v2749_v46, -1e+30 }
 0x271   : > { %3533 = vmax.xlane.f32.xlu0 %v9294_v51 }
 0x273   : > { %v6637_v63 = vpop.f32.mrb[104].mxu0 }
 0x274   : > { %v2920_v55 = vpop.f32.mrb[105].mxu0  ;;  %3535 = vmax.xlane.f32.xlu1 %v9300_v59  ;;  %v9312_v36 = vsel %vm3362_vm3, %v6637_v63, -1e+30 }
 0x275   : > { %v9306_v12 = vsel %vm3361_vm4, %v2920_v55, -1e+30 }
 0x276   : > { %3537 = vmax.xlane.f32.xlu0 %v9306_v12 }
 0x277   : > { %v6640_v46 = vpop.f32.mrb[106].mxu0 }
 0x278   : > { %v2930_v47 = vpop.f32.mrb[107].mxu0  ;;  %3539 = vmax.xlane.f32.xlu1 %v9312_v36  ;;  %v9324_v14 = vsel %vm3364_vm5, %v6640_v46, -1e+30 }
 0x279   : > { %v9318_v22 = vsel %vm3363_vm6, %v2930_v47, -1e+30 }
 0x27a   : > { %3541 = vmax.xlane.f32.xlu0 %v9318_v22 }
 0x27b   : > { %v6643_v55 = vpop.f32.mrb[108].mxu0 }
 0x27c   : > { %v2940_v33 = vpop.f32.mrb[109].mxu0  ;;  %3543 = vmax.xlane.f32.xlu1 %v9324_v14  ;;  %v9336_v54 = vsel %vm3366_vm7, %v6643_v55, -1e+30 }
 0x27d   : > { %v9330_v63 = vsel %vm3365_vm8, %v2940_v33, -1e+30 }
 0x27e   : > { %3545 = vmax.xlane.f32.xlu0 %v9330_v63 }
 0x27f   : > { %v6646_v47 = vpop.f32.mrb[110].mxu0 }
 0x280   : > { %v2950_v3 = vpop.f32.mrb[111].mxu0  ;;  %3547 = vmax.xlane.f32.xlu1 %v9336_v54  ;;  %v9348_v60 = vsel %vm3368_vm9, %v6646_v47, -1e+30 }
 0x281   : > { %v9342_v46 = vsel %vm3367_vm10, %v2950_v3, -1e+30  ;;  %10130 = vst [vmem:[#allocation9_spill] sm:$0xff] %v9348_v60 }
 0x282   : > { %3549 = vmax.xlane.f32.xlu0 %v9342_v46 }
 0x283   : > { %v6649_v33 = vpop.f32.mrb[112].mxu0 }
 0x284   : > { %v2960_v43 = vpop.f32.mrb[113].mxu0  ;;  %3551 = vmax.xlane.f32.xlu1 %v9348_v60  ;;  %v9360_v4 = vsel %vm3370_vm11, %v6649_v33, -1e+30 }
 0x285   : > { %v9354_v55 = vsel %vm3369_vm12, %v2960_v43, -1e+30  ;;  %10132 = vst [vmem:[#allocation13_spill] sm:$0xff] %v9360_v4 }
 0x286   : > { %10131 = vst [vmem:[#allocation11_spill] sm:$0xff] %v9354_v55  ;;  %3553 = vmax.xlane.f32.xlu0 %v9354_v55 }
 0x287   : > { %v6652_v3 = vpop.f32.mrb[114].mxu0 }
 0x288   : > { %v2970_v40 = vpop.f32.mrb[115].mxu0  ;;  %3555 = vmax.xlane.f32.xlu1 %v9360_v4  ;;  %v9372_v55 = vsel %vm3372_vm13, %v6652_v3, -1e+30 }
 0x289   : > { %v9366_v47 = vsel %vm3371_vm14, %v2970_v40, -1e+30  ;;  %10134 = vst [vmem:[#allocation15_spill] sm:$0xff] %v9372_v55 }
 0x28a   : > { %10133 = vst [vmem:[#allocation12_spill] sm:$0xff] %v9366_v47  ;;  %3557 = vmax.xlane.f32.xlu0 %v9366_v47 }
 0x28b   : > { %v6655_v43 = vpop.f32.mrb[116].mxu0 }
 0x28c   : > { %v2980_v60 = vpop.f32.mrb[117].mxu0  ;;  %3559 = vmax.xlane.f32.xlu1 %v9372_v55  ;;  %v9384_v47 = vsel %vm3374_vm15, %v6655_v43, -1e+30 }
 0x28d   : > { %v9378_v33 = vsel %vm3373_vm2, %v2980_v60, -1e+30  ;;  %10136 = vst [vmem:[#allocation17_spill] sm:$0xff] %v9384_v47 }
 0x28e   : > { %10135 = vst [vmem:[#allocation14_spill] sm:$0xff] %v9378_v33  ;;  %3561 = vmax.xlane.f32.xlu0 %v9378_v33 }
 0x28f   : > { %v6658_v40 = vpop.f32.mrb[118].mxu0 }
 0x290   : > { %v2990_v4 = vpop.f32.mrb[119].mxu0  ;;  %3563 = vmax.xlane.f32.xlu1 %v9384_v47  ;;  %v9396_v33 = vsel %vm3376_vm0, %v6658_v40, -1e+30 }
 0x291   : > { %v9390_v3 = vsel %vm3375_vm1, %v2990_v4, -1e+30 }
 0x292   : > { %10137 = vst [vmem:[#allocation16_spill] sm:$0xff] %v9390_v3  ;;  %3565 = vmax.xlane.f32.xlu0 %v9390_v3  ;;  %v6693_v60 = vpop.f32.mrb[120].mxu1 }
 0x293   : > { %v3161_v55 = vpop.f32.mrb[121].mxu1  ;;  %v9408_v3 = vsel %vm3362_vm3, %v6693_v60, -1e+30 }
 0x294   : > { %3567 = vmax.xlane.f32.xlu1 %v9396_v33  ;;  %v9402_v43 = vsel %vm3361_vm4, %v3161_v55, -1e+30 }
 0x295   : > { %10138 = vst [vmem:[#allocation19_spill] sm:$0xff] %v9402_v43 }
 0x296   : > { %3569 = vmax.xlane.f32.xlu0 %v9402_v43  ;;  %v6696_v4 = vpop.f32.mrb[122].mxu1 }
 0x297   : > { %v3171_v47 = vpop.f32.mrb[123].mxu1  ;;  %v9420_v43 = vsel %vm3364_vm5, %v6696_v4, -1e+30 }
 0x298   : > { %3571 = vmax.xlane.f32.xlu1 %v9408_v3  ;;  %v9414_v40 = vsel %vm3363_vm6, %v3171_v47, -1e+30 }
 0x29a   : > { %3573 = vmax.xlane.f32.xlu0 %v9414_v40  ;;  %v6699_v42 = vpop.f32.mrb[124].mxu1 }
 0x29b   : > { %v3181_v55 = vpop.f32.mrb[125].mxu1  ;;  %v9432_v60 = vsel %vm3366_vm7, %v6699_v42, -1e+30 }
 0x29c   : > { %3575 = vmax.xlane.f32.xlu1 %v9420_v43  ;;  %v9426_v9 = vsel %vm3365_vm8, %v3181_v55, -1e+30 }
 0x29e   : > { %3577 = vmax.xlane.f32.xlu0 %v9426_v9  ;;  %v6702_v32 = vpop.f32.mrb[126].mxu1 }
 0x29f   : > { %v3191_v47 = vpop.f32.mrb[127].mxu1  ;;  %v9444_v55 = vsel %vm3368_vm9, %v6702_v32, -1e+30 }
 0x2a0   : > { %3579 = vmax.xlane.f32.xlu1 %v9432_v60  ;;  %v9438_v10 = vsel %vm3367_vm10, %v3191_v47, -1e+30 }
 0x2a2   : > { %3581 = vmax.xlane.f32.xlu0 %v9438_v10  ;;  %v6705_v11 = vpop.f32.mrb[128].mxu1 }
 0x2a3   : > { %v3201_v4 = vpop.f32.mrb[129].mxu1  ;;  %v9456_v47 = vsel %vm3370_vm11, %v6705_v11, -1e+30 }
 0x2a4   : > { %3583 = vmax.xlane.f32.xlu1 %v9444_v55  ;;  %v9450_v48 = vsel %vm3369_vm12, %v3201_v4, -1e+30 }
 0x2a6   : > { %3585 = vmax.xlane.f32.xlu0 %v9450_v48  ;;  %v6708_v49 = vpop.f32.mrb[130].mxu1 }
 0x2a7   : > { %v3211_v42 = vpop.f32.mrb[131].mxu1  ;;  %v9468_v4 = vsel %vm3372_vm13, %v6708_v49, -1e+30 }
 0x2a8   : > { %3587 = vmax.xlane.f32.xlu1 %v9456_v47  ;;  %v9462_v45 = vsel %vm3371_vm14, %v3211_v42, -1e+30  ;;  %10140 = vst [vmem:[#allocation21_spill] sm:$0xff] %v9468_v4 }
 0x2a9   : > { %10139 = vst [vmem:[#allocation18_spill] sm:$0xff] %v9462_v45 }
 0x2aa   : > { %3589 = vmax.xlane.f32.xlu0 %v9462_v45  ;;  %v6711_v56 = vpop.f32.mrb[132].mxu1 }
 0x2ab   : > { %v3221_v32 = vpop.f32.mrb[133].mxu1  ;;  %v9480_v42 = vsel %vm3374_vm15, %v6711_v56, -1e+30 }
 0x2ac   : > { %3591 = vmax.xlane.f32.xlu1 %v9468_v4  ;;  %v9474_v29 = vsel %vm3373_vm2, %v3221_v32, -1e+30  ;;  %10142 = vst [vmem:[#allocation23_spill] sm:$0xff] %v9480_v42 }
 0x2ad   : > { %10141 = vst [vmem:[#allocation20_spill] sm:$0xff] %v9474_v29 }
 0x2ae   : > { %3593 = vmax.xlane.f32.xlu0 %v9474_v29  ;;  %v6714_v20 = vpop.f32.mrb[134].mxu1 }
 0x2af   : > { %v3231_v11 = vpop.f32.mrb[135].mxu1  ;;  %v9492_v15 = vsel %vm3376_vm0, %v6714_v20, -1e+30  ;;  %vm10202_vm0 = vcmask 64512  }
 0x2b0   : > { %3595 = vmax.xlane.f32.xlu1 %v9480_v42  ;;  %v9486_v44 = vsel %vm3375_vm1, %v3231_v11, -1e+30  ;;  %vm10203_vm1 = vmmov %vm10202_vm0 }
 0x2b1   : > { %10143 = vst [vmem:[#allocation22_spill] sm:$0xff] %v9486_v44  ;;  %vm10204_vm3 = vmmov %vm10202_vm0 }
 0x2b2   : > { %3597 = vmax.xlane.f32.xlu0 %v9486_v44  ;;  %vm10205_vm4 = vmmov %vm10202_vm0 }
 0x2b3   : > { %vm10206_vm5 = vmmov %vm10202_vm0 }
 0x2b4   : > { %3599 = vmax.xlane.f32.xlu1 %v9492_v15  ;;  %vm10207_vm6 = vmmov %vm10202_vm0 }
 0x2b5   : > { %vm10208_vm7 = vmmov %vm10202_vm0 }
 0x2b6   : > { %vm10209_vm8 = vmmov %vm10202_vm0 }
 0x2b7   : > { %vm10210_vm9 = vmmov %vm10202_vm0 }
 0x2b8   : > { %vm10211_vm10 = vmmov %vm10202_vm0 }
 0x2b9   : > { %vm10212_vm11 = vmmov %vm10202_vm0 }
 0x2ba   : > { %vm10213_vm12 = vmmov %vm10202_vm0 }
 0x2bb   : > { %vm10214_vm13 = vmmov %vm10202_vm0 }
 0x2bc   : > { %vm10215_vm14 = vmmov %vm10202_vm0 }
 0x2bd   : > { %vm10216_vm15 = vmmov %vm10202_vm0 }
 0x2be   : > { %vm10217_vm2 = vmmov %vm10202_vm0 }
 0x2c1   : > { %v3476_v49 = vpop.xlane.xlu0 %3475 }
 0x2c2   : > { %v3602_v26 = vsub.f32 %v9026_v30, %v3476_v49 }
 0x2c4   : > { %v3667_v56 = vmul.f32 1.442695, %v3602_v26 }
 0x2c5   : > { %v3474_v32 = vpop.xlane.xlu0 %3473  ;;  %v3480_v42 = vpop.xlane.xlu1 %3479 }
 0x2c6   : > { %7410 = vpow2.f32 %v3667_v56  ;;  %v3601_v37 = vsub.f32 %v9055_v58, %v3474_v32  ;;  %v3604_v11 = vsub.f32 %v9060_v21, %v3480_v42 }
 0x2c8   : > { %v3665_v29 = vmul.f32 1.442695, %v3601_v37  ;;  %v3671_v44 = vmul.f32 1.442695, %v3604_v11 }
 0x2c9   : > { %v3478_v4 = vpop.xlane.xlu0 %3477  ;;  %v3484_v45 = vpop.xlane.xlu1 %3483 }
 0x2ca   : > { %7412 = vpow2.f32 %v3665_v29  ;;  %v3603_v13 = vsub.f32 %v9084_v16, %v3478_v4  ;;  %v3606_v34 = vsub.f32 %v9089_v35, %v3484_v45 }
 0x2cb   : > { %7414 = vpow2.f32 %v3671_v44 }
 0x2cc   : > { %v3669_v20 = vmul.f32 1.442695, %v3603_v13  ;;  %v3675_v30 = vmul.f32 1.442695, %v3606_v34 }
 0x2cd   : > { %v3482_v49 = vpop.xlane.xlu0 %3481  ;;  %v3488_v26 = vpop.xlane.xlu1 %3487 }
 0x2ce   : > { %7416 = vpow2.f32 %v3669_v20  ;;  %v3605_v56 = vsub.f32 %v9106_v25, %v3482_v49  ;;  %v3608_v58 = vsub.f32 %v9111_v53, %v3488_v26 }
 0x2cf   : > { %7418 = vpow2.f32 %v3675_v30 }
 0x2d0   : > { %v9502_v21 = vpop.eup %7410  ;;  %v3673_v42 = vmul.f32 1.442695, %v3605_v56  ;;  %v3679_v32 = vmul.f32 1.442695, %v3608_v58 }
 0x2d1   : > { %v3486_v29 = vpop.xlane.xlu0 %3485  ;;  %v3492_v37 = vpop.xlane.xlu1 %3491  ;;  %3795 = vadd.xlane.f32.xlu1 %v9502_v21 }
 0x2d2   : > { %7420 = vpow2.f32 %v3673_v42  ;;  %v3607_v16 = vsub.f32 %v9124_v7, %v3486_v29  ;;  %v3610_v35 = vsub.f32 %v9129_v38, %v3492_v37 }
 0x2d3   : > { %7422 = vpow2.f32 %v3679_v32 }
 0x2d4   : > { %v9507_v45 = vpop.eup %7412  ;;  %v3677_v25 = vmul.f32 1.442695, %v3607_v16  ;;  %v3683_v4 = vmul.f32 1.442695, %v3610_v35 }
 0x2d5   : > { %v9509_v53 = vpop.eup %7414  ;;  %v3490_v44 = vpop.xlane.xlu0 %3489  ;;  %3793 = vadd.xlane.f32.xlu0 %v9507_v45 }
 0x2d6   : > { %v3496_v11 = vpop.xlane.xlu1 %3495  ;;  %7424 = vpow2.f32 %v3677_v25  ;;  %v3609_v13 = vsub.f32 %v9146_v19, %v3490_v44  ;;  %3799 = vadd.xlane.f32.xlu1 %v9509_v53 }
 0x2d7   : > { %v3612_v34 = vsub.f32 %v9151_v2, %v3496_v11  ;;  %7426 = vpow2.f32 %v3683_v4 }
 0x2d8   : > { %v9515_v7 = vpop.eup %7416  ;;  %v3681_v38 = vmul.f32 1.442695, %v3609_v13 }
 0x2d9   : > { %v3687_v20 = vmul.f32 1.442695, %v3612_v34  ;;  %v9517_v30 = vpop.eup %7418  ;;  %v3494_v49 = vpop.xlane.xlu0 %3493  ;;  %3797 = vadd.xlane.f32.xlu0 %v9515_v7 }
 0x2da   : > { %v3500_v26 = vpop.xlane.xlu1 %3499  ;;  %7428 = vpow2.f32 %v3681_v38  ;;  %v3611_v56 = vsub.f32 %v9170_v1, %v3494_v49  ;;  %3803 = vadd.xlane.f32.xlu1 %v9517_v30 }
 0x2db   : > { %v3614_v19 = vsub.f32 %v9175_v41, %v3500_v26  ;;  %7430 = vpow2.f32 %v3687_v20 }
 0x2dc   : > { %v9523_v2 = vpop.eup %7420  ;;  %v3685_v58 = vmul.f32 1.442695, %v3611_v56 }
 0x2dd   : > { %v3691_v42 = vmul.f32 1.442695, %v3614_v19  ;;  %v9525_v32 = vpop.eup %7422  ;;  %v3498_v29 = vpop.xlane.xlu0 %3497  ;;  %3801 = vadd.xlane.f32.xlu0 %v9523_v2 }
 0x2de   : > { %v3504_v37 = vpop.xlane.xlu1 %3503  ;;  %7432 = vpow2.f32 %v3685_v58  ;;  %v3613_v16 = vsub.f32 %v9190_v24, %v3498_v29  ;;  %3807 = vadd.xlane.f32.xlu1 %v9525_v32 }
 0x2df   : > { %v3616_v1 = vsub.f32 %v9195_v5, %v3504_v37  ;;  %7434 = vpow2.f32 %v3691_v42 }
 0x2e0   : > { %v9531_v41 = vpop.eup %7424  ;;  %v3689_v35 = vmul.f32 1.442695, %v3613_v16 }
 0x2e1   : > { %v3695_v25 = vmul.f32 1.442695, %v3616_v1  ;;  %v9533_v4 = vpop.eup %7426  ;;  %v3502_v11 = vpop.xlane.xlu0 %3501  ;;  %3805 = vadd.xlane.f32.xlu0 %v9531_v41 }
 0x2e2   : > { %v3508_v44 = vpop.xlane.xlu1 %3507  ;;  %7436 = vpow2.f32 %v3689_v35  ;;  %v3615_v24 = vsub.f32 %v9209_v27, %v3502_v11  ;;  %3811 = vadd.xlane.f32.xlu1 %v9533_v4 }
 0x2e3   : > { %v3618_v13 = vsub.f32 %v9204_v23, %v3508_v44  ;;  %7438 = vpow2.f32 %v3695_v25 }
 0x2e4   : > { %v9539_v5 = vpop.eup %7428  ;;  %v3693_v38 = vmul.f32 1.442695, %v3615_v24 }
 0x2e5   : > { %v3699_v34 = vmul.f32 1.442695, %v3618_v13  ;;  %v9541_v20 = vpop.eup %7430  ;;  %3809 = vadd.xlane.f32.xlu0 %v9539_v5 }
 0x2e6   : > { %v3506_v49 = vpop.xlane.xlu1 %3505  ;;  %3815 = vadd.xlane.f32.xlu1 %v9541_v20  ;;  %v3510_v23 = vpop.xlane.xlu0 %3509 }
 0x2e7   : > { %7440 = vpow2.f32 %v3699_v34  ;;  %v3617_v26 = vsub.f32 %v9216_v17, %v3506_v49  ;;  %v3619_v27 = vsub.f32 %v9222_v57, %v3510_v23 }
 0x2e8   : > { %7442 = vpow2.f32 %v3693_v38  ;;  %v9547_v56 = vpop.eup %7432 }
 0x2e9   : > { %v3697_v19 = vmul.f32 1.442695, %v3617_v26  ;;  %v9549_v58 = vpop.eup %7434  ;;  %3813 = vadd.xlane.f32.xlu0 %v9547_v56  ;;  %v3701_v37 = vmul.f32 1.442695, %v3619_v27 }
 0x2ea   : > { %v3512_v42 = vpop.xlane.xlu1 %3511  ;;  %3819 = vadd.xlane.f32.xlu1 %v9549_v58  ;;  %v3514_v17 = vpop.xlane.xlu0 %3513 }
 0x2eb   : > { %7444 = vpow2.f32 %v3697_v19  ;;  %v3620_v29 = vsub.f32 %v9228_v50, %v3512_v42  ;;  %v3621_v16 = vsub.f32 %v9234_v62, %v3514_v17 }
 0x2ec   : > { %v9555_v1 = vpop.eup %7436 }
 0x2ed   : > { %v3703_v57 = vmul.f32 1.442695, %v3620_v29  ;;  %v9557_v35 = vpop.eup %7438  ;;  %3817 = vadd.xlane.f32.xlu0 %v9555_v1  ;;  %v3705_v11 = vmul.f32 1.442695, %v3621_v16 }
 0x2ee   : > { %v3516_v25 = vpop.xlane.xlu1 %3515  ;;  %3823 = vadd.xlane.f32.xlu1 %v9557_v35  ;;  %v3518_v50 = vpop.xlane.xlu0 %3517 }
 0x2ef   : > { %7446 = vpow2.f32 %v3703_v57  ;;  %v3622_v44 = vsub.f32 %v9240_v52, %v3516_v25  ;;  %v3623_v13 = vsub.f32 %v9246_v61, %v3518_v50 }
 0x2f0   : > { %7448 = vpow2.f32 %v3701_v37 }
 0x2f1   : > { %v9563_v24 = vpop.eup %7440  ;;  %v3707_v62 = vmul.f32 1.442695, %v3622_v44  ;;  %v3709_v26 = vmul.f32 1.442695, %v3623_v13 }
 0x2f2   : > { %v9565_v34 = vpop.eup %7442  ;;  %v3520_v38 = vpop.xlane.xlu1 %3519  ;;  %3827 = vadd.xlane.f32.xlu1 %v9563_v24 }
 0x2f3   : > { %7450 = vpow2.f32 %v3707_v62  ;;  %v3624_v49 = vsub.f32 %v9252_v28, %v3520_v38  ;;  %3821 = vadd.xlane.f32.xlu0 %v9565_v34  ;;  %v3522_v52 = vpop.xlane.xlu0 %3521 }
 0x2f4   : > { %7452 = vpow2.f32 %v3705_v11  ;;  %v3625_v23 = vsub.f32 %v9258_v18, %v3522_v52 }
 0x2f5   : > { %v9571_v27 = vpop.eup %7444  ;;  %v3711_v61 = vmul.f32 1.442695, %v3624_v49 }
 0x2f6   : > { %v3524_v19 = vpop.xlane.xlu1 %3523  ;;  %v3713_v28 = vmul.f32 1.442695, %v3625_v23 }
 0x2f7   : > { %7454 = vpow2.f32 %v3711_v61  ;;  %v3626_v42 = vsub.f32 %v9264_v0, %v3524_v19  ;;  %3825 = vadd.xlane.f32.xlu0 %v9571_v27  ;;  %v3526_v29 = vpop.xlane.xlu0 %3525 }
 0x2f8   : > { %7456 = vpow2.f32 %v3709_v26  ;;  %v3627_v17 = vsub.f32 %v9270_v31, %v3526_v29 }
 0x2f9   : > { %v9576_v37 = vpop.eup %7446  ;;  %v3715_v16 = vmul.f32 1.442695, %v3626_v42 }
 0x2fa   : > { %v9578_v57 = vpop.eup %7448  ;;  %v3528_v18 = vpop.xlane.xlu1 %3527  ;;  %3831 = vadd.xlane.f32.xlu1 %v9576_v37  ;;  %v3717_v44 = vmul.f32 1.442695, %v3627_v17 }
 0x2fb   : > { %7458 = vpow2.f32 %v3715_v16  ;;  %v3628_v25 = vsub.f32 %v9276_v8, %v3528_v18  ;;  %3829 = vadd.xlane.f32.xlu0 %v9578_v57  ;;  %v3530_v0 = vpop.xlane.xlu0 %3529 }
 0x2fc   : > { %7460 = vpow2.f32 %v3713_v28  ;;  %v3629_v50 = vsub.f32 %v9282_v39, %v3530_v0 }
 0x2fd   : > { %v9584_v11 = vpop.eup %7450  ;;  %v3719_v31 = vmul.f32 1.442695, %v3628_v25 }
 0x2fe   : > { %v9586_v13 = vpop.eup %7452  ;;  %v3532_v62 = vpop.xlane.xlu1 %3531  ;;  %3835 = vadd.xlane.f32.xlu1 %v9584_v11  ;;  %v3721_v49 = vmul.f32 1.442695, %v3629_v50 }
 0x2ff   : > { %7462 = vpow2.f32 %v3719_v31  ;;  %v3630_v38 = vsub.f32 %v9288_v6, %v3532_v62  ;;  %3833 = vadd.xlane.f32.xlu0 %v9586_v13  ;;  %v3534_v8 = vpop.xlane.xlu0 %3533 }
 0x300   : > { %7464 = vpow2.f32 %v3717_v44  ;;  %v3631_v52 = vsub.f32 %v9294_v51, %v3534_v8 }
 0x301   : > { %v9592_v26 = vpop.eup %7454  ;;  %v3723_v39 = vmul.f32 1.442695, %v3630_v38 }
 0x302   : > { %v9594_v23 = vpop.eup %7456  ;;  %v3536_v61 = vpop.xlane.xlu1 %3535  ;;  %3839 = vadd.xlane.f32.xlu1 %v9592_v26  ;;  %v3725_v6 = vmul.f32 1.442695, %v3631_v52 }
 0x303   : > { %7466 = vpow2.f32 %v3723_v39  ;;  %v3632_v19 = vsub.f32 %v9300_v59, %v3536_v61  ;;  %3837 = vadd.xlane.f32.xlu0 %v9594_v23  ;;  %v3538_v42 = vpop.xlane.xlu0 %3537 }
 0x304   : > { %7468 = vpow2.f32 %v3721_v49  ;;  %v3633_v51 = vsub.f32 %v9306_v12, %v3538_v42 }
 0x305   : > { %v9599_v29 = vpop.eup %7458  ;;  %v3727_v28 = vmul.f32 1.442695, %v3632_v19 }
 0x306   : > { %v9602_v17 = vpop.eup %7460  ;;  %v3540_v16 = vpop.xlane.xlu1 %3539  ;;  %3843 = vadd.xlane.f32.xlu1 %v9599_v29  ;;  %v3729_v59 = vmul.f32 1.442695, %v3633_v51 }
 0x307   : > { %7470 = vpow2.f32 %v3727_v28  ;;  %v3634_v18 = vsub.f32 %v9312_v36, %v3540_v16  ;;  %3841 = vadd.xlane.f32.xlu0 %v9602_v17  ;;  %v3542_v25 = vpop.xlane.xlu0 %3541  ;;  %v10144_v16 = vld [vmem:[#allocation9_spill] sm:$0xff] }
 0x308   : > { %7472 = vpow2.f32 %v3725_v6  ;;  %v3635_v50 = vsub.f32 %v9318_v22, %v3542_v25 }
 0x309   : > { %v9607_v0 = vpop.eup %7462  ;;  %v3731_v44 = vmul.f32 1.442695, %v3634_v18 }
 0x30a   : > { %v9610_v31 = vpop.eup %7464  ;;  %v3544_v12 = vpop.xlane.xlu1 %3543  ;;  %3847 = vadd.xlane.f32.xlu1 %v9607_v0  ;;  %v3733_v36 = vmul.f32 1.442695, %v3635_v50  ;;  %v10145_v50 = vld [vmem:[#allocation11_spill] sm:$0xff] }
 0x30b   : > { %7474 = vpow2.f32 %v3731_v44  ;;  %v3636_v62 = vsub.f32 %v9324_v14, %v3544_v12  ;;  %3845 = vadd.xlane.f32.xlu0 %v9610_v31  ;;  %v3546_v38 = vpop.xlane.xlu0 %3545 }
 0x30c   : > { %7476 = vpow2.f32 %v3729_v59  ;;  %v3637_v52 = vsub.f32 %v9330_v63, %v3546_v38 }
 0x30d   : > { %v9615_v8 = vpop.eup %7466  ;;  %v3735_v49 = vmul.f32 1.442695, %v3636_v62 }
 0x30e   : > { %v9618_v39 = vpop.eup %7468  ;;  %v3548_v22 = vpop.xlane.xlu1 %3547  ;;  %3851 = vadd.xlane.f32.xlu1 %v9615_v8  ;;  %v3737_v14 = vmul.f32 1.442695, %v3637_v52 }
 0x30f   : > { %7478 = vpow2.f32 %v3735_v49  ;;  %v3638_v61 = vsub.f32 %v9336_v54, %v3548_v22  ;;  %3849 = vadd.xlane.f32.xlu0 %v9618_v39  ;;  %v3550_v19 = vpop.xlane.xlu0 %3549 }
 0x310   : > { %7480 = vpow2.f32 %v3733_v36  ;;  %v3639_v28 = vsub.f32 %v9342_v46, %v3550_v19  ;;  %v10146_v36 = vld [vmem:[#allocation13_spill] sm:$0xff] }
 0x311   : > { %v9623_v6 = vpop.eup %7470  ;;  %v3739_v42 = vmul.f32 1.442695, %v3638_v61 }
 0x312   : > { %v9626_v51 = vpop.eup %7472  ;;  %v3552_v63 = vpop.xlane.xlu1 %3551  ;;  %3855 = vadd.xlane.f32.xlu1 %v9623_v6  ;;  %v3741_v54 = vmul.f32 1.442695, %v3639_v28 }
 0x313   : > { %7482 = vpow2.f32 %v3739_v42  ;;  %v3640_v18 = vsub.f32 %v10144_v16, %v3552_v63  ;;  %3853 = vadd.xlane.f32.xlu0 %v9626_v51  ;;  %v3554_v59 = vpop.xlane.xlu0 %3553  ;;  %v10148_v63 = vld [vmem:[#allocation15_spill] sm:$0xff] }
 0x314   : > { %7484 = vpow2.f32 %v3737_v14  ;;  %v3641_v12 = vsub.f32 %v10145_v50, %v3554_v59  ;;  %v10147_v14 = vld [vmem:[#allocation12_spill] sm:$0xff]  ;;  %v10149_v50 = vld [vmem:[#allocation14_spill] sm:$0xff] }
 0x315   : > { %v9631_v25 = vpop.eup %7474  ;;  %v3743_v44 = vmul.f32 1.442695, %v3640_v18 }
 0x316   : > { %v9634_v62 = vpop.eup %7476  ;;  %v3556_v46 = vpop.xlane.xlu1 %3555  ;;  %3859 = vadd.xlane.f32.xlu1 %v9631_v25  ;;  %v3745_v49 = vmul.f32 1.442695, %v3641_v12 }
 0x317   : > { %7486 = vpow2.f32 %v3743_v44  ;;  %v3642_v38 = vsub.f32 %v10146_v36, %v3556_v46  ;;  %3857 = vadd.xlane.f32.xlu0 %v9634_v62  ;;  %v3558_v52 = vpop.xlane.xlu0 %3557 }
 0x318   : > { %7488 = vpow2.f32 %v3741_v54  ;;  %v3643_v19 = vsub.f32 %v10147_v14, %v3558_v52 }
 0x319   : > { %v9639_v22 = vpop.eup %7478  ;;  %v3747_v61 = vmul.f32 1.442695, %v3642_v38  ;;  %v10151_v38 = vld [vmem:[#allocation17_spill] sm:$0xff] }
 0x31a   : > { %v9642_v42 = vpop.eup %7480  ;;  %v3560_v28 = vpop.xlane.xlu1 %3559  ;;  %3863 = vadd.xlane.f32.xlu1 %v9639_v22  ;;  %v3749_v18 = vmul.f32 1.442695, %v3643_v19 }
 0x31b   : > { %7490 = vpow2.f32 %v3747_v61  ;;  %v3644_v16 = vsub.f32 %v10148_v63, %v3560_v28  ;;  %3861 = vadd.xlane.f32.xlu0 %v9642_v42  ;;  %v3562_v54 = vpop.xlane.xlu0 %3561  ;;  %v10152_v28 = vld [vmem:[#allocation16_spill] sm:$0xff] }
 0x31c   : > { %7492 = vpow2.f32 %v3745_v49  ;;  %v3645_v12 = vsub.f32 %v10149_v50, %v3562_v54 }
 0x31d   : > { %v9647_v59 = vpop.eup %7482  ;;  %v3751_v44 = vmul.f32 1.442695, %v3644_v16 }
 0x31e   : > { %v9650_v46 = vpop.eup %7484  ;;  %v3564_v36 = vpop.xlane.xlu1 %3563  ;;  %3867 = vadd.xlane.f32.xlu1 %v9647_v59  ;;  %v3753_v61 = vmul.f32 1.442695, %v3645_v12 }
 0x31f   : > { %10150 = vst [vmem:[#allocation25_spill] sm:$0xff] %v9650_v46  ;;  %7494 = vpow2.f32 %v3751_v44  ;;  %v3646_v52 = vsub.f32 %v10151_v38, %v3564_v36  ;;  %3865 = vadd.xlane.f32.xlu0 %v9650_v46  ;;  %v3566_v49 = vpop.xlane.xlu0 %3565  ;;  %v10153_v38 = vld [vmem:[#allocation19_spill] sm:$0xff] }
 0x320   : > { %7496 = vpow2.f32 %v3749_v18  ;;  %v3647_v63 = vsub.f32 %v10152_v28, %v3566_v49 }
 0x321   : > { %v9655_v14 = vpop.eup %7486  ;;  %v3755_v19 = vmul.f32 1.442695, %v3646_v52 }
 0x322   : > { %v9658_v16 = vpop.eup %7488  ;;  %3871 = vadd.xlane.f32.xlu1 %v9655_v14  ;;  %v3568_v54 = vpop.xlane.xlu1 %3567  ;;  %v3757_v50 = vmul.f32 1.442695, %v3647_v63 }
 0x323   : > { %7498 = vpow2.f32 %v3755_v19  ;;  %v3648_v44 = vsub.f32 %v9396_v33, %v3568_v54  ;;  %3869 = vadd.xlane.f32.xlu0 %v9658_v16  ;;  %v3570_v18 = vpop.xlane.xlu0 %3569 }
 0x324   : > { %7500 = vpow2.f32 %v3753_v61  ;;  %v3649_v52 = vsub.f32 %v10153_v38, %v3570_v18 }
 0x325   : > { %v9663_v12 = vpop.eup %7490  ;;  %v3759_v36 = vmul.f32 1.442695, %v3648_v44 }
 0x326   : > { %v9666_v46 = vpop.eup %7492  ;;  %3875 = vadd.xlane.f32.xlu1 %v9663_v12  ;;  %v3572_v49 = vpop.xlane.xlu1 %3571  ;;  %v3761_v33 = vmul.f32 1.442695, %v3649_v52 }
 0x327   : > { %7502 = vpow2.f32 %v3759_v36  ;;  %v3650_v19 = vsub.f32 %v9408_v3, %v3572_v49  ;;  %3873 = vadd.xlane.f32.xlu0 %v9666_v46  ;;  %v3574_v61 = vpop.xlane.xlu0 %3573 }
 0x328   : > { %7504 = vpow2.f32 %v3757_v50  ;;  %v3651_v54 = vsub.f32 %v9414_v40, %v3574_v61 }
 0x329   : > { %v9671_v28 = vpop.eup %7494  ;;  %v3763_v63 = vmul.f32 1.442695, %v3650_v19 }
 0x32a   : > { %v9674_v44 = vpop.eup %7496  ;;  %3879 = vadd.xlane.f32.xlu1 %v9671_v28  ;;  %v3576_v18 = vpop.xlane.xlu1 %3575  ;;  %v3765_v3 = vmul.f32 1.442695, %v3651_v54 }
 0x32b   : > { %7506 = vpow2.f32 %v3763_v63  ;;  %v3652_v36 = vsub.f32 %v9420_v43, %v3576_v18  ;;  %3877 = vadd.xlane.f32.xlu0 %v9674_v44  ;;  %v3578_v50 = vpop.xlane.xlu0 %3577 }
 0x32c   : > { %7508 = vpow2.f32 %v3761_v33  ;;  %v3653_v49 = vsub.f32 %v9426_v9, %v3578_v50 }
 0x32d   : > { %v9679_v38 = vpop.eup %7498  ;;  %v3767_v52 = vmul.f32 1.442695, %v3652_v36 }
 0x32e   : > { %v9682_v19 = vpop.eup %7500  ;;  %3883 = vadd.xlane.f32.xlu1 %v9679_v38  ;;  %v3580_v40 = vpop.xlane.xlu1 %3579  ;;  %v3769_v43 = vmul.f32 1.442695, %v3653_v49 }
 0x32f   : > { %7510 = vpow2.f32 %v3767_v52  ;;  %v3654_v61 = vsub.f32 %v9432_v60, %v3580_v40  ;;  %3881 = vadd.xlane.f32.xlu0 %v9682_v19  ;;  %v3582_v33 = vpop.xlane.xlu0 %3581 }
 0x330   : > { %7512 = vpow2.f32 %v3765_v3  ;;  %v3655_v18 = vsub.f32 %v9438_v10, %v3582_v33 }
 0x331   : > { %v9687_v63 = vpop.eup %7502  ;;  %v3771_v54 = vmul.f32 1.442695, %v3654_v61 }
 0x332   : > { %v9690_v36 = vpop.eup %7504  ;;  %3887 = vadd.xlane.f32.xlu1 %v9687_v63  ;;  %v3584_v9 = vpop.xlane.xlu1 %3583  ;;  %v3773_v60 = vmul.f32 1.442695, %v3655_v18 }
 0x333   : > { %10154 = vst [vmem:[#allocation24_spill] sm:$0xff] %v9690_v36  ;;  %7514 = vpow2.f32 %v3771_v54  ;;  %v3656_v50 = vsub.f32 %v9444_v55, %v3584_v9  ;;  %3885 = vadd.xlane.f32.xlu0 %v9690_v36  ;;  %v3586_v3 = vpop.xlane.xlu0 %3585  ;;  %v10158_v9 = vld [vmem:[#allocation18_spill] sm:$0xff] }
 0x334   : > { %7516 = vpow2.f32 %v3769_v43  ;;  %v3657_v40 = vsub.f32 %v9450_v48, %v3586_v3  ;;  %v10160_v3 = vld [vmem:[#allocation21_spill] sm:$0xff] }
 0x335   : > { %v9695_v52 = vpop.eup %7506  ;;  %v3775_v49 = vmul.f32 1.442695, %v3656_v50 }
 0x336   : > { %10155 = vst [vmem:[#allocation9_spill] sm:$0xff] %v9695_v52  ;;  %v9698_v61 = vpop.eup %7508  ;;  %3891 = vadd.xlane.f32.xlu1 %v9695_v52  ;;  %v3588_v10 = vpop.xlane.xlu1 %3587  ;;  %v3777_v55 = vmul.f32 1.442695, %v3657_v40 }
 0x337   : > { %10156 = vst [vmem:[#allocation11_spill] sm:$0xff] %v9698_v61  ;;  %7518 = vpow2.f32 %v3775_v49  ;;  %v3658_v33 = vsub.f32 %v9456_v47, %v3588_v10  ;;  %3889 = vadd.xlane.f32.xlu0 %v9698_v61  ;;  %v3590_v43 = vpop.xlane.xlu0 %3589  ;;  %v10161_v61 = vld [vmem:[#allocation20_spill] sm:$0xff] }
 0x338   : > { %7520 = vpow2.f32 %v3773_v60  ;;  %v3659_v50 = vsub.f32 %v10158_v9, %v3590_v43  ;;  %v10162_v9 = vld [vmem:[#allocation23_spill] sm:$0xff] }
 0x339   : > { %v9703_v54 = vpop.eup %7510  ;;  %v3779_v18 = vmul.f32 1.442695, %v3658_v33 }
 0x33a   : > { %10157 = vst [vmem:[#allocation13_spill] sm:$0xff] %v9703_v54  ;;  %v9706_v36 = vpop.eup %7512  ;;  %3895 = vadd.xlane.f32.xlu1 %v9703_v54  ;;  %v3592_v48 = vpop.xlane.xlu1 %3591  ;;  %v3781_v47 = vmul.f32 1.442695, %v3659_v50 }
 0x33b   : > { %10159 = vst [vmem:[#allocation12_spill] sm:$0xff] %v9706_v36  ;;  %7522 = vpow2.f32 %v3779_v18  ;;  %v3660_v49 = vsub.f32 %v10160_v3, %v3592_v48  ;;  %3893 = vadd.xlane.f32.xlu0 %v9706_v36  ;;  %v3594_v60 = vpop.xlane.xlu0 %3593  ;;  %v10163_v36 = vld [vmem:[#allocation22_spill] sm:$0xff] }
 0x33c   : > { %7524 = vpow2.f32 %v3777_v55  ;;  %v3661_v33 = vsub.f32 %v10161_v61, %v3594_v60 }
 0x33d   : > { %v9711_v40 = vpop.eup %7514  ;;  %v3783_v10 = vmul.f32 1.442695, %v3660_v49 }
 0x33e   : > { %v9714_v52 = vpop.eup %7516  ;;  %3899 = vadd.xlane.f32.xlu1 %v9711_v40  ;;  %v3596_v43 = vpop.xlane.xlu1 %3595  ;;  %v3785_v48 = vmul.f32 1.442695, %v3661_v33 }
 0x33f   : > { %7526 = vpow2.f32 %v3783_v10  ;;  %v3662_v18 = vsub.f32 %v10162_v9, %v3596_v43  ;;  %3897 = vadd.xlane.f32.xlu0 %v9714_v52  ;;  %v3598_v55 = vpop.xlane.xlu0 %3597 }
 0x340   : > { %7528 = vpow2.f32 %v3781_v47  ;;  %v3663_v49 = vsub.f32 %v10163_v36, %v3598_v55 }
 0x341   : > { %v9719_v50 = vpop.eup %7518  ;;  %v3787_v3 = vmul.f32 1.442695, %v3662_v18 }
 0x342   : > { %v9722_v54 = vpop.eup %7520  ;;  %3903 = vadd.xlane.f32.xlu1 %v9719_v50  ;;  %v3600_v61 = vpop.xlane.xlu1 %3599  ;;  %v3789_v10 = vmul.f32 1.442695, %v3663_v49 }
 0x343   : > { %7530 = vpow2.f32 %v3787_v3  ;;  %v3664_v60 = vsub.f32 %v9492_v15, %v3600_v61  ;;  %3901 = vadd.xlane.f32.xlu0 %v9722_v54 }
 0x344   : > { %7532 = vpow2.f32 %v3785_v48 }
 0x345   : > { %v9727_v47 = vpop.eup %7522  ;;  %v3791_v33 = vmul.f32 1.442695, %v3664_v60 }
 0x346   : > { %10164 = vst [vmem:[#allocation15_spill] sm:$0xff] %v9727_v47  ;;  %v9729_v43 = vpop.eup %7524  ;;  %3907 = vadd.xlane.f32.xlu1 %v9727_v47  ;;  %v10173_v47 = vld [vmem:[#allocation27_spill] sm:$0xff] }
 0x347   : > { %10165 = vst [vmem:[#allocation14_spill] sm:$0xff] %v9729_v43  ;;  %7534 = vpow2.f32 %v3791_v33  ;;  %3905 = vadd.xlane.f32.xlu0 %v9729_v43 }
 0x348   : > { %7536 = vpow2.f32 %v3789_v10 }
 0x349   : > { %v9733_v36 = vpop.eup %7526 }
 0x34a   : > { %10166 = vst [vmem:[#allocation17_spill] sm:$0xff] %v9733_v36  ;;  %v9735_v9 = vpop.eup %7528  ;;  %3911 = vadd.xlane.f32.xlu1 %v9733_v36 }
 0x34b   : > { %10167 = vst [vmem:[#allocation16_spill] sm:$0xff] %v9735_v9  ;;  %3909 = vadd.xlane.f32.xlu0 %v9735_v9 }
 0x34d   : > { %v9739_v15 = vpop.eup %7530 }
 0x34e   : > { %10168 = vst [vmem:[#allocation19_spill] sm:$0xff] %v9739_v15  ;;  %v9741_v18 = vpop.eup %7532  ;;  %3915 = vadd.xlane.f32.xlu1 %v9739_v15 }
 0x34f   : > { %10169 = vst [vmem:[#allocation18_spill] sm:$0xff] %v9741_v18  ;;  %3913 = vadd.xlane.f32.xlu0 %v9741_v18 }
 0x351   : > { %v9745_v48 = vpop.eup %7534 }
 0x352   : > { %10170 = vst [vmem:[#allocation21_spill] sm:$0xff] %v9745_v48  ;;  %v9747_v55 = vpop.eup %7536  ;;  %3919 = vadd.xlane.f32.xlu1 %v9745_v48 }
 0x353   : > { %10171 = vst [vmem:[#allocation20_spill] sm:$0xff] %v9747_v55  ;;  %3917 = vadd.xlane.f32.xlu0 %v9747_v55 }
 0x35e   : > { %v3796_v3 = vpop.xlane.xlu1 %3795 }
 0x35f   : > { %7538 = vrcp.f32 %v3796_v3 }
 0x362   : > { %v3794_v49 = vpop.xlane.xlu0 %3793 }
 0x363   : > { %v3800_v61 = vpop.xlane.xlu1 %3799  ;;  %7540 = vrcp.f32 %v3794_v49 }
 0x364   : > { %7542 = vrcp.f32 %v3800_v61  ;;  %v10172_v61 = vld [vmem:[#allocation26_spill] sm:$0xff] }
 0x366   : > { %v3798_v60 = vpop.xlane.xlu0 %3797 }
 0x367   : > { %v3804_v10 = vpop.xlane.xlu1 %3803  ;;  %7544 = vrcp.f32 %v3798_v60 }
 0x368   : > { %7546 = vrcp.f32 %v3804_v10 }
 0x369   : > { %v7539_v15 = vpop.eup %7538 }
 0x36a   : > { %v3802_v33 = vpop.xlane.xlu0 %3801  ;;  %v3924_v3 = vmul.f32 %v7539_v15, %v9502_v21 }
 0x36b   : > { %v3808_v18 = vpop.xlane.xlu1 %3807  ;;  %7548 = vrcp.f32 %v3802_v33 }
 0x36c   : > { %7550 = vrcp.f32 %v3808_v18 }
 0x36d   : > { %v7541_v9 = vpop.eup %7540 }
 0x36e   : > { %v3806_v36 = vpop.xlane.xlu0 %3805  ;;  %v3922_v48 = vmul.f32 %v7541_v9, %v9507_v45  ;;  %v7543_v43 = vpop.eup %7542 }
 0x36f   : > { %v3812_v55 = vpop.xlane.xlu1 %3811  ;;  %7552 = vrcp.f32 %v3806_v36  ;;  %v3928_v45 = vmul.f32 %v7543_v43, %v9509_v53 }
 0x370   : > { %6747 = vmatprep.mubr.f32.mxu0 %v3922_v48  ;;  %7554 = vrcp.f32 %v3812_v55  ;;  %v10174_v48 = vld [vmem:[#allocation28_spill] sm:$0xff] }
 0x371   : > { %v7545_v49 = vpop.eup %7544  ;;  %6748 = vmatmul.mubr.f32.vlgmr.msra.gmra.mrb[120].mxu0 %v3924_v3 }
 0x372   : > { %7326 = vmatpush3.bf16.msra.mxu0 %v10172_v61  ;;  %v3810_v60 = vpop.xlane.xlu0 %3809  ;;  %v3926_v10 = vmul.f32 %v7545_v49, %v9515_v7  ;;  %v7547_v9 = vpop.eup %7546  ;;  %v10175_v49 = vld [vmem:[#allocation29_spill] sm:$0xff] }
 0x373   : > { %v3816_v33 = vpop.xlane.xlu1 %3815  ;;  %7328 = vmatprep.subr.bf16.mxu0 %v10173_v47  ;;  %7556 = vrcp.f32 %v3810_v60  ;;  %v3932_v7 = vmul.f32 %v7547_v9, %v9517_v30 }
 0x374   : > { %6750 = vmatprep.mubr.f32.mxu0 %v3926_v10  ;;  %7558 = vrcp.f32 %v3816_v33  ;;  %v10176_v10 = vld [vmem:[#allocation30_spill] sm:$0xff] }
 0x375   : > { %v7549_v36 = vpop.eup %7548  ;;  %6751 = vmatmul.mubr.f32.gmra.mrb[122].mxu0 %v3928_v45 }
 0x376   : > { %7330 = vmatpush3.bf16.msra.mxu0 %v10173_v47  ;;  %v3814_v21 = vpop.xlane.xlu0 %3813  ;;  %v3930_v15 = vmul.f32 %v7549_v36, %v9523_v2  ;;  %v7551_v55 = vpop.eup %7550 }
 0x377   : > { %v3820_v18 = vpop.xlane.xlu1 %3819  ;;  %7332 = vmatprep.subr.bf16.mxu0 %v10174_v48  ;;  %7560 = vrcp.f32 %v3814_v21  ;;  %v3936_v2 = vmul.f32 %v7551_v55, %v9525_v32  ;;  %v10177_v21 = vld [vmem:[#allocation31_spill] sm:$0xff]  ;;  %v10178_v55 = vld [vmem:[#allocation32_spill] sm:$0xff] }
 0x378   : > { %6753 = vmatprep.mubr.f32.mxu0 %v3930_v15  ;;  %7562 = vrcp.f32 %v3820_v18 }
 0x379   : > { %v7553_v3 = vpop.eup %7552  ;;  %6754 = vmatmul.mubr.f32.gmra.mrb[124].mxu0 %v3932_v7 }
 0x37a   : > { %7334 = vmatpush3.bf16.msra.mxu0 %v10174_v48  ;;  %v3818_v53 = vpop.xlane.xlu0 %3817  ;;  %v3934_v43 = vmul.f32 %v7553_v3, %v9531_v41  ;;  %v7555_v61 = vpop.eup %7554 }
 0x37b   : > { %v3824_v47 = vpop.xlane.xlu1 %3823  ;;  %7336 = vmatprep.subr.bf16.mxu0 %v10175_v49  ;;  %7564 = vrcp.f32 %v3818_v53  ;;  %v3940_v45 = vmul.f32 %v7555_v61, %v9533_v4 }
 0x37c   : > { %6756 = vmatprep.mubr.f32.mxu0 %v3934_v43  ;;  %7566 = vrcp.f32 %v3824_v47  ;;  %v10179_v47 = vld [vmem:[#allocation33_spill] sm:$0xff] }
 0x37d   : > { %v7557_v60 = vpop.eup %7556  ;;  %6757 = vmatmul.mubr.f32.gmra.mrb[126].mxu0 %v3936_v2 }
 0x37e   : > { %7338 = vmatpush3.bf16.msra.mxu0 %v10175_v49  ;;  %v3938_v30 = vmul.f32 %v7557_v60, %v9539_v5  ;;  %v7559_v41 = vpop.eup %7558 }
 0x37f   : > { %7340 = vmatprep.subr.bf16.mxu0 %v10176_v10  ;;  %v3828_v9 = vpop.xlane.xlu1 %3827  ;;  %v3944_v15 = vmul.f32 %v7559_v41, %v9541_v20 }
 0x380   : > { %v3822_v33 = vpop.xlane.xlu0 %3821  ;;  %6759 = vmatprep.mubr.f32.mxu0 %v3938_v30 }
 0x381   : > { %v7561_v36 = vpop.eup %7560  ;;  %7568 = vrcp.f32 %v3822_v33  ;;  %6760 = vmatmul.mubr.f32.gmra.mrb[128].mxu0 %v3940_v45 }
 0x382   : > { %7342 = vmatpush3.bf16.msra.mxu0 %v10176_v10  ;;  %v3942_v32 = vmul.f32 %v7561_v36, %v9547_v56  ;;  %7570 = vrcp.f32 %v3828_v9  ;;  %v7563_v18 = vpop.eup %7562  ;;  %v10180_v9 = vld [vmem:[#allocation34_spill] sm:$0xff] }
 0x383   : > { %7344 = vmatprep.subr.bf16.mxu0 %v10177_v21  ;;  %v3948_v3 = vmul.f32 %v7563_v18, %v9549_v58 }
 0x384   : > { %v3826_v5 = vpop.xlane.xlu0 %3825  ;;  %6762 = vmatprep.mubr.f32.mxu0 %v3942_v32 }
 0x385   : > { %7572 = vrcp.f32 %v3826_v5  ;;  %v7565_v4 = vpop.eup %7564  ;;  %6763 = vmatmul.mubr.f32.gmra.mrb[130].mxu0 %v3944_v15 }
 0x386   : > { %7346 = vmatpush3.bf16.msra.mxu0 %v10177_v21  ;;  %v3946_v7 = vmul.f32 %v7565_v4, %v9555_v1  ;;  %v7567_v20 = vpop.eup %7566  ;;  %v10181_v21 = vld [vmem:[#allocation4_spill] sm:$0xff]  ;;  %v10182_v4 = vld [vmem:[#allocation3_spill] sm:$0xff] }
 0x387   : > { %v3832_v48 = vpop.xlane.xlu1 %3831  ;;  %7348 = vmatprep.subr.bf16.mxu0 %v10178_v55  ;;  %v3952_v61 = vmul.f32 %v7567_v20, %v9557_v35 }
 0x388   : > { %7574 = vrcp.f32 %v3832_v48  ;;  %v3830_v56 = vpop.xlane.xlu0 %3829  ;;  %6765 = vmatprep.mubr.f32.mxu0 %v3946_v7 }
 0x389   : > { %7576 = vrcp.f32 %v3830_v56  ;;  %6766 = vmatmul.mubr.f32.gmra.mrb[132].mxu0 %v3948_v3  ;;  %v10183_v3 = vld [vmem:[#allocation6_spill] sm:$0xff] }
 0x38a   : > { %7350 = vmatpush3.bf16.msra.mxu0 %v10178_v55 }
 0x38b   : > { %v3836_v53 = vpop.xlane.xlu1 %3835  ;;  %v7569_v43 = vpop.eup %7568  ;;  %7352 = vmatprep.subr.bf16.mxu0 %v10179_v47 }
 0x38c   : > { %7578 = vrcp.f32 %v3836_v53  ;;  %v3834_v49 = vpop.xlane.xlu0 %3833  ;;  %v3950_v1 = vmul.f32 %v7569_v43, %v9565_v34  ;;  %v7571_v2 = vpop.eup %7570 }
 0x38d   : > { %7580 = vrcp.f32 %v3834_v49  ;;  %v3956_v33 = vmul.f32 %v7571_v2, %v9563_v24  ;;  %v10184_v49 = vld [vmem:[#allocation5_spill] sm:$0xff] }
 0x38e   : > { %6768 = vmatprep.mubr.f32.mxu0 %v3950_v1  ;;  %7354 = vmatpush3.bf16.msra.mxu0 %v10179_v47 }
 0x38f   : > { %v7573_v60 = vpop.eup %7572  ;;  %v3840_v58 = vpop.xlane.xlu1 %3839  ;;  %6769 = vmatmul.mubr.f32.gmra.mrb[134].mxu0 %v3952_v61 }
 0x390   : > { %7582 = vrcp.f32 %v3840_v58  ;;  %v3838_v30 = vpop.xlane.xlu0 %3837  ;;  %v3954_v10 = vmul.f32 %v7573_v60, %v9571_v27  ;;  %v10185_v58 = vld [vmem:[#allocation8_spill] sm:$0xff] }
 0x391   : > { %7584 = vrcp.f32 %v3838_v30 }
 0x392   : > { %v7575_v45 = vpop.eup %7574  ;;  %6803 = vmatprep.mubr.f32.mxu1 %v3954_v10 }
 0x393   : > { %v7577_v41 = vpop.eup %7576  ;;  %6804 = vmatmul.mubr.f32.vlgmr.msra.gmra.mrb[136].mxu1 %v3956_v33  ;;  %v3844_v34 = vpop.xlane.xlu1 %3843  ;;  %v3960_v35 = vmul.f32 %v7575_v45, %v9576_v37 }
 0x394   : > { %7358 = vmatpush3.bf16.msra.mxu1 %v10180_v9  ;;  %7586 = vrcp.f32 %v3844_v34  ;;  %v3842_v36 = vpop.xlane.xlu0 %3841  ;;  %v3958_v32 = vmul.f32 %v7577_v41, %v9578_v57  ;;  %v10186_v41 = vld [vmem:[#allocation7_spill] sm:$0xff] }
 0x395   : > { %7360 = vmatprep.subr.bf16.mxu1 %v10181_v21  ;;  %7588 = vrcp.f32 %v3842_v36 }
 0x396   : > { %v7579_v27 = vpop.eup %7578  ;;  %6806 = vmatprep.mubr.f32.mxu1 %v3958_v32  ;;  %v10187_v32 = vld [vmem:[#allocation10_spill] sm:$0xff] }
 0x397   : > { %v7581_v24 = vpop.eup %7580  ;;  %6807 = vmatmul.mubr.f32.gmra.mrb[138].mxu1 %v3960_v35  ;;  %v3848_v5 = vpop.xlane.xlu1 %3847  ;;  %v3964_v15 = vmul.f32 %v7579_v27, %v9584_v11 }
 0x398   : > { %7362 = vmatpush3.bf16.msra.mxu1 %v10181_v21  ;;  %7590 = vrcp.f32 %v3848_v5  ;;  %v3846_v37 = vpop.xlane.xlu0 %3845  ;;  %v3962_v18 = vmul.f32 %v7581_v24, %v9586_v13 }
 0x399   : > { %7364 = vmatprep.subr.bf16.mxu1 %v10182_v4  ;;  %7592 = vrcp.f32 %v3846_v37 }
 0x39a   : > { %v7583_v57 = vpop.eup %7582  ;;  %6809 = vmatprep.mubr.f32.mxu1 %v3962_v18 }
 0x39b   : > { %v7585_v48 = vpop.eup %7584  ;;  %6810 = vmatmul.mubr.f32.gmra.mrb[140].mxu1 %v3964_v15  ;;  %v3852_v7 = vpop.xlane.xlu1 %3851  ;;  %v3968_v55 = vmul.f32 %v7583_v57, %v9592_v26 }
 0x39c   : > { %7366 = vmatpush3.bf16.msra.mxu1 %v10182_v4  ;;  %7594 = vrcp.f32 %v3852_v7  ;;  %v3850_v11 = vpop.xlane.xlu0 %3849  ;;  %v3966_v56 = vmul.f32 %v7585_v48, %v9594_v23 }
 0x39d   : > { %7368 = vmatprep.subr.bf16.mxu1 %v10183_v3  ;;  %7596 = vrcp.f32 %v3850_v11  ;;  %v10188_v11 = vld [vmem:[#allocation25_spill] sm:$0xff] }
 0x39e   : > { %v7587_v13 = vpop.eup %7586  ;;  %6812 = vmatprep.mubr.f32.mxu1 %v3966_v56 }
 0x39f   : > { %v7589_v20 = vpop.eup %7588  ;;  %6813 = vmatmul.mubr.f32.gmra.mrb[142].mxu1 %v3968_v55  ;;  %v3856_v53 = vpop.xlane.xlu1 %3855  ;;  %v3972_v43 = vmul.f32 %v7587_v13, %v9599_v29 }
 0x3a0   : > { %7370 = vmatpush3.bf16.msra.mxu1 %v10183_v3  ;;  %7598 = vrcp.f32 %v3856_v53  ;;  %v3854_v26 = vpop.xlane.xlu0 %3853  ;;  %v3970_v47 = vmul.f32 %v7589_v20, %v9602_v17 }
 0x3a1   : > { %7372 = vmatprep.subr.bf16.mxu1 %v10184_v49  ;;  %7600 = vrcp.f32 %v3854_v26 }
 0x3a2   : > { %v7591_v23 = vpop.eup %7590  ;;  %6815 = vmatprep.mubr.f32.mxu1 %v3970_v47 }
 0x3a3   : > { %v7593_v1 = vpop.eup %7592  ;;  %6816 = vmatmul.mubr.f32.gmra.mrb[144].mxu1 %v3972_v43  ;;  %v3860_v2 = vpop.xlane.xlu1 %3859  ;;  %v3976_v61 = vmul.f32 %v7591_v23, %v9607_v0 }
 0x3a4   : > { %7374 = vmatpush3.bf16.msra.mxu1 %v10184_v49  ;;  %7602 = vrcp.f32 %v3860_v2  ;;  %v3858_v29 = vpop.xlane.xlu0 %3857  ;;  %v3974_v60 = vmul.f32 %v7593_v1, %v9610_v31 }
 0x3a5   : > { %7376 = vmatprep.subr.bf16.mxu1 %v10185_v58  ;;  %7604 = vrcp.f32 %v3858_v29 }
 0x3a6   : > { %v7595_v17 = vpop.eup %7594  ;;  %6818 = vmatprep.mubr.f32.mxu1 %v3974_v60 }
 0x3a7   : > { %v7597_v30 = vpop.eup %7596  ;;  %6819 = vmatmul.mubr.f32.gmra.mrb[146].mxu1 %v3976_v61  ;;  %v3864_v10 = vpop.xlane.xlu1 %3863  ;;  %v3980_v33 = vmul.f32 %v7595_v17, %v9615_v8 }
 0x3a8   : > { %7378 = vmatpush3.bf16.msra.mxu1 %v10185_v58  ;;  %7606 = vrcp.f32 %v3864_v10  ;;  %v3862_v0 = vpop.xlane.xlu0 %3861  ;;  %v3978_v45 = vmul.f32 %v7597_v30, %v9618_v39 }
 0x3a9   : > { %7380 = vmatprep.subr.bf16.mxu1 %v10186_v41  ;;  %7608 = vrcp.f32 %v3862_v0 }
 0x3aa   : > { %v7599_v31 = vpop.eup %7598  ;;  %6821 = vmatprep.mubr.f32.mxu1 %v3978_v45  ;;  %v10189_v45 = vld [vmem:[#allocation24_spill] sm:$0xff] }
 0x3ab   : > { %v7601_v34 = vpop.eup %7600  ;;  %6822 = vmatmul.mubr.f32.gmra.mrb[148].mxu1 %v3980_v33  ;;  %v3868_v35 = vpop.xlane.xlu1 %3867  ;;  %v3984_v9 = vmul.f32 %v7599_v31, %v9623_v6 }
 0x3ac   : > { %7382 = vmatpush3.bf16.msra.mxu1 %v10186_v41  ;;  %7610 = vrcp.f32 %v3868_v35  ;;  %v3866_v8 = vpop.xlane.xlu0 %3865  ;;  %v3982_v36 = vmul.f32 %v7601_v34, %v9626_v51  ;;  %v10190_v34 = vld [vmem:[#allocation9_spill] sm:$0xff] }
 0x3ad   : > { %7384 = vmatprep.subr.bf16.mxu1 %v10187_v32  ;;  %7612 = vrcp.f32 %v3866_v8  ;;  %v10191_v8 = vld [vmem:[#allocation11_spill] sm:$0xff] }
 0x3ae   : > { %v7603_v39 = vpop.eup %7602  ;;  %6824 = vmatprep.mubr.f32.mxu1 %v3982_v36 }
 0x3af   : > { %v7605_v21 = vpop.eup %7604  ;;  %v3988_v27 = vmul.f32 %v7603_v39, %v9631_v25  ;;  %6825 = vmatmul.mubr.f32.gmra.mrb[150].mxu1 %v3984_v9  ;;  %v3872_v24 = vpop.xlane.xlu1 %3871 }
 0x3b0   : > { %7386 = vmatpush3.bf16.msra.mxu1 %v10187_v32  ;;  %7614 = vrcp.f32 %v3872_v24  ;;  %v3870_v6 = vpop.xlane.xlu0 %3869  ;;  %v3986_v5 = vmul.f32 %v7605_v21, %v9634_v62  ;;  %v10192_v21 = vld [vmem:[#allocation13_spill] sm:$0xff] }
 0x3b1   : > { %7616 = vrcp.f32 %v3870_v6  ;;  %v10193_v6 = vld [vmem:[#allocation12_spill] sm:$0xff] }
 0x3b2   : > { %v7607_v15 = vpop.eup %7606  ;;  %6859 = vmatprep.mubr.f32.mxu0 %v3986_v5 }
 0x3b3   : > { %v7609_v51 = vpop.eup %7608  ;;  %6860 = vmatmul.mubr.f32.vlgmr.msra.gmra.mrb[136].mxu0 %v3988_v27  ;;  %v3876_v37 = vpop.xlane.xlu1 %3875  ;;  %v3992_v18 = vmul.f32 %v7607_v15, %v9639_v22 }
 0x3b4   : > { %7618 = vrcp.f32 %v3876_v37  ;;  %v3874_v4 = vpop.xlane.xlu0 %3873  ;;  %v3990_v25 = vmul.f32 %v7609_v51, %v9642_v42 }
 0x3b5   : > { %7620 = vrcp.f32 %v3874_v4 }
 0x3b6   : > { %v7611_v57 = vpop.eup %7610  ;;  %6862 = vmatprep.mubr.f32.mxu0 %v3990_v25 }
 0x3b7   : > { %v7613_v48 = vpop.eup %7612  ;;  %6863 = vmatmul.mubr.f32.gmra.mrb[138].mxu0 %v3992_v18  ;;  %v3880_v7 = vpop.xlane.xlu1 %3879  ;;  %v3996_v62 = vmul.f32 %v7611_v57, %v9647_v59 }
 0x3b8   : > { %7622 = vrcp.f32 %v3880_v7  ;;  %v3878_v55 = vpop.xlane.xlu0 %3877  ;;  %v3994_v56 = vmul.f32 %v7613_v48, %v10188_v11 }
 0x3b9   : > { %7624 = vrcp.f32 %v3878_v55 }
 0x3ba   : > { %v7615_v3 = vpop.eup %7614  ;;  %6865 = vmatprep.mubr.f32.mxu0 %v3994_v56 }
 0x3bb   : > { %v7617_v22 = vpop.eup %7616  ;;  %6866 = vmatmul.mubr.f32.gmra.mrb[140].mxu0 %v3996_v62  ;;  %v3884_v13 = vpop.xlane.xlu1 %3883  ;;  %v4000_v42 = vmul.f32 %v7615_v3, %v9655_v14 }
 0x3bc   : > { %7626 = vrcp.f32 %v3884_v13  ;;  %v3882_v20 = vpop.xlane.xlu0 %3881  ;;  %v3998_v53 = vmul.f32 %v7617_v22, %v9658_v16  ;;  %v10194_v22 = vld [vmem:[#allocation15_spill] sm:$0xff] }
 0x3bd   : > { %7628 = vrcp.f32 %v3882_v20 }
 0x3be   : > { %v7619_v43 = vpop.eup %7618  ;;  %6868 = vmatprep.mubr.f32.mxu0 %v3998_v53 }
 0x3bf   : > { %v7621_v59 = vpop.eup %7620  ;;  %6869 = vmatmul.mubr.f32.gmra.mrb[142].mxu0 %v4000_v42  ;;  %v3888_v26 = vpop.xlane.xlu1 %3887  ;;  %v4004_v47 = vmul.f32 %v7619_v43, %v9663_v12  ;;  %v10195_v42 = vld [vmem:[#allocation14_spill] sm:$0xff]  ;;  %v10196_v43 = vld [vmem:[#allocation17_spill] sm:$0xff] }
 0x3c0   : > { %7630 = vrcp.f32 %v3888_v26  ;;  %v3886_v49 = vpop.xlane.xlu0 %3885  ;;  %v4002_v23 = vmul.f32 %v7621_v59, %v9666_v46 }
 0x3c1   : > { %7632 = vrcp.f32 %v3886_v49 }
 0x3c2   : > { %v7623_v1 = vpop.eup %7622  ;;  %6871 = vmatprep.mubr.f32.mxu0 %v4002_v23  ;;  %v10198_v23 = vld [vmem:[#allocation19_spill] sm:$0xff] }
 0x3c3   : > { %v7625_v14 = vpop.eup %7624  ;;  %6872 = vmatmul.mubr.f32.gmra.mrb[144].mxu0 %v4004_v47  ;;  %v3892_v2 = vpop.xlane.xlu1 %3891  ;;  %v4008_v16 = vmul.f32 %v7623_v1, %v9671_v28 }
 0x3c4   : > { %7634 = vrcp.f32 %v3892_v2  ;;  %v3890_v61 = vpop.xlane.xlu0 %3889  ;;  %v4006_v29 = vmul.f32 %v7625_v14, %v9674_v44  ;;  %v10199_v14 = vld [vmem:[#allocation18_spill] sm:$0xff] }
 0x3c5   : > { %7636 = vrcp.f32 %v3890_v61 }
 0x3c6   : > { %v7627_v60 = vpop.eup %7626  ;;  %6874 = vmatprep.mubr.f32.mxu0 %v4006_v29  ;;  %v10200_v29 = vld [vmem:[#allocation21_spill] sm:$0xff] }
 0x3c7   : > { %v7629_v12 = vpop.eup %7628  ;;  %6875 = vmatmul.mubr.f32.gmra.mrb[146].mxu0 %v4008_v16  ;;  %v3896_v58 = vpop.xlane.xlu1 %3895  ;;  %v4012_v46 = vmul.f32 %v7627_v60, %v9679_v38 }
 0x3c8   : > { %7638 = vrcp.f32 %v3896_v58  ;;  %v3894_v17 = vpop.xlane.xlu0 %3893  ;;  %v4010_v30 = vmul.f32 %v7629_v12, %v9682_v19  ;;  %v10201_v12 = vld [vmem:[#allocation20_spill] sm:$0xff] }
 0x3c9   : > { %7640 = vrcp.f32 %v3894_v17 }
 0x3ca   : > { %v7631_v10 = vpop.eup %7630  ;;  %6877 = vmatprep.mubr.f32.mxu0 %v4010_v30 }
 0x3cb   : > { %v7633_v28 = vpop.eup %7632  ;;  %6878 = vmatmul.mubr.f32.gmra.mrb[148].mxu0 %v4012_v46  ;;  %v3900_v33 = vpop.xlane.xlu1 %3899  ;;  %v4016_v44 = vmul.f32 %v7631_v10, %v9687_v63 }
 0x3cc   : > { %7642 = vrcp.f32 %v3900_v33  ;;  %v3898_v0 = vpop.xlane.xlu0 %3897  ;;  %v4014_v41 = vmul.f32 %v7633_v28, %v10189_v45 }
 0x3cd   : > { %7644 = vrcp.f32 %v3898_v0 }
 0x3ce   : > { %v7635_v31 = vpop.eup %7634  ;;  %6880 = vmatprep.mubr.f32.mxu0 %v4014_v41 }
 0x3cf   : > { %v7637_v38 = vpop.eup %7636  ;;  %v4020_v35 = vmul.f32 %v7635_v31, %v10190_v34  ;;  %6881 = vmatmul.mubr.f32.gmra.mrb[150].mxu0 %v4016_v44  ;;  %v3904_v19 = vpop.xlane.xlu1 %3903 }
 0x3d0   : > { %7646 = vrcp.f32 %v3904_v19  ;;  %v3902_v9 = vpop.xlane.xlu0 %3901  ;;  %v4018_v36 = vmul.f32 %v7637_v38, %v10191_v8 }
 0x3d1   : > { %7648 = vrcp.f32 %v3902_v9 }
 0x3d2   : > { %v7639_v32 = vpop.eup %7638  ;;  %6915 = vmatprep.mubr.f32.mxu1 %v4018_v36 }
 0x3d3   : > { %v7641_v63 = vpop.eup %7640  ;;  %6916 = vmatmul.mubr.f32.vlgmr.msra.gmra.mrb[152].mxu1 %v4020_v35  ;;  %v3908_v39 = vpop.xlane.xlu1 %3907  ;;  %v4024_v27 = vmul.f32 %v7639_v32, %v10192_v21 }
 0x3d4   : > { %7650 = vrcp.f32 %v3908_v39  ;;  %v3906_v24 = vpop.xlane.xlu0 %3905  ;;  %v4022_v5 = vmul.f32 %v7641_v63, %v10193_v6 }
 0x3d5   : > { %7652 = vrcp.f32 %v3906_v24 }
 0x3d6   : > { %v7643_v15 = vpop.eup %7642  ;;  %6918 = vmatprep.mubr.f32.mxu1 %v4022_v5 }
 0x3d7   : > { %v7645_v51 = vpop.eup %7644  ;;  %6919 = vmatmul.mubr.f32.gmra.mrb[154].mxu1 %v4024_v27  ;;  %v3912_v37 = vpop.xlane.xlu1 %3911  ;;  %v4028_v18 = vmul.f32 %v7643_v15, %v9711_v40 }
 0x3d8   : > { %7654 = vrcp.f32 %v3912_v37  ;;  %v3910_v4 = vpop.xlane.xlu0 %3909  ;;  %v4026_v25 = vmul.f32 %v7645_v51, %v9714_v52 }
 0x3d9   : > { %7656 = vrcp.f32 %v3910_v4 }
 0x3da   : > { %v7647_v57 = vpop.eup %7646  ;;  %6921 = vmatprep.mubr.f32.mxu1 %v4026_v25 }
 0x3db   : > { %v7649_v48 = vpop.eup %7648  ;;  %6922 = vmatmul.mubr.f32.gmra.mrb[156].mxu1 %v4028_v18  ;;  %v3916_v7 = vpop.xlane.xlu1 %3915  ;;  %v4032_v62 = vmul.f32 %v7647_v57, %v9719_v50 }
 0x3dc   : > { %7658 = vrcp.f32 %v3916_v7  ;;  %v3914_v55 = vpop.xlane.xlu0 %3913  ;;  %v4030_v11 = vmul.f32 %v7649_v48, %v9722_v54  ;;  %v10197_v54 = vld [vmem:[#allocation16_spill] sm:$0xff]  ;;  %v4904_v48 = vld [vmem:[%s10017_s4] sm:$0xff] }
 0x3dd   : > { %7660 = vrcp.f32 %v3914_v55  ;;  %v4905_v7 = vld [vmem:[%s10017_s4 + $0x8] sm:$0xff] }
 0x3de   : > { %v7651_v56 = vpop.eup %7650  ;;  %6924 = vmatprep.mubr.f32.mxu1 %v4030_v11  ;;  %v7387_v55 = vpack.c.bf16 %v4905_v7, %v4904_v48 }
 0x3df   : > { %v7653_v40 = vpop.eup %7652  ;;  %6925 = vmatmul.mubr.f32.gmra.mrb[158].mxu1 %v4032_v62  ;;  %v3920_v3 = vpop.xlane.xlu1 %3919  ;;  %v4036_v52 = vmul.f32 %v7651_v56, %v10194_v22 }
 0x3e0   : > { %7662 = vrcp.f32 %v3920_v3  ;;  %v3918_v13 = vpop.xlane.xlu0 %3917  ;;  %v4034_v20 = vmul.f32 %v7653_v40, %v10195_v42  ;;  %7388 = vmatprep.subr.bf16.mxu0 %v7387_v55  ;;  %v4906_v42 = vld [vmem:[%s10017_s4 + $0x10] sm:$0xff] }
 0x3e1   : > { %7664 = vrcp.f32 %v3918_v13  ;;  %7390 = vmatpush3.bf16.msra.mxu0 %v7387_v55 }
 0x3e2   : > { %v7655_v53 = vpop.eup %7654  ;;  %6927 = vmatprep.mubr.f32.mxu1 %v4034_v20  ;;  %v4907_v20 = vld [vmem:[%s10017_s4 + $0x18] sm:$0xff] }
 0x3e3   : > { %v7657_v50 = vpop.eup %7656  ;;  %6928 = vmatmul.mubr.f32.gmra.mrb[160].mxu1 %v4036_v52  ;;  %v4040_v59 = vmul.f32 %v7655_v53, %v10196_v43 }
 0x3e4   : > { %v4038_v26 = vmul.f32 %v7657_v50, %v10197_v54  ;;  %v7391_v50 = vpack.c.bf16 %v4907_v20, %v4906_v42 }
 0x3e6   : > { %v7659_v47 = vpop.eup %7658  ;;  %6930 = vmatprep.mubr.f32.mxu1 %v4038_v26  ;;  %7392 = vmatprep.subr.bf16.mxu0 %v7391_v50 }
 0x3e7   : > { %v7661_v49 = vpop.eup %7660  ;;  %6931 = vmatmul.mubr.f32.gmra.mrb[162].mxu1 %v4040_v59  ;;  %v4044_v1 = vmul.f32 %v7659_v47, %v10198_v23  ;;  %7394 = vmatpush3.bf16.msra.mxu0 %v7391_v50 }
 0x3e8   : > { %v4042_v2 = vmul.f32 %v7661_v49, %v10199_v14 }
 0x3ea   : > { %v7663_v16 = vpop.eup %7662  ;;  %6933 = vmatprep.mubr.f32.mxu1 %v4042_v2 }
 0x3eb   : > { %v7665_v61 = vpop.eup %7664  ;;  %6934 = vmatmul.mubr.f32.gmra.mrb[164].mxu1 %v4044_v1  ;;  %v4048_v60 = vmul.f32 %v7663_v16, %v10200_v29 }
 0x3ec   : > { %v4046_v58 = vmul.f32 %v7665_v61, %v10201_v12 }
 0x3ee   : > { %6936 = vmatprep.mubr.f32.mxu1 %v4046_v58 }
 0x3ef   : > { %6937 = vmatmul.mubr.f32.gmra.mrb[166].mxu1 %v4048_v60 }
 0x444   : > { %v6749_v46 = vpop.f32.mrb[120].mxu0 }
 0x445   : > { %4630 = vst.msk [vmem:[#allocation2 + $0x8] sm:$0xff] %vm10202_vm0, %v6749_v46  ;;  %v4115_v17 = vpop.f32.mrb[121].mxu0  ;;  %vm4709_vm0 = vcmask 130112  }
 0x446   : > { %4629 = vst.msk [vmem:[#allocation2] sm:$0xff] %vm10203_vm1, %v4115_v17  ;;  %vm4790_vm1 = vcmask 195712  }
 0x448   : > { %v6752_v30 = vpop.f32.mrb[122].mxu0 }
 0x449   : > { %4632 = vst.msk [vmem:[#allocation2 + $0x18] sm:$0xff] %vm10204_vm3, %v6752_v30  ;;  %v4125_v10 = vpop.f32.mrb[123].mxu0  ;;  %vm4871_vm3 = vcmask 261312  }
 0x44a   : > { %4631 = vst.msk [vmem:[#allocation2 + $0x10] sm:$0xff] %vm10205_vm4, %v4125_v10  ;;  %vm10218_vm4 = vcmask 261120  }
 0x44c   : > { %v6755_v28 = vpop.f32.mrb[124].mxu0 }
 0x44d   : > { %4634 = vst.msk [vmem:[#allocation2 + $0x28] sm:$0xff] %vm10206_vm5, %v6755_v28  ;;  %v4135_v33 = vpop.f32.mrb[125].mxu0  ;;  %vm10219_vm5 = vmmov %vm10218_vm4 }
 0x44e   : > { %4633 = vst.msk [vmem:[#allocation2 + $0x20] sm:$0xff] %vm10207_vm6, %v4135_v33  ;;  %vm10220_vm6 = vmmov %vm10218_vm4 }
 0x450   : > { %v6758_v44 = vpop.f32.mrb[126].mxu0 }
 0x451   : > { %4636 = vst.msk [vmem:[#allocation2 + $0x38] sm:$0xff] %vm10208_vm7, %v6758_v44  ;;  %v4145_v0 = vpop.f32.mrb[127].mxu0  ;;  %vm10221_vm7 = vmmov %vm10218_vm4 }
 0x452   : > { %4635 = vst.msk [vmem:[#allocation2 + $0x30] sm:$0xff] %vm10209_vm8, %v4145_v0  ;;  %vm10222_vm8 = vmmov %vm10218_vm4 }
 0x454   : > { %v6761_v45 = vpop.f32.mrb[128].mxu0 }
 0x455   : > { %4638 = vst.msk [vmem:[#allocation2 + $0x48] sm:$0xff] %vm10210_vm9, %v6761_v45  ;;  %v4155_v41 = vpop.f32.mrb[129].mxu0  ;;  %vm10223_vm9 = vmmov %vm10218_vm4 }
 0x456   : > { %4637 = vst.msk [vmem:[#allocation2 + $0x40] sm:$0xff] %vm10211_vm10, %v4155_v41  ;;  %vm10224_vm10 = vmmov %vm10218_vm4 }
 0x458   : > { %v6764_v31 = vpop.f32.mrb[130].mxu0 }
 0x459   : > { %4640 = vst.msk [vmem:[#allocation2 + $0x58] sm:$0xff] %vm10212_vm11, %v6764_v31  ;;  %v4165_v38 = vpop.f32.mrb[131].mxu0  ;;  %vm10225_vm11 = vmmov %vm10218_vm4 }
 0x45a   : > { %4639 = vst.msk [vmem:[#allocation2 + $0x50] sm:$0xff] %vm10213_vm12, %v4165_v38  ;;  %vm10226_vm12 = vmmov %vm10218_vm4 }
 0x45c   : > { %v6767_v34 = vpop.f32.mrb[132].mxu0 }
 0x45d   : > { %4642 = vst.msk [vmem:[#allocation2 + $0x68] sm:$0xff] %vm10214_vm13, %v6767_v34  ;;  %v4175_v35 = vpop.f32.mrb[133].mxu0  ;;  %vm10227_vm13 = vmmov %vm10218_vm4 }
 0x45e   : > { %4641 = vst.msk [vmem:[#allocation2 + $0x60] sm:$0xff] %vm10215_vm14, %v4175_v35  ;;  %vm10228_vm14 = vmmov %vm10218_vm4 }
 0x462   : > { %v6770_v19 = vpop.f32.mrb[134].mxu0 }
 0x463   : > { %4644 = vst.msk [vmem:[#allocation2 + $0x78] sm:$0xff] %vm10216_vm15, %v6770_v19  ;;  %v4185_v9 = vpop.f32.mrb[135].mxu0  ;;  %vm10229_vm15 = vmmov %vm10218_vm4 }
 0x464   : > { %4643 = vst.msk [vmem:[#allocation2 + $0x70] sm:$0xff] %vm10217_vm2, %v4185_v9  ;;  %vm10230_vm2 = vmmov %vm10218_vm4 }
 0x466   : > { %v6805_v8 = vpop.f32.mrb[136].mxu1 }
 0x467   : > { %4663 = vrot.lane.b32.xlu1 %v6805_v8, %s7674_s17  ;;  %v4260_v36 = vpop.f32.mrb[137].mxu1 }
 0x468   : > { %4661 = vrot.lane.b32.xlu0 %v4260_v36, %s7674_s17 }
 0x46a   : > { %v6808_v32 = vpop.f32.mrb[138].mxu1 }
 0x46b   : > { %4667 = vrot.lane.b32.xlu1 %v6808_v32, %s7674_s17  ;;  %v4270_v63 = vpop.f32.mrb[139].mxu1 }
 0x46c   : > { %4665 = vrot.lane.b32.xlu0 %v4270_v63, %s7674_s17 }
 0x46e   : > { %v6811_v39 = vpop.f32.mrb[140].mxu1 }
 0x46f   : > { %4671 = vrot.lane.b32.xlu1 %v6811_v39, %s7674_s17  ;;  %v4280_v21 = vpop.f32.mrb[141].mxu1 }
 0x470   : > { %4669 = vrot.lane.b32.xlu0 %v4280_v21, %s7674_s17 }
 0x472   : > { %v6814_v27 = vpop.f32.mrb[142].mxu1 }
 0x473   : > { %4675 = vrot.lane.b32.xlu1 %v6814_v27, %s7674_s17  ;;  %v4290_v24 = vpop.f32.mrb[143].mxu1 }
 0x474   : > { %4673 = vrot.lane.b32.xlu0 %v4290_v24, %s7674_s17 }
 0x476   : > { %v6817_v6 = vpop.f32.mrb[144].mxu1 }
 0x477   : > { %4679 = vrot.lane.b32.xlu1 %v6817_v6, %s7674_s17  ;;  %v4300_v5 = vpop.f32.mrb[145].mxu1 }
 0x478   : > { %4677 = vrot.lane.b32.xlu0 %v4300_v5, %s7674_s17 }
 0x47a   : > { %v6820_v15 = vpop.f32.mrb[146].mxu1 }
 0x47b   : > { %4683 = vrot.lane.b32.xlu1 %v6820_v15, %s7674_s17  ;;  %v4310_v51 = vpop.f32.mrb[147].mxu1 }
 0x47c   : > { %4681 = vrot.lane.b32.xlu0 %v4310_v51, %s7674_s17 }
 0x47e   : > { %v6823_v37 = vpop.f32.mrb[148].mxu1 }
 0x47f   : > { %4687 = vrot.lane.b32.xlu1 %v6823_v37, %s7674_s17  ;;  %v4320_v18 = vpop.f32.mrb[149].mxu1 }
 0x480   : > { %4685 = vrot.lane.b32.xlu0 %v4320_v18, %s7674_s17 }
 0x482   : > { %v6826_v4 = vpop.f32.mrb[150].mxu1 }
 0x483   : > { %4691 = vrot.lane.b32.xlu1 %v6826_v4, %s7674_s17  ;;  %v4330_v25 = vpop.f32.mrb[151].mxu1 }
 0x484   : > { %4689 = vrot.lane.b32.xlu0 %v4330_v25, %s7674_s17 }
 0x486   : > { %v6861_v57 = vpop.f32.mrb[136].mxu0 }
 0x487   : > { %4744 = vrot.lane.b32.xlu1 %v6861_v57, %s7675_s23  ;;  %v4405_v62 = vpop.f32.mrb[137].mxu0 }
 0x48a   : > { %v6864_v11 = vpop.f32.mrb[138].mxu0 }
 0x48b   : > { %4742 = vrot.lane.b32.xlu1 %v4405_v62, %s7675_s23  ;;  %v4415_v56 = vpop.f32.mrb[139].mxu0 }
 0x48c   : > { %4746 = vrot.lane.b32.xlu0 %v4415_v56, %s7675_s23 }
 0x48e   : > { %v6867_v40 = vpop.f32.mrb[140].mxu0 }
 0x48f   : > { %4748 = vrot.lane.b32.xlu1 %v6864_v11, %s7675_s23  ;;  %v4425_v3 = vpop.f32.mrb[141].mxu0 }
 0x490   : > { %4750 = vrot.lane.b32.xlu0 %v4425_v3, %s7675_s23 }
 0x492   : > { %v6870_v22 = vpop.f32.mrb[142].mxu0 }
 0x493   : > { %4752 = vrot.lane.b32.xlu1 %v6867_v40, %s7675_s23  ;;  %v4435_v52 = vpop.f32.mrb[143].mxu0 }
 0x494   : > { %4754 = vrot.lane.b32.xlu0 %v4435_v52, %s7675_s23 }
 0x496   : > { %v6873_v13 = vpop.f32.mrb[144].mxu0 }
 0x497   : > { %4756 = vrot.lane.b32.xlu1 %v6870_v22, %s7675_s23  ;;  %v4445_v53 = vpop.f32.mrb[145].mxu0 }
 0x498   : > { %4758 = vrot.lane.b32.xlu0 %v4445_v53, %s7675_s23 }
 0x49a   : > { %v6876_v43 = vpop.f32.mrb[146].mxu0 }
 0x49b   : > { %4760 = vrot.lane.b32.xlu1 %v6873_v13, %s7675_s23  ;;  %v4455_v59 = vpop.f32.mrb[147].mxu0 }
 0x49c   : > { %4762 = vrot.lane.b32.xlu0 %v4455_v59, %s7675_s23 }
 0x49e   : > { %v6879_v54 = vpop.f32.mrb[148].mxu0 }
 0x49f   : > { %4764 = vrot.lane.b32.xlu1 %v6876_v43, %s7675_s23  ;;  %v4465_v26 = vpop.f32.mrb[149].mxu0 }
 0x4a0   : > { %4766 = vrot.lane.b32.xlu0 %v4465_v26, %s7675_s23 }
 0x4a2   : > { %v6882_v47 = vpop.f32.mrb[150].mxu0 }
 0x4a3   : > { %4768 = vrot.lane.b32.xlu1 %v6879_v54, %s7675_s23  ;;  %v4475_v49 = vpop.f32.mrb[151].mxu0 }
 0x4a4   : > { %4770 = vrot.lane.b32.xlu0 %v4475_v49, %s7675_s23 }
 0x4a6   : > { %v6917_v23 = vpop.f32.mrb[152].mxu1 }
 0x4a7   : > { %4772 = vrot.lane.b32.xlu1 %v6882_v47, %s7675_s23  ;;  %v4550_v1 = vpop.f32.mrb[153].mxu1 }
 0x4a8   : > { %4823 = vrot.lane.b32.xlu0 %v4550_v1, %s7676_s28 }
 0x4aa   : > { %v6920_v14 = vpop.f32.mrb[154].mxu1 }
 0x4ab   : > { %4825 = vrot.lane.b32.xlu1 %v6917_v23, %s7676_s28  ;;  %v4560_v2 = vpop.f32.mrb[155].mxu1 }
 0x4ac   : > { %4827 = vrot.lane.b32.xlu0 %v4560_v2, %s7676_s28 }
 0x4ae   : > { %v6923_v16 = vpop.f32.mrb[156].mxu1 }
 0x4af   : > { %4829 = vrot.lane.b32.xlu1 %v6920_v14, %s7676_s28  ;;  %v4570_v61 = vpop.f32.mrb[157].mxu1 }
 0x4b0   : > { %4831 = vrot.lane.b32.xlu0 %v4570_v61, %s7676_s28 }
 0x4b2   : > { %v6926_v29 = vpop.f32.mrb[158].mxu1 }
 0x4b3   : > { %4833 = vrot.lane.b32.xlu1 %v6923_v16, %s7676_s28  ;;  %v4580_v60 = vpop.f32.mrb[159].mxu1 }
 0x4b4   : > { %4835 = vrot.lane.b32.xlu0 %v4580_v60, %s7676_s28 }
 0x4b6   : > { %v6929_v12 = vpop.f32.mrb[160].mxu1 }
 0x4b7   : > { %4837 = vrot.lane.b32.xlu1 %v6926_v29, %s7676_s28  ;;  %v4590_v58 = vpop.f32.mrb[161].mxu1 }
 0x4b8   : > { %4839 = vrot.lane.b32.xlu0 %v4590_v58, %s7676_s28 }
 0x4ba   : > { %v6932_v46 = vpop.f32.mrb[162].mxu1 }
 0x4bb   : > { %4841 = vrot.lane.b32.xlu1 %v6929_v12, %s7676_s28  ;;  %v4600_v17 = vpop.f32.mrb[163].mxu1 }
 0x4bc   : > { %4843 = vrot.lane.b32.xlu0 %v4600_v17, %s7676_s28 }
 0x4be   : > { %v6935_v30 = vpop.f32.mrb[164].mxu1 }
 0x4bf   : > { %4845 = vrot.lane.b32.xlu1 %v6932_v46, %s7676_s28  ;;  %v4610_v10 = vpop.f32.mrb[165].mxu1 }
 0x4c0   : > { %4847 = vrot.lane.b32.xlu0 %v4610_v10, %s7676_s28 }
 0x4c2   : > { %v6938_v28 = vpop.f32.mrb[166].mxu1 }
 0x4c3   : > { %4849 = vrot.lane.b32.xlu1 %v6935_v30, %s7676_s28  ;;  %v4620_v33 = vpop.f32.mrb[167].mxu1 }
 0x4c4   : > { %4851 = vrot.lane.b32.xlu0 %v4620_v33, %s7676_s28 }
 0x4c7   : > { %4853 = vrot.lane.b32.xlu1 %v6938_v28, %s7676_s28 }
 0x4d9   : > { %v4664_v44 = vpop.permute.xlu1 %4663 }
 0x4da   : > { %4711 = vst.msk [vmem:[#allocation2 + $0x8] sm:$0xff] %vm4709_vm0, %v4664_v44  ;;  %v4662_v0 = vpop.permute.xlu0 %4661  ;;  %v5568_v44 = vld [vmem:[%s10018_s5] ss:$0 sm:$0xff] }
 0x4db   : > { %4710 = vst.msk [vmem:[#allocation2] sm:$0xff] %vm4709_vm0, %v4662_v0 }
 0x4dd   : > { %v4668_v45 = vpop.permute.xlu1 %4667 }
 0x4de   : > { %4713 = vst.msk [vmem:[#allocation2 + $0x18] sm:$0xff] %vm4709_vm0, %v4668_v45  ;;  %v4666_v41 = vpop.permute.xlu0 %4665 }
 0x4df   : > { %4712 = vst.msk [vmem:[#allocation2 + $0x10] sm:$0xff] %vm4709_vm0, %v4666_v41 }
 0x4e1   : > { %v4672_v31 = vpop.permute.xlu1 %4671 }
 0x4e2   : > { %4715 = vst.msk [vmem:[#allocation2 + $0x28] sm:$0xff] %vm4709_vm0, %v4672_v31  ;;  %v4670_v38 = vpop.permute.xlu0 %4669 }
 0x4e3   : > { %4714 = vst.msk [vmem:[#allocation2 + $0x20] sm:$0xff] %vm4709_vm0, %v4670_v38 }
 0x4e5   : > { %v4676_v34 = vpop.permute.xlu1 %4675 }
 0x4e6   : > { %4717 = vst.msk [vmem:[#allocation2 + $0x38] sm:$0xff] %vm4709_vm0, %v4676_v34  ;;  %v4674_v35 = vpop.permute.xlu0 %4673 }
 0x4e7   : > { %4716 = vst.msk [vmem:[#allocation2 + $0x30] sm:$0xff] %vm4709_vm0, %v4674_v35 }
 0x4e9   : > { %v4680_v19 = vpop.permute.xlu1 %4679 }
 0x4ea   : > { %4719 = vst.msk [vmem:[#allocation2 + $0x48] sm:$0xff] %vm4709_vm0, %v4680_v19  ;;  %v4678_v9 = vpop.permute.xlu0 %4677 }
 0x4eb   : > { %4718 = vst.msk [vmem:[#allocation2 + $0x40] sm:$0xff] %vm4709_vm0, %v4678_v9 }
 0x4ed   : > { %v4684_v8 = vpop.permute.xlu1 %4683 }
 0x4ee   : > { %4721 = vst.msk [vmem:[#allocation2 + $0x58] sm:$0xff] %vm4709_vm0, %v4684_v8  ;;  %v4682_v36 = vpop.permute.xlu0 %4681 }
 0x4ef   : > { %4720 = vst.msk [vmem:[#allocation2 + $0x50] sm:$0xff] %vm4709_vm0, %v4682_v36 }
 0x4f1   : > { %v4688_v32 = vpop.permute.xlu1 %4687 }
 0x4f2   : > { %4723 = vst.msk [vmem:[#allocation2 + $0x68] sm:$0xff] %vm4709_vm0, %v4688_v32  ;;  %v4686_v63 = vpop.permute.xlu0 %4685 }
 0x4f3   : > { %4722 = vst.msk [vmem:[#allocation2 + $0x60] sm:$0xff] %vm4709_vm0, %v4686_v63 }
 0x4f5   : > { %v4692_v39 = vpop.permute.xlu1 %4691 }
 0x4f6   : > { %4725 = vst.msk [vmem:[#allocation2 + $0x78] sm:$0xff] %vm4709_vm0, %v4692_v39  ;;  %v4690_v21 = vpop.permute.xlu0 %4689 }
 0x4f7   : > { %4724 = vst.msk [vmem:[#allocation2 + $0x70] sm:$0xff] %vm4709_vm0, %v4690_v21  ;;  %vm10231_vm0 = vmmov %vm10230_vm2 }
 0x4f9   : > { %v4745_v27 = vpop.permute.xlu1 %4744 }
 0x4fa   : > { %4792 = vst.msk [vmem:[#allocation2 + $0x8] sm:$0xff] %vm4790_vm1, %v4745_v27 }
 0x4fd   : > { %v4743_v24 = vpop.permute.xlu1 %4742 }
 0x4fe   : > { %4791 = vst.msk [vmem:[#allocation2] sm:$0xff] %vm4790_vm1, %v4743_v24  ;;  %v4747_v6 = vpop.permute.xlu0 %4746 }
 0x4ff   : > { %4793 = vst.msk [vmem:[#allocation2 + $0x10] sm:$0xff] %vm4790_vm1, %v4747_v6 }
 0x501   : > { %v4749_v5 = vpop.permute.xlu1 %4748 }
 0x502   : > { %4794 = vst.msk [vmem:[#allocation2 + $0x18] sm:$0xff] %vm4790_vm1, %v4749_v5  ;;  %v4751_v15 = vpop.permute.xlu0 %4750 }
 0x503   : > { %4795 = vst.msk [vmem:[#allocation2 + $0x20] sm:$0xff] %vm4790_vm1, %v4751_v15 }
 0x505   : > { %v4753_v51 = vpop.permute.xlu1 %4752 }
 0x506   : > { %4796 = vst.msk [vmem:[#allocation2 + $0x28] sm:$0xff] %vm4790_vm1, %v4753_v51  ;;  %v4755_v37 = vpop.permute.xlu0 %4754 }
 0x507   : > { %4797 = vst.msk [vmem:[#allocation2 + $0x30] sm:$0xff] %vm4790_vm1, %v4755_v37 }
 0x509   : > { %v4757_v18 = vpop.permute.xlu1 %4756 }
 0x50a   : > { %4798 = vst.msk [vmem:[#allocation2 + $0x38] sm:$0xff] %vm4790_vm1, %v4757_v18  ;;  %v4759_v4 = vpop.permute.xlu0 %4758 }
 0x50b   : > { %4799 = vst.msk [vmem:[#allocation2 + $0x40] sm:$0xff] %vm4790_vm1, %v4759_v4 }
 0x50d   : > { %v4761_v25 = vpop.permute.xlu1 %4760 }
 0x50e   : > { %4800 = vst.msk [vmem:[#allocation2 + $0x48] sm:$0xff] %vm4790_vm1, %v4761_v25  ;;  %v4763_v57 = vpop.permute.xlu0 %4762 }
 0x50f   : > { %4801 = vst.msk [vmem:[#allocation2 + $0x50] sm:$0xff] %vm4790_vm1, %v4763_v57 }
 0x511   : > { %v4765_v48 = vpop.permute.xlu1 %4764 }
 0x512   : > { %4802 = vst.msk [vmem:[#allocation2 + $0x58] sm:$0xff] %vm4790_vm1, %v4765_v48  ;;  %v4767_v7 = vpop.permute.xlu0 %4766 }
 0x513   : > { %4803 = vst.msk [vmem:[#allocation2 + $0x60] sm:$0xff] %vm4790_vm1, %v4767_v7 }
 0x515   : > { %v4769_v62 = vpop.permute.xlu1 %4768 }
 0x516   : > { %4804 = vst.msk [vmem:[#allocation2 + $0x68] sm:$0xff] %vm4790_vm1, %v4769_v62  ;;  %v4771_v55 = vpop.permute.xlu0 %4770 }
 0x517   : > { %4805 = vst.msk [vmem:[#allocation2 + $0x70] sm:$0xff] %vm4790_vm1, %v4771_v55 }
 0x519   : > { %v4773_v11 = vpop.permute.xlu1 %4772 }
 0x51a   : > { %4806 = vst.msk [vmem:[#allocation2 + $0x78] sm:$0xff] %vm4790_vm1, %v4773_v11  ;;  %v4824_v56 = vpop.permute.xlu0 %4823  ;;  %vm10232_vm1 = vmmov %vm10231_vm0 }
 0x51b   : > { %4872 = vst.msk [vmem:[#allocation2] sm:$0xff] %vm4871_vm3, %v4824_v56 }
 0x51d   : > { %v4826_v40 = vpop.permute.xlu1 %4825 }
 0x51e   : > { %4873 = vst.msk [vmem:[#allocation2 + $0x8] sm:$0xff] %vm4871_vm3, %v4826_v40  ;;  %v4828_v3 = vpop.permute.xlu0 %4827 }
 0x51f   : > { %4874 = vst.msk [vmem:[#allocation2 + $0x10] sm:$0xff] %vm4871_vm3, %v4828_v3 }
 0x521   : > { %v4830_v22 = vpop.permute.xlu1 %4829 }
 0x522   : > { %4875 = vst.msk [vmem:[#allocation2 + $0x18] sm:$0xff] %vm4871_vm3, %v4830_v22  ;;  %v4832_v52 = vpop.permute.xlu0 %4831  ;;  %v4888_v13 = vld [vmem:[#allocation2] sm:$0xff] }
 0x523   : > { %4876 = vst.msk [vmem:[#allocation2 + $0x20] sm:$0xff] %vm4871_vm3, %v4832_v52  ;;  %6947 = vmatprep.mubr.msk.f32.mxu0 %vm10218_vm4, %v4888_v13  ;;  %vm10233_vm4 = vmmov %vm10231_vm0 }
 0x525   : > { %v4834_v42 = vpop.permute.xlu1 %4833  ;;  %v4889_v20 = vld [vmem:[#allocation2 + $0x8] sm:$0xff] }
 0x526   : > { %4877 = vst.msk [vmem:[#allocation2 + $0x28] sm:$0xff] %vm4871_vm3, %v4834_v42  ;;  %6948 = vmatmul.mubr.msk.f32.vlgmr.msra.gmra.mrb[152].mxu0 %vm10219_vm5, %v4889_v20  ;;  %v4836_v53 = vpop.permute.xlu0 %4835  ;;  %v4890_v50 = vld [vmem:[#allocation2 + $0x10] sm:$0xff]  ;;  %vm10235_vm5 = vmmov %vm10231_vm0 }
 0x527   : > { %4878 = vst.msk [vmem:[#allocation2 + $0x30] sm:$0xff] %vm4871_vm3, %v4836_v53  ;;  %6950 = vmatprep.mubr.msk.f32.mxu0 %vm10220_vm6, %v4890_v50  ;;  %vm10236_vm6 = vmmov %vm10231_vm0 }
 0x529   : > { %v4838_v43 = vpop.permute.xlu1 %4837  ;;  %v4891_v59 = vld [vmem:[#allocation2 + $0x18] sm:$0xff] }
 0x52a   : > { %4879 = vst.msk [vmem:[#allocation2 + $0x38] sm:$0xff] %vm4871_vm3, %v4838_v43  ;;  %6951 = vmatmul.mubr.msk.f32.gmra.mrb[154].mxu0 %vm10221_vm7, %v4891_v59  ;;  %v4840_v54 = vpop.permute.xlu0 %4839  ;;  %v4892_v26 = vld [vmem:[#allocation2 + $0x20] sm:$0xff]  ;;  %vm10237_vm7 = vmmov %vm10231_vm0 }
 0x52b   : > { %4880 = vst.msk [vmem:[#allocation2 + $0x40] sm:$0xff] %vm4871_vm3, %v4840_v54  ;;  %6953 = vmatprep.mubr.msk.f32.mxu0 %vm10222_vm8, %v4892_v26  ;;  %vm10238_vm8 = vmmov %vm10231_vm0 }
 0x52d   : > { %v4842_v47 = vpop.permute.xlu1 %4841  ;;  %v4893_v49 = vld [vmem:[#allocation2 + $0x28] sm:$0xff] }
 0x52e   : > { %4881 = vst.msk [vmem:[#allocation2 + $0x48] sm:$0xff] %vm4871_vm3, %v4842_v47  ;;  %6954 = vmatmul.mubr.msk.f32.gmra.mrb[156].mxu0 %vm10223_vm9, %v4893_v49  ;;  %v4844_v23 = vpop.permute.xlu0 %4843  ;;  %v4894_v1 = vld [vmem:[#allocation2 + $0x30] sm:$0xff]  ;;  %vm10239_vm9 = vmmov %vm10231_vm0 }
 0x52f   : > { %4882 = vst.msk [vmem:[#allocation2 + $0x50] sm:$0xff] %vm4871_vm3, %v4844_v23  ;;  %6956 = vmatprep.mubr.msk.f32.mxu0 %vm10224_vm10, %v4894_v1  ;;  %vm10240_vm10 = vmmov %vm10231_vm0 }
 0x531   : > { %v4846_v14 = vpop.permute.xlu1 %4845  ;;  %v4895_v2 = vld [vmem:[#allocation2 + $0x38] sm:$0xff] }
 0x532   : > { %4883 = vst.msk [vmem:[#allocation2 + $0x58] sm:$0xff] %vm4871_vm3, %v4846_v14  ;;  %6957 = vmatmul.mubr.msk.f32.gmra.mrb[158].mxu0 %vm10225_vm11, %v4895_v2  ;;  %v4848_v16 = vpop.permute.xlu0 %4847  ;;  %v4896_v61 = vld [vmem:[#allocation2 + $0x40] sm:$0xff]  ;;  %vm10241_vm11 = vmmov %vm10231_vm0 }
 0x533   : > { %4884 = vst.msk [vmem:[#allocation2 + $0x60] sm:$0xff] %vm4871_vm3, %v4848_v16  ;;  %6959 = vmatprep.mubr.msk.f32.mxu0 %vm10226_vm12, %v4896_v61  ;;  %vm10242_vm12 = vmmov %vm10231_vm0 }
 0x535   : > { %v4850_v29 = vpop.permute.xlu1 %4849  ;;  %v4897_v60 = vld [vmem:[#allocation2 + $0x48] sm:$0xff] }
 0x536   : > { %4885 = vst.msk [vmem:[#allocation2 + $0x68] sm:$0xff] %vm4871_vm3, %v4850_v29  ;;  %6960 = vmatmul.mubr.msk.f32.gmra.mrb[160].mxu0 %vm10227_vm13, %v4897_v60  ;;  %v4852_v12 = vpop.permute.xlu0 %4851  ;;  %v4898_v58 = vld [vmem:[#allocation2 + $0x50] sm:$0xff]  ;;  %vm10243_vm13 = vmmov %vm10231_vm0 }
 0x537   : > { %4886 = vst.msk [vmem:[#allocation2 + $0x70] sm:$0xff] %vm4871_vm3, %v4852_v12  ;;  %6962 = vmatprep.mubr.msk.f32.mxu0 %vm10228_vm14, %v4898_v58  ;;  %vm10244_vm14 = vmmov %vm10231_vm0 }
 0x539   : > { %v4854_v46 = vpop.permute.xlu1 %4853  ;;  %v4899_v17 = vld [vmem:[#allocation2 + $0x58] sm:$0xff] }
 0x53a   : > { %4887 = vst.msk [vmem:[#allocation2 + $0x78] sm:$0xff] %vm4871_vm3, %v4854_v46  ;;  %6963 = vmatmul.mubr.msk.f32.gmra.mrb[162].mxu0 %vm10229_vm15, %v4899_v17  ;;  %v4900_v30 = vld [vmem:[#allocation2 + $0x60] sm:$0xff]  ;;  %vm10234_vm3 = vmmov %vm10231_vm0 }
 0x53b   : > { %6965 = vmatprep.mubr.msk.f32.mxu0 %vm10230_vm2, %v4900_v30  ;;  %vm10245_vm15 = vmmov %vm10231_vm0 }
 0x53c   : > { %vm10246_vm2 = vmmov %vm10231_vm0 }
 0x53d   : > { %v4901_v10 = vld [vmem:[#allocation2 + $0x68] sm:$0xff] }
 0x53e   : > { %6966 = vmatmul.mubr.msk.f32.gmra.mrb[164].mxu0 %vm10231_vm0, %v4901_v10  ;;  %v4902_v28 = vld [vmem:[#allocation2 + $0x70] sm:$0xff] }
 0x53f   : > { %6968 = vmatprep.mubr.msk.f32.mxu0 %vm10232_vm1, %v4902_v28  ;;  %vm10247_vm1 = vmmov %vm10231_vm0 }
 0x541   : > { %v4903_v33 = vld [vmem:[#allocation2 + $0x78] sm:$0xff] }
 0x542   : > { %6969 = vmatmul.mubr.msk.f32.gmra.mrb[166].mxu0 %vm10233_vm4, %v4903_v33  ;;  %vm10248_vm4 = vmmov %vm10231_vm0 }
 0x5f9   : > { %v6949_v0 = vpop.f32.mrb[152].mxu0 }
 0x5fa   : > { %v5035_v45 = vadd.f32 %v6949_v0, %v5568_v44  ;;  %v5029_v41 = vpop.f32.mrb[153].mxu0 }
 0x5fb   : > { %v5030_v31 = vadd.f32 %v5568_v44, %v5029_v41 }
 0x5fc   : > { %5109 = vst.msk [vmem:[%s9976_s9 + $0x8] sm:$0xff] %vm10234_vm3, %v5035_v45 }
 0x5fd   : > { %5108 = vst.msk [vmem:[%s9976_s9] sm:$0xff] %vm10235_vm5, %v5030_v31  ;;  %v6952_v38 = vpop.f32.mrb[154].mxu0 }
 0x5fe   : > { %v5045_v34 = vadd.f32 %v6952_v38, %v5568_v44  ;;  %v5039_v35 = vpop.f32.mrb[155].mxu0 }
 0x5ff   : > { %v5040_v19 = vadd.f32 %v5568_v44, %v5039_v35 }
 0x600   : > { %5111 = vst.msk [vmem:[%s9976_s9 + $0x18] sm:$0xff] %vm10236_vm6, %v5045_v34 }
 0x601   : > { %5110 = vst.msk [vmem:[%s9976_s9 + $0x10] sm:$0xff] %vm10237_vm7, %v5040_v19  ;;  %v6955_v9 = vpop.f32.mrb[156].mxu0 }
 0x602   : > { %v5055_v8 = vadd.f32 %v6955_v9, %v5568_v44  ;;  %v5049_v36 = vpop.f32.mrb[157].mxu0 }
 0x603   : > { %v5050_v32 = vadd.f32 %v5568_v44, %v5049_v36 }
 0x604   : > { %5113 = vst.msk [vmem:[%s9976_s9 + $0x28] sm:$0xff] %vm10238_vm8, %v5055_v8 }
 0x605   : > { %5112 = vst.msk [vmem:[%s9976_s9 + $0x20] sm:$0xff] %vm10239_vm9, %v5050_v32  ;;  %v6958_v63 = vpop.f32.mrb[158].mxu0 }
 0x606   : > { %v5065_v39 = vadd.f32 %v6958_v63, %v5568_v44  ;;  %v5059_v21 = vpop.f32.mrb[159].mxu0 }
 0x607   : > { %v5060_v27 = vadd.f32 %v5568_v44, %v5059_v21 }
 0x608   : > { %5115 = vst.msk [vmem:[%s9976_s9 + $0x38] sm:$0xff] %vm10240_vm10, %v5065_v39 }
 0x609   : > { %5114 = vst.msk [vmem:[%s9976_s9 + $0x30] sm:$0xff] %vm10241_vm11, %v5060_v27  ;;  %v6961_v24 = vpop.f32.mrb[160].mxu0 }
 0x60a   : > { %v5075_v6 = vadd.f32 %v6961_v24, %v5568_v44  ;;  %v5069_v5 = vpop.f32.mrb[161].mxu0 }
 0x60b   : > { %v5070_v15 = vadd.f32 %v5568_v44, %v5069_v5 }
 0x60c   : > { %5117 = vst.msk [vmem:[%s9976_s9 + $0x48] sm:$0xff] %vm10242_vm12, %v5075_v6 }
 0x60d   : > { %5116 = vst.msk [vmem:[%s9976_s9 + $0x40] sm:$0xff] %vm10243_vm13, %v5070_v15  ;;  %v6964_v51 = vpop.f32.mrb[162].mxu0 }
 0x60e   : > { %v5085_v37 = vadd.f32 %v6964_v51, %v5568_v44  ;;  %v5079_v18 = vpop.f32.mrb[163].mxu0 }
 0x60f   : > { %v5080_v4 = vadd.f32 %v5568_v44, %v5079_v18 }
 0x610   : > { %5119 = vst.msk [vmem:[%s9976_s9 + $0x58] sm:$0xff] %vm10244_vm14, %v5085_v37 }
 0x611   : > { %5118 = vst.msk [vmem:[%s9976_s9 + $0x50] sm:$0xff] %vm10245_vm15, %v5080_v4  ;;  %v6967_v25 = vpop.f32.mrb[164].mxu0 }
 0x612   : > { %v5095_v57 = vadd.f32 %v6967_v25, %v5568_v44  ;;  %v5089_v48 = vpop.f32.mrb[165].mxu0 }
 0x613   : > { %v5090_v7 = vadd.f32 %v5568_v44, %v5089_v48 }
 0x614   : > { %5121 = vst.msk [vmem:[%s9976_s9 + $0x68] sm:$0xff] %vm10246_vm2, %v5095_v57 }
 0x615   : > { %5120 = vst.msk [vmem:[%s9976_s9 + $0x60] sm:$0xff] %vm10231_vm0, %v5090_v7  ;;  %v6970_v62 = vpop.f32.mrb[166].mxu0 }
 0x616   : > { %v5105_v55 = vadd.f32 %v6970_v62, %v5568_v44  ;;  %v5099_v11 = vpop.f32.mrb[167].mxu0 }
 0x617   : > { %v5100_v56 = vadd.f32 %v5568_v44, %v5099_v11 }
 0x618   : > { %5123 = vst.msk [vmem:[%s9976_s9 + $0x78] sm:$0xff] %vm10247_vm1, %v5105_v55 }
 0x619   : > { %5122 = vst.msk [vmem:[%s9976_s9 + $0x70] sm:$0xff] %vm10248_vm4, %v5100_v56 }
 0x61a PF: > { %s16_s21 = sadd.s32 1, %s7672_s21  }
 0x61b   : > { %p13_p4 = scmp.ge.s32.totalorder %s16_s21, 4  }
 0x61d   :  { %15 = sbr.rel (!%p13_p4) target bundleno = 1 (0x1), region = 82 }

</bundles_post_ra>
